<compile_context>
chip_gen: v6e
topology: v6e:2x2x1
jax: 0.10.0
libtpu: 0.0.40
codegen_flags: <defaults>
</compile_context>

<pallas_src>
import numpy as np
import jax
import jax.numpy as jnp
from jax.experimental import pallas as pl
from jax.experimental.pallas import tpu as pltpu

CHANNEL_LIST = [64, 128, 256, 512]
CLASS_NUM = 2
PAD_W = 128                      # lane-dense width for the tiny logit outputs
_SQRT1_2 = 0.7071067811865476


# ----------------------------------------------------------------------------
# small in-kernel helpers
# ----------------------------------------------------------------------------
def _gelu_exact(x):
    # PyTorch nn.GELU default (erf formulation).
    return 0.5 * x * (1.0 + jax.lax.erf(x * _SQRT1_2))


def _head_vpu(pooled, wt_ref, b_pad_ref, n_cls, out_width):
    """(1, C) @ W^T + b on the VPU.

    Returns (cols, row): `cols` is a python list of n_cls (1, 1) logits (used
    for the softmax / layer-attention math); `row` is a lane-dense
    (1, out_width) slab with the logits in the first n_cls lanes and zeros
    elsewhere (the bias is zero-padded by the wrapper).  Avoids a degenerate
    (1, C) @ (C, 2) MXU matmul and 2-lane masked stores.
    """
    lane = jax.lax.broadcasted_iota(jnp.int32, (1, out_width), 1)
    b_row = b_pad_ref[...]                                     # (1, out_width)
    row = b_row
    cols = []
    for n in range(n_cls):
        w_row = wt_ref[pl.ds(n, 1), :]                         # (1, C)
        wc = jnp.sum(pooled * w_row, axis=-1, keepdims=True)   # (1, 1)
        b_n = jnp.sum(jnp.where(lane == n, b_row, 0.0), axis=-1, keepdims=True)
        cols.append(wc + b_n)
        row = row + jnp.where(lane == n, wc, 0.0)
    return cols, row


def _softmax_list(vals):
    """Numerically-stable softmax over a python list of (1, 1) scalars."""
    m = vals[0]
    for v in vals[1:]:
        m = jnp.maximum(m, v)
    es = [jnp.exp(v - m) for v in vals]
    den = es[0]
    for e in es[1:]:
        den = den + e
    return [e / den for e in es]


def _window_max_compact(z, s_out):
    # z: (4*s_out, C) with rows ordered window-position-major (p*s_out + q).
    # s_out is a multiple of 8 -> the four slices are sublane-tile aligned.
    return jnp.maximum(
        jnp.maximum(z[0:s_out], z[s_out:2 * s_out]),
        jnp.maximum(z[2 * s_out:3 * s_out], z[3 * s_out:4 * s_out]))


def _window_max_rolled(z, s_out):
    """Window max for the final (2x2) grid, kept replicated over 8 rows.

    z: (16, C) with rows ordered p*4 + q (p = window position, q = output
    pixel).  Result row r holds max_p z[p*4 + (r mod 4)].  One aligned
    half-slice max (VPU) + one sublane roll (XLU slot, effectively free)
    replaces the previous 4-iteration masked where/reduce loop.
    """
    assert z.shape[0] == 16 and s_out == 4, "only a 2x2 final grid is handled"
    m1 = jnp.maximum(z[0:8], z[8:16])                   # window positions {p, p+2}
    m2 = jnp.maximum(m1, pltpu.roll(m1, shift=s_out, axis=0))
    return m2                                           # (8, C), period-4 replicated


# ----------------------------------------------------------------------------
# wrapper-side layout helpers (pure plumbing)
# ----------------------------------------------------------------------------
def _hierarchical_perm(h, w, n_levels):
    """Permutation of the flattened (h*w) spatial index to hierarchical order.

    new_index(y, x) = p1*(hw/4) + p2*(hw/16) + ... + p_k*(hw/4^k) + r, where
    p_j is the position inside the 2x2 block at pool level j and r is the
    row-major index on the final (h/2^k, w/2^k) grid.  With this order the four
    2x2-window elements of every pooling stage form four contiguous, equally
    sized row blocks, so each in-kernel maxpool is a max over aligned slices.
    """
    perm = np.empty(h * w, dtype=np.int32)
    for y in range(h):
        for x in range(w):
            yy, xx = y, x
            size = h * w
            new = 0
            for _ in range(n_levels):
                size //= 4
                new += ((yy % 2) * 2 + (xx % 2)) * size
                yy //= 2
                xx //= 2
            new += yy * (w >> n_levels) + xx
            perm[new] = y * w + x
    return perm


def init_params(key):
    n_lev = len(CHANNEL_LIST)
    ks = jax.random.split(key, 2 * n_lev + 2 * (n_lev - 1) + 2)
    k = iter(range(len(ks)))
    params = {"cls_w": [], "cls_b": [], "ds_w": [], "ds_b": []}
    for c in CHANNEL_LIST:
        # nn.Linear(c, CLASS_NUM): weight (CLASS_NUM, c), bias (CLASS_NUM,)
        params["cls_w"].append(
            jax.random.normal(ks[next(k)], (CLASS_NUM, c), jnp.float32) * 0.05)
        params["cls_b"].append(
            jax.random.normal(ks[next(k)], (1, CLASS_NUM), jnp.float32) * 0.05)
    for j in range(n_lev - 1):
        cin, cout = CHANNEL_LIST[j], CHANNEL_LIST[j + 1]
        # nn.Conv2d(cin, cout, 1) weight (cout, cin, 1, 1), stored transposed (cin, cout)
        params["ds_w"].append(
            jax.random.normal(ks[next(k)], (cin, cout), jnp.float32) * 0.05)
        params["ds_b"].append(
            jax.random.normal(ks[next(k)], (1, cout), jnp.float32) * 0.05)
    params["fc_w"] = jax.random.normal(
        ks[next(k)], (CLASS_NUM, CHANNEL_LIST[-1]), jnp.float32) * 0.05
    params["fc_b"] = jax.random.normal(
        ks[next(k)], (1, CLASS_NUM), jnp.float32) * 0.05
    return params


# ----------------------------------------------------------------------------
# fused forward pass
# ----------------------------------------------------------------------------
def fpn_forward(feature_list_nchw, b, t, params):
    n_lev = len(feature_list_nchw)
    n_ds = n_lev - 1
    n_cls = params["fc_w"].shape[0]

    # ---- wrapper-side layout: NCHW -> (B, T, HW, C) with hierarchical
    #      (2x2-window-major) spatial ordering; cast to bf16 for DMA/MXU. ----
    # TODO(synk): fold this permutation/transpose into the producer layout (or an
    # in-kernel scalar-prefetch gather); at realistic sizes it is an extra HBM copy.
    xs, hw_sizes, spatial = [], [], []
    for i, f in enumerate(feature_list_nchw):
        bt, c, h, w = f.shape
        assert bt == b * t
        spatial.append((h, w))
        x = f.reshape(b, t, c, h, w).transpose(0, 1, 3, 4, 2).reshape(b, t, h * w, c)
        perm = _hierarchical_perm(h, w, n_ds - i)
        xs.append(x[:, :, perm, :].astype(jnp.bfloat16))
        hw_sizes.append(h * w)

    for i in range(n_ds):
        h, w = spatial[i]
        h2, w2 = spatial[i + 1]
        # TODO(synk): MaxPool2d(ceil_mode=True) with odd H/W is not handled; even dims assumed.
        assert h % 2 == 0 and w % 2 == 0 and h2 == h // 2 and w2 == w // 2
    for i in range(1, n_lev - 1):
        # intermediate fusion outputs must be sublane(8)-aligned for the
        # compact window-max slices
        assert hw_sizes[i] % 8 == 0

    hw_last = hw_sizes[-1]
    replicate_last = (hw_last % 8) != 0
    if replicate_last:
        # Replicate the last level spatially (row r <-> pixel r mod hw_last) so
        # the final fusion stage can keep its pooled result window-replicated on
        # 8 sublane-aligned rows; the trailing spatial mean is unchanged by
        # uniform replication.
        assert hw_last == 4, "only a 2x2 final grid is handled"  # TODO(synk): generalize
        xs[-1] = jnp.tile(xs[-1], (1, 1, 8 // hw_last, 1))

    # ---- parameters: ds weights in bf16 (MXU inputs), everything else f32;
    #      tiny (1, n_cls) biases zero-padded to lane-dense (1, PAD_W). ----
    cls_w = [w.astype(jnp.float32) for w in params["cls_w"]]        # (n_cls, C_i)
    ds_w = [w.astype(jnp.bfloat16) for w in params["ds_w"]]         # (C_in, C_out)
    ds_b = [v.astype(jnp.float32) for v in params["ds_b"]]          # (1, C_out)
    fc_w = params["fc_w"].astype(jnp.float32)                       # (n_cls, C_last)

    def _pad_bias(bias):
        out = jnp.zeros((1, PAD_W), jnp.float32)
        return out.at[:, :bias.shape[1]].set(bias.astype(jnp.float32))

    cls_b = [_pad_bias(v) for v in params["cls_b"]]                 # (1, PAD_W)
    fc_b = _pad_bias(params["fc_b"])                                # (1, PAD_W)

    # ------------------------------------------------------------------------
    def kernel(*refs):
        x_refs = refs[0:n_lev]
        cw_refs = refs[n_lev:2 * n_lev]
        cb_refs = refs[2 * n_lev:3 * n_lev]
        dw_refs = refs[3 * n_lev:3 * n_lev + n_ds]
        db_refs = refs[3 * n_lev + n_ds:3 * n_lev + 2 * n_ds]
        fcw_ref = refs[3 * n_lev + 2 * n_ds]
        fcb_ref = refs[3 * n_lev + 2 * n_ds + 1]
        out_ref = refs[3 * n_lev + 2 * n_ds + 2]
        sfpn_ref = refs[3 * n_lev + 2 * n_ds + 3]
        acc_refs = refs[3 * n_lev + 2 * n_ds + 4:]

        t_idx = pl.program_id(1)

        # ---- temporal-sum accumulation (every grid step, f32 accumulators) ----
        @pl.when(t_idx == 0)
        def _init():
            for i in range(n_lev):
                acc_refs[i][...] = jnp.zeros_like(acc_refs[i])

        for i in range(n_lev):
            acc_refs[i][...] += x_refs[i][0, 0].astype(jnp.float32)

        # ---- epilogue: heads + layer attention + fusion chain (last t only) ----
        @pl.when(t_idx == pl.num_programs(1) - 1)
        def _epilogue():
            sums = [acc_refs[i][...] for i in range(n_lev)]

            # per-level heads: AdaptiveAvgPool(1,1) + Linear (VPU)
            cols_per_level = []
            sfpn_row = None
            for i in range(n_lev):
                pooled = jnp.mean(sums[i], axis=0, keepdims=True)       # (1, C_i)
                cols, row = _head_vpu(pooled, cw_refs[i], cb_refs[i], n_cls, PAD_W)
                cols_per_level.append(cols)
                sfpn_row = row if sfpn_row is None else sfpn_row + row
            sfpn_ref[0] = sfpn_row                                       # (1, PAD_W)

            # layer-attention weights: dif = softmax_over_levels(sum_c |p_c - p_0|)
            difs_raw = []
            for cols in cols_per_level:
                p = _softmax_list(cols)
                d = jnp.zeros_like(p[0])
                for n in range(1, n_cls):
                    d = d + jnp.abs(p[n] - p[0])
                difs_raw.append(d)
            dif = _softmax_list(difs_raw)                                # (1,1) each, > 0

            # fusion chain: conv1x1 (ONE MXU matmul over all 4 window positions)
            #   -> 2x2 maxpool (aligned slices / sublane roll) -> GELU -> scaled skip
            cur = sums[0]
            for j in range(n_ds):
                w = dw_refs[j][...]                                      # (Cin, Cout) bf16
                bias = db_refs[j][...]                                   # (1, Cout) f32
                z = jnp.dot(cur.astype(jnp.bfloat16), w,
                            preferred_element_type=jnp.float32)          # (R, Cout) f32
                s_out = z.shape[0] // 4
                if s_out % 8 == 0:
                    zmax = _window_max_compact(z, s_out)
                else:
                    zmax = _window_max_rolled(z, s_out)                  # 8 replicated rows
                if j == 0:
                    # dif[0] > 0 (softmax output) and the conv bias is window-
                    # independent, so both commute with the window max and are
                    # applied once here (hoisted out of the window reduction).
                    zmax = zmax * dif[0]
                zmax = zmax + bias
                cur = _gelu_exact(zmax) + sums[j + 1] * dif[j + 1]

            pooled = jnp.mean(cur, axis=0, keepdims=True)                # (1, C_last)
            _, out_row = _head_vpu(pooled, fcw_ref, fcb_ref, n_cls, PAD_W)
            out_ref[0] = out_row                                         # (1, PAD_W)

    # ------------------------------------------------------------------------
    const_arrays = (list(cls_w) + list(cls_b) + list(ds_w) + list(ds_b)
                    + [fc_w, fc_b])
    in_arrays = list(xs) + const_arrays

    def _x_spec(x):
        hw, c = x.shape[2], x.shape[3]
        return pl.BlockSpec((1, 1, hw, c), lambda bi, ti: (bi, ti, 0, 0))

    def _const_spec(a):
        nd = a.ndim
        return pl.BlockSpec(tuple(a.shape), lambda bi, ti, _n=nd: (0,) * _n)

    in_specs = [_x_spec(x) for x in xs] + [_const_spec(a) for a in const_arrays]
    out_specs = (pl.BlockSpec((1, 1, PAD_W), lambda bi, ti: (bi, 0, 0)),
                 pl.BlockSpec((1, 1, PAD_W), lambda bi, ti: (bi, 0, 0)))
    out_shape = (jax.ShapeDtypeStruct((b, 1, PAD_W), jnp.float32),
                 jax.ShapeDtypeStruct((b, 1, PAD_W), jnp.float32))
    scratch_shapes = [pltpu.VMEM((x.shape[2], x.shape[3]), jnp.float32) for x in xs]

    # explicit scoped-VMEM limit computed from the actual block sizes (+ headroom)
    per_step_in = sum(int(np.prod(x.shape[2:])) * x.dtype.itemsize for x in xs)
    const_bytes = sum(int(np.prod(a.shape)) * a.dtype.itemsize for a in const_arrays)
    scratch_bytes = sum(int(np.prod(x.shape[2:])) * 4 for x in xs)
    est = 2 * per_step_in + 2 * const_bytes + scratch_bytes + 2 * (2 * PAD_W * 4)
    vmem_limit = int(min(64 * 2 ** 20, max(8 * 2 ** 20, 4 * est)))

    out3, sfpn3 = pl.pallas_call(
        kernel,
        grid=(b, t),
        out_shape=out_shape,
        in_specs=in_specs,
        out_specs=out_specs,
        scratch_shapes=scratch_shapes,
        compiler_params=pltpu.CompilerParams(
            dimension_semantics=("parallel", "arbitrary"),
            vmem_limit_bytes=vmem_limit),
    )(*in_arrays)
    return out3[:, 0, :n_cls], sfpn3[:, 0, :n_cls]


if __name__ == "__main__":
    b, t = 2, 2
    base_hw = 16
    key = jax.random.PRNGKey(0)
    pkey, *fkeys = jax.random.split(key, 1 + len(CHANNEL_LIST))
    params = init_params(pkey)

    feature_list = []
    for i, c in enumerate(CHANNEL_LIST):
        h = w = base_hw // (2 ** i)                 # 16, 8, 4, 2
        feature_list.append(
            jax.random.normal(fkeys[i], (b * t, c, h, w), jnp.float32))

    out, out_sfpn = fpn_forward(feature_list, b, t, params)
    jax.block_until_ready((out, out_sfpn))
    assert out.shape == (b, CLASS_NUM)
    assert out_sfpn.shape == (b, CLASS_NUM)
    print("KERNEL_OK")
</pallas_src>

<mosaic_0001>
module attributes {stable_mosaic.version = 11 : i64} {
  func.func @kernel(%arg0: i32, %arg1: i32, %arg2: memref<1x1x256x64xbf16, #tpu.memory_space<vmem>>, %arg3: memref<1x1x64x128xbf16, #tpu.memory_space<vmem>>, %arg4: memref<1x1x16x256xbf16, #tpu.memory_space<vmem>>, %arg5: memref<1x1x8x512xbf16, #tpu.memory_space<vmem>>, %arg6: memref<2x64xf32, #tpu.memory_space<vmem>>, %arg7: memref<2x128xf32, #tpu.memory_space<vmem>>, %arg8: memref<2x256xf32, #tpu.memory_space<vmem>>, %arg9: memref<2x512xf32, #tpu.memory_space<vmem>>, %arg10: memref<1x128xf32, #tpu.memory_space<vmem>>, %arg11: memref<1x128xf32, #tpu.memory_space<vmem>>, %arg12: memref<1x128xf32, #tpu.memory_space<vmem>>, %arg13: memref<1x128xf32, #tpu.memory_space<vmem>>, %arg14: memref<64x128xbf16, #tpu.memory_space<vmem>>, %arg15: memref<128x256xbf16, #tpu.memory_space<vmem>>, %arg16: memref<256x512xbf16, #tpu.memory_space<vmem>>, %arg17: memref<1x128xf32, #tpu.memory_space<vmem>>, %arg18: memref<1x256xf32, #tpu.memory_space<vmem>>, %arg19: memref<1x512xf32, #tpu.memory_space<vmem>>, %arg20: memref<2x512xf32, #tpu.memory_space<vmem>>, %arg21: memref<1x128xf32, #tpu.memory_space<vmem>>, %arg22: memref<1x1x128xf32, #tpu.memory_space<vmem>>, %arg23: memref<1x1x128xf32, #tpu.memory_space<vmem>>, %arg24: memref<256x64xf32, #tpu.memory_space<vmem>>, %arg25: memref<64x128xf32, #tpu.memory_space<vmem>>, %arg26: memref<16x256xf32, #tpu.memory_space<vmem>>, %arg27: memref<8x512xf32, #tpu.memory_space<vmem>>) attributes {dimension_semantics = [#tpu.dimension_semantics<parallel>, #tpu.dimension_semantics<arbitrary>], iteration_bounds = array<i64: 2, 2>, scalar_prefetch = 0 : i64, scratch_operands = 4 : i64, tpu.core_type = #tpu.core_type<tc>, window_params = [{transform_indices = @transform_0, window_bounds = array<i64: 1, 1, 256, 64>}, {transform_indices = @transform_1, window_bounds = array<i64: 1, 1, 64, 128>}, {transform_indices = @transform_2, window_bounds = array<i64: 1, 1, 16, 256>}, {transform_indices = @transform_3, window_bounds = array<i64: 1, 1, 8, 512>}, {pipeline_mode = #tpu.pipeline_mode<synchronous>, transform_indices = @transform_4, window_bounds = array<i64: 2, 64>}, {pipeline_mode = #tpu.pipeline_mode<synchronous>, transform_indices = @transform_5, window_bounds = array<i64: 2, 128>}, {pipeline_mode = #tpu.pipeline_mode<synchronous>, transform_indices = @transform_6, window_bounds = array<i64: 2, 256>}, {pipeline_mode = #tpu.pipeline_mode<synchronous>, transform_indices = @transform_7, window_bounds = array<i64: 2, 512>}, {pipeline_mode = #tpu.pipeline_mode<synchronous>, transform_indices = @transform_8, window_bounds = array<i64: 1, 128>}, {pipeline_mode = #tpu.pipeline_mode<synchronous>, transform_indices = @transform_9, window_bounds = array<i64: 1, 128>}, {pipeline_mode = #tpu.pipeline_mode<synchronous>, transform_indices = @transform_10, window_bounds = array<i64: 1, 128>}, {pipeline_mode = #tpu.pipeline_mode<synchronous>, transform_indices = @transform_11, window_bounds = array<i64: 1, 128>}, {pipeline_mode = #tpu.pipeline_mode<synchronous>, transform_indices = @transform_12, window_bounds = array<i64: 64, 128>}, {pipeline_mode = #tpu.pipeline_mode<synchronous>, transform_indices = @transform_13, window_bounds = array<i64: 128, 256>}, {pipeline_mode = #tpu.pipeline_mode<synchronous>, transform_indices = @transform_14, window_bounds = array<i64: 256, 512>}, {pipeline_mode = #tpu.pipeline_mode<synchronous>, transform_indices = @transform_15, window_bounds = array<i64: 1, 128>}, {pipeline_mode = #tpu.pipeline_mode<synchronous>, transform_indices = @transform_16, window_bounds = array<i64: 1, 256>}, {pipeline_mode = #tpu.pipeline_mode<synchronous>, transform_indices = @transform_17, window_bounds = array<i64: 1, 512>}, {pipeline_mode = #tpu.pipeline_mode<synchronous>, transform_indices = @transform_18, window_bounds = array<i64: 2, 512>}, {pipeline_mode = #tpu.pipeline_mode<synchronous>, transform_indices = @transform_19, window_bounds = array<i64: 1, 128>}, {transform_indices = @transform_20, window_bounds = array<i64: 1, 1, 128>}, {transform_indices = @transform_21, window_bounds = array<i64: 1, 1, 128>}]} {
    %c0_i32 = arith.constant 0 : i32
    %0 = arith.cmpi eq, %arg1, %c0_i32 : i32
    %1 = arith.extui %0 : i1 to i32
    %c0_i32_0 = arith.constant 0 : i32
    %2 = arith.cmpi ne, %1, %c0_i32_0 : i32
    scf.if %2 {
      %cst = arith.constant 0.000000e+00 : f32
      %30 = vector.broadcast %cst : f32 to vector<256x64xf32>
      %c0_33 = arith.constant 0 : index
      %c0_34 = arith.constant 0 : index
      %31 = vector.load %arg24[%c0_33, %c0_34] : memref<256x64xf32, #tpu.memory_space<vmem>>, vector<256x64xf32>
      tpu.vector_store %arg24[%c0_33, %c0_34], %30 {strides = array<i32>} : memref<256x64xf32, #tpu.memory_space<vmem>>, vector<256x64xf32>,
      %cst_35 = arith.constant 0.000000e+00 : f32
      %32 = vector.broadcast %cst_35 : f32 to vector<64x128xf32>
      %c0_36 = arith.constant 0 : index
      %c0_37 = arith.constant 0 : index
      %33 = vector.load %arg25[%c0_36, %c0_37] : memref<64x128xf32, #tpu.memory_space<vmem>>, vector<64x128xf32>
      tpu.vector_store %arg25[%c0_36, %c0_37], %32 {strides = array<i32>} : memref<64x128xf32, #tpu.memory_space<vmem>>, vector<64x128xf32>,
      %cst_38 = arith.constant 0.000000e+00 : f32
      %34 = vector.broadcast %cst_38 : f32 to vector<16x256xf32>
      %c0_39 = arith.constant 0 : index
      %c0_40 = arith.constant 0 : index
      %35 = vector.load %arg26[%c0_39, %c0_40] : memref<16x256xf32, #tpu.memory_space<vmem>>, vector<16x256xf32>
      tpu.vector_store %arg26[%c0_39, %c0_40], %34 {strides = array<i32>} : memref<16x256xf32, #tpu.memory_space<vmem>>, vector<16x256xf32>,
      %cst_41 = arith.constant 0.000000e+00 : f32
      %36 = vector.broadcast %cst_41 : f32 to vector<8x512xf32>
      %c0_42 = arith.constant 0 : index
      %c0_43 = arith.constant 0 : index
      %37 = vector.load %arg27[%c0_42, %c0_43] : memref<8x512xf32, #tpu.memory_space<vmem>>, vector<8x512xf32>
      tpu.vector_store %arg27[%c0_42, %c0_43], %36 {strides = array<i32>} : memref<8x512xf32, #tpu.memory_space<vmem>>, vector<8x512xf32>,
    } else {
    }
    %c0 = arith.constant 0 : index
    %c0_1 = arith.constant 0 : index
    %3 = vector.load %arg24[%c0, %c0_1] : memref<256x64xf32, #tpu.memory_space<vmem>>, vector<256x64xf32>
    %c0_2 = arith.constant 0 : index
    %c0_3 = arith.constant 0 : index
    %c0_4 = arith.constant 0 : index
    %c0_5 = arith.constant 0 : index
    %4 = vector.load %arg2[%c0_2, %c0_3, %c0_4, %c0_5] : memref<1x1x256x64xbf16, #tpu.memory_space<vmem>>, vector<1x1x256x64xbf16>
    %5 = vector.shape_cast %4 : vector<1x1x256x64xbf16> to vector<256x64xbf16>
    %6 = arith.extf %5 : vector<256x64xbf16> to vector<256x64xf32>
    %7 = arith.addf %3, %6 : vector<256x64xf32>
    %c0_6 = arith.constant 0 : index
    %c0_7 = arith.constant 0 : index
    %8 = vector.load %arg24[%c0_6, %c0_7] : memref<256x64xf32, #tpu.memory_space<vmem>>, vector<256x64xf32>
    tpu.vector_store %arg24[%c0_6, %c0_7], %7 {strides = array<i32>} : memref<256x64xf32, #tpu.memory_space<vmem>>, vector<256x64xf32>,
    %c0_8 = arith.constant 0 : index
    %c0_9 = arith.constant 0 : index
    %9 = vector.load %arg25[%c0_8, %c0_9] : memref<64x128xf32, #tpu.memory_space<vmem>>, vector<64x128xf32>
    %c0_10 = arith.constant 0 : index
    %c0_11 = arith.constant 0 : index
    %c0_12 = arith.constant 0 : index
    %c0_13 = arith.constant 0 : index
    %10 = vector.load %arg3[%c0_10, %c0_11, %c0_12, %c0_13] : memref<1x1x64x128xbf16, #tpu.memory_space<vmem>>, vector<1x1x64x128xbf16>
    %11 = vector.shape_cast %10 : vector<1x1x64x128xbf16> to vector<64x128xbf16>
    %12 = arith.extf %11 : vector<64x128xbf16> to vector<64x128xf32>
    %13 = arith.addf %9, %12 : vector<64x128xf32>
    %c0_14 = arith.constant 0 : index
    %c0_15 = arith.constant 0 : index
    %14 = vector.load %arg25[%c0_14, %c0_15] : memref<64x128xf32, #tpu.memory_space<vmem>>, vector<64x128xf32>
    tpu.vector_store %arg25[%c0_14, %c0_15], %13 {strides = array<i32>} : memref<64x128xf32, #tpu.memory_space<vmem>>, vector<64x128xf32>,
    %c0_16 = arith.constant 0 : index
    %c0_17 = arith.constant 0 : index
    %15 = vector.load %arg26[%c0_16, %c0_17] : memref<16x256xf32, #tpu.memory_space<vmem>>, vector<16x256xf32>
    %c0_18 = arith.constant 0 : index
    %c0_19 = arith.constant 0 : index
    %c0_20 = arith.constant 0 : index
    %c0_21 = arith.constant 0 : index
    %16 = vector.load %arg4[%c0_18, %c0_19, %c0_20, %c0_21] : memref<1x1x16x256xbf16, #tpu.memory_space<vmem>>, vector<1x1x16x256xbf16>
    %17 = vector.shape_cast %16 : vector<1x1x16x256xbf16> to vector<16x256xbf16>
    %18 = arith.extf %17 : vector<16x256xbf16> to vector<16x256xf32>
    %19 = arith.addf %15, %18 : vector<16x256xf32>
    %c0_22 = arith.constant 0 : index
    %c0_23 = arith.constant 0 : index
    %20 = vector.load %arg26[%c0_22, %c0_23] : memref<16x256xf32, #tpu.memory_space<vmem>>, vector<16x256xf32>
    tpu.vector_store %arg26[%c0_22, %c0_23], %19 {strides = array<i32>} : memref<16x256xf32, #tpu.memory_space<vmem>>, vector<16x256xf32>,
    %c0_24 = arith.constant 0 : index
    %c0_25 = arith.constant 0 : index
    %21 = vector.load %arg27[%c0_24, %c0_25] : memref<8x512xf32, #tpu.memory_space<vmem>>, vector<8x512xf32>
    %c0_26 = arith.constant 0 : index
    %c0_27 = arith.constant 0 : index
    %c0_28 = arith.constant 0 : index
    %c0_29 = arith.constant 0 : index
    %22 = vector.load %arg5[%c0_26, %c0_27, %c0_28, %c0_29] : memref<1x1x8x512xbf16, #tpu.memory_space<vmem>>, vector<1x1x8x512xbf16>
    %23 = vector.shape_cast %22 : vector<1x1x8x512xbf16> to vector<8x512xbf16>
    %24 = arith.extf %23 : vector<8x512xbf16> to vector<8x512xf32>
    %25 = arith.addf %21, %24 : vector<8x512xf32>
    %c0_30 = arith.constant 0 : index
    %c0_31 = arith.constant 0 : index
    %26 = vector.load %arg27[%c0_30, %c0_31] : memref<8x512xf32, #tpu.memory_space<vmem>>, vector<8x512xf32>
    tpu.vector_store %arg27[%c0_30, %c0_31], %25 {strides = array<i32>} : memref<8x512xf32, #tpu.memory_space<vmem>>, vector<8x512xf32>,
    %c1_i32 = arith.constant 1 : i32
    %27 = arith.cmpi eq, %arg1, %c1_i32 : i32
    %28 = arith.extui %27 : i1 to i32
    %c0_i32_32 = arith.constant 0 : i32
    %29 = arith.cmpi ne, %28, %c0_i32_32 : i32
    scf.if %29 {
      %c0_33 = arith.constant 0 : index
      %c0_34 = arith.constant 0 : index
      %30 = vector.load %arg24[%c0_33, %c0_34] : memref<256x64xf32, #tpu.memory_space<vmem>>, vector<256x64xf32>
      %c0_35 = arith.constant 0 : index
      %c0_36 = arith.constant 0 : index
      %31 = vector.load %arg25[%c0_35, %c0_36] : memref<64x128xf32, #tpu.memory_space<vmem>>, vector<64x128xf32>
      %c0_37 = arith.constant 0 : index
      %c0_38 = arith.constant 0 : index
      %32 = vector.load %arg26[%c0_37, %c0_38] : memref<16x256xf32, #tpu.memory_space<vmem>>, vector<16x256xf32>
      %c0_39 = arith.constant 0 : index
      %c0_40 = arith.constant 0 : index
      %33 = vector.load %arg27[%c0_39, %c0_40] : memref<8x512xf32, #tpu.memory_space<vmem>>, vector<8x512xf32>
      %cst = arith.constant dense<0.000000e+00> : vector<64xf32>
      %34 = vector.multi_reduction <add>, %30, %cst [0] : vector<256x64xf32> to vector<64xf32>
      %35 = vector.shape_cast %34 : vector<64xf32> to vector<1x64xf32>
      %cst_41 = arith.constant 2.560000e+02 : f32
      %36 = vector.broadcast %cst_41 : f32 to vector<1x64xf32>
      %37 = arith.divf %35, %36 : vector<1x64xf32>
      %38 = tpu.iota {dimensions = array<i32: 1>} : vector<1x128xi32>
      %c0_42 = arith.constant 0 : index
      %c0_43 = arith.constant 0 : index
      %39 = vector.load %arg10[%c0_42, %c0_43] : memref<1x128xf32, #tpu.memory_space<vmem>>, vector<1x128xf32>
      %c0_44 = arith.constant 0 : index
      %c0_45 = arith.constant 0 : index
      %40 = vector.load %arg6[%c0_44, %c0_45] : memref<2x64xf32, #tpu.memory_space<vmem>>, vector<1x64xf32>
      %41 = arith.mulf %37, %40 : vector<1x64xf32>
      %cst_46 = arith.constant dense<0.000000e+00> : vector<1xf32>
      %42 = vector.multi_reduction <add>, %41, %cst_46 [1] : vector<1x64xf32> to vector<1xf32>
      %43 = vector.shape_cast %42 : vector<1xf32> to vector<1x1xf32>
      %c0_i32_47 = arith.constant 0 : i32
      %44 = vector.broadcast %c0_i32_47 : i32 to vector<1x128xi32>
      %45 = arith.cmpi eq, %38, %44 : vector<1x128xi32>
      %cst_48 = arith.constant 0.000000e+00 : f32
      %46 = vector.broadcast %cst_48 : f32 to vector<1x128xf32>
      %47 = arith.select %45, %39, %46 : vector<1x128xi1>, vector<1x128xf32>
      %cst_49 = arith.constant dense<0.000000e+00> : vector<1xf32>
      %48 = vector.multi_reduction <add>, %47, %cst_49 [1] : vector<1x128xf32> to vector<1xf32>
      %49 = vector.shape_cast %48 : vector<1xf32> to vector<1x1xf32>
      %50 = arith.addf %43, %49 : vector<1x1xf32>
      %c0_i32_50 = arith.constant 0 : i32
      %51 = vector.broadcast %c0_i32_50 : i32 to vector<1x128xi32>
      %52 = arith.cmpi eq, %38, %51 : vector<1x128xi32>
      %cst_51 = arith.constant 0.000000e+00 : f32
      %53 = vector.shape_cast %43 : vector<1x1xf32> to vector<1x1xf32>
      %54 = vector.broadcast %53 : vector<1x1xf32> to vector<1x128xf32>
      %55 = vector.broadcast %cst_51 : f32 to vector<1x128xf32>
      %56 = arith.select %52, %54, %55 : vector<1x128xi1>, vector<1x128xf32>
      %57 = arith.addf %39, %56 : vector<1x128xf32>
      %c1 = arith.constant 1 : index
      %c0_52 = arith.constant 0 : index
      %58 = vector.load %arg6[%c1, %c0_52] : memref<2x64xf32, #tpu.memory_space<vmem>>, vector<1x64xf32>
      %59 = arith.mulf %37, %58 : vector<1x64xf32>
      %cst_53 = arith.constant dense<0.000000e+00> : vector<1xf32>
      %60 = vector.multi_reduction <add>, %59, %cst_53 [1] : vector<1x64xf32> to vector<1xf32>
      %61 = vector.shape_cast %60 : vector<1xf32> to vector<1x1xf32>
      %c1_i32_54 = arith.constant 1 : i32
      %62 = vector.broadcast %c1_i32_54 : i32 to vector<1x128xi32>
      %63 = arith.cmpi eq, %38, %62 : vector<1x128xi32>
      %cst_55 = arith.constant 0.000000e+00 : f32
      %64 = vector.broadcast %cst_55 : f32 to vector<1x128xf32>
      %65 = arith.select %63, %39, %64 : vector<1x128xi1>, vector<1x128xf32>
      %cst_56 = arith.constant dense<0.000000e+00> : vector<1xf32>
      %66 = vector.multi_reduction <add>, %65, %cst_56 [1] : vector<1x128xf32> to vector<1xf32>
      %67 = vector.shape_cast %66 : vector<1xf32> to vector<1x1xf32>
      %68 = arith.addf %61, %67 : vector<1x1xf32>
      %c1_i32_57 = arith.constant 1 : i32
      %69 = vector.broadcast %c1_i32_57 : i32 to vector<1x128xi32>
      %70 = arith.cmpi eq, %38, %69 : vector<1x128xi32>
      %cst_58 = arith.constant 0.000000e+00 : f32
      %71 = vector.shape_cast %61 : vector<1x1xf32> to vector<1x1xf32>
      %72 = vector.broadcast %71 : vector<1x1xf32> to vector<1x128xf32>
      %73 = vector.broadcast %cst_58 : f32 to vector<1x128xf32>
      %74 = arith.select %70, %72, %73 : vector<1x128xi1>, vector<1x128xf32>
      %75 = arith.addf %57, %74 : vector<1x128xf32>
      %cst_59 = arith.constant dense<0.000000e+00> : vector<128xf32>
      %76 = vector.multi_reduction <add>, %31, %cst_59 [0] : vector<64x128xf32> to vector<128xf32>
      %77 = vector.shape_cast %76 : vector<128xf32> to vector<1x128xf32>
      %cst_60 = arith.constant 6.400000e+01 : f32
      %78 = vector.broadcast %cst_60 : f32 to vector<1x128xf32>
      %79 = arith.divf %77, %78 : vector<1x128xf32>
      %80 = tpu.iota {dimensions = array<i32: 1>} : vector<1x128xi32>
      %c0_61 = arith.constant 0 : index
      %c0_62 = arith.constant 0 : index
      %81 = vector.load %arg11[%c0_61, %c0_62] : memref<1x128xf32, #tpu.memory_space<vmem>>, vector<1x128xf32>
      %c0_63 = arith.constant 0 : index
      %c0_64 = arith.constant 0 : index
      %82 = vector.load %arg7[%c0_63, %c0_64] : memref<2x128xf32, #tpu.memory_space<vmem>>, vector<1x128xf32>
      %83 = arith.mulf %79, %82 : vector<1x128xf32>
      %cst_65 = arith.constant dense<0.000000e+00> : vector<1xf32>
      %84 = vector.multi_reduction <add>, %83, %cst_65 [1] : vector<1x128xf32> to vector<1xf32>
      %85 = vector.shape_cast %84 : vector<1xf32> to vector<1x1xf32>
      %c0_i32_66 = arith.constant 0 : i32
      %86 = vector.broadcast %c0_i32_66 : i32 to vector<1x128xi32>
      %87 = arith.cmpi eq, %80, %86 : vector<1x128xi32>
      %cst_67 = arith.constant 0.000000e+00 : f32
      %88 = vector.broadcast %cst_67 : f32 to vector<1x128xf32>
      %89 = arith.select %87, %81, %88 : vector<1x128xi1>, vector<1x128xf32>
      %cst_68 = arith.constant dense<0.000000e+00> : vector<1xf32>
      %90 = vector.multi_reduction <add>, %89, %cst_68 [1] : vector<1x128xf32> to vector<1xf32>
      %91 = vector.shape_cast %90 : vector<1xf32> to vector<1x1xf32>
      %92 = arith.addf %85, %91 : vector<1x1xf32>
      %c0_i32_69 = arith.constant 0 : i32
      %93 = vector.broadcast %c0_i32_69 : i32 to vector<1x128xi32>
      %94 = arith.cmpi eq, %80, %93 : vector<1x128xi32>
      %cst_70 = arith.constant 0.000000e+00 : f32
      %95 = vector.shape_cast %85 : vector<1x1xf32> to vector<1x1xf32>
      %96 = vector.broadcast %95 : vector<1x1xf32> to vector<1x128xf32>
      %97 = vector.broadcast %cst_70 : f32 to vector<1x128xf32>
      %98 = arith.select %94, %96, %97 : vector<1x128xi1>, vector<1x128xf32>
      %99 = arith.addf %81, %98 : vector<1x128xf32>
      %c1_71 = arith.constant 1 : index
      %c0_72 = arith.constant 0 : index
      %100 = vector.load %arg7[%c1_71, %c0_72] : memref<2x128xf32, #tpu.memory_space<vmem>>, vector<1x128xf32>
      %101 = arith.mulf %79, %100 : vector<1x128xf32>
      %cst_73 = arith.constant dense<0.000000e+00> : vector<1xf32>
      %102 = vector.multi_reduction <add>, %101, %cst_73 [1] : vector<1x128xf32> to vector<1xf32>
      %103 = vector.shape_cast %102 : vector<1xf32> to vector<1x1xf32>
      %c1_i32_74 = arith.constant 1 : i32
      %104 = vector.broadcast %c1_i32_74 : i32 to vector<1x128xi32>
      %105 = arith.cmpi eq, %80, %104 : vector<1x128xi32>
      %cst_75 = arith.constant 0.000000e+00 : f32
      %106 = vector.broadcast %cst_75 : f32 to vector<1x128xf32>
      %107 = arith.select %105, %81, %106 : vector<1x128xi1>, vector<1x128xf32>
      %cst_76 = arith.constant dense<0.000000e+00> : vector<1xf32>
      %108 = vector.multi_reduction <add>, %107, %cst_76 [1] : vector<1x128xf32> to vector<1xf32>
      %109 = vector.shape_cast %108 : vector<1xf32> to vector<1x1xf32>
      %110 = arith.addf %103, %109 : vector<1x1xf32>
      %c1_i32_77 = arith.constant 1 : i32
      %111 = vector.broadcast %c1_i32_77 : i32 to vector<1x128xi32>
      %112 = arith.cmpi eq, %80, %111 : vector<1x128xi32>
      %cst_78 = arith.constant 0.000000e+00 : f32
      %113 = vector.shape_cast %103 : vector<1x1xf32> to vector<1x1xf32>
      %114 = vector.broadcast %113 : vector<1x1xf32> to vector<1x128xf32>
      %115 = vector.broadcast %cst_78 : f32 to vector<1x128xf32>
      %116 = arith.select %112, %114, %115 : vector<1x128xi1>, vector<1x128xf32>
      %117 = arith.addf %99, %116 : vector<1x128xf32>
      %118 = arith.addf %75, %117 : vector<1x128xf32>
      %cst_79 = arith.constant dense<0.000000e+00> : vector<256xf32>
      %119 = vector.multi_reduction <add>, %32, %cst_79 [0] : vector<16x256xf32> to vector<256xf32>
      %120 = vector.shape_cast %119 : vector<256xf32> to vector<1x256xf32>
      %cst_80 = arith.constant 1.600000e+01 : f32
      %121 = vector.broadcast %cst_80 : f32 to vector<1x256xf32>
      %122 = arith.divf %120, %121 : vector<1x256xf32>
      %123 = tpu.iota {dimensions = array<i32: 1>} : vector<1x128xi32>
      %c0_81 = arith.constant 0 : index
      %c0_82 = arith.constant 0 : index
      %124 = vector.load %arg12[%c0_81, %c0_82] : memref<1x128xf32, #tpu.memory_space<vmem>>, vector<1x128xf32>
      %c0_83 = arith.constant 0 : index
      %c0_84 = arith.constant 0 : index
      %125 = vector.load %arg8[%c0_83, %c0_84] : memref<2x256xf32, #tpu.memory_space<vmem>>, vector<1x256xf32>
      %126 = arith.mulf %122, %125 : vector<1x256xf32>
      %cst_85 = arith.constant dense<0.000000e+00> : vector<1xf32>
      %127 = vector.multi_reduction <add>, %126, %cst_85 [1] : vector<1x256xf32> to vector<1xf32>
      %128 = vector.shape_cast %127 : vector<1xf32> to vector<1x1xf32>
      %c0_i32_86 = arith.constant 0 : i32
      %129 = vector.broadcast %c0_i32_86 : i32 to vector<1x128xi32>
      %130 = arith.cmpi eq, %123, %129 : vector<1x128xi32>
      %cst_87 = arith.constant 0.000000e+00 : f32
      %131 = vector.broadcast %cst_87 : f32 to vector<1x128xf32>
      %132 = arith.select %130, %124, %131 : vector<1x128xi1>, vector<1x128xf32>
      %cst_88 = arith.constant dense<0.000000e+00> : vector<1xf32>
      %133 = vector.multi_reduction <add>, %132, %cst_88 [1] : vector<1x128xf32> to vector<1xf32>
      %134 = vector.shape_cast %133 : vector<1xf32> to vector<1x1xf32>
      %135 = arith.addf %128, %134 : vector<1x1xf32>
      %c0_i32_89 = arith.constant 0 : i32
      %136 = vector.broadcast %c0_i32_89 : i32 to vector<1x128xi32>
      %137 = arith.cmpi eq, %123, %136 : vector<1x128xi32>
      %cst_90 = arith.constant 0.000000e+00 : f32
      %138 = vector.shape_cast %128 : vector<1x1xf32> to vector<1x1xf32>
      %139 = vector.broadcast %138 : vector<1x1xf32> to vector<1x128xf32>
      %140 = vector.broadcast %cst_90 : f32 to vector<1x128xf32>
      %141 = arith.select %137, %139, %140 : vector<1x128xi1>, vector<1x128xf32>
      %142 = arith.addf %124, %141 : vector<1x128xf32>
      %c1_91 = arith.constant 1 : index
      %c0_92 = arith.constant 0 : index
      %143 = vector.load %arg8[%c1_91, %c0_92] : memref<2x256xf32, #tpu.memory_space<vmem>>, vector<1x256xf32>
      %144 = arith.mulf %122, %143 : vector<1x256xf32>
      %cst_93 = arith.constant dense<0.000000e+00> : vector<1xf32>
      %145 = vector.multi_reduction <add>, %144, %cst_93 [1] : vector<1x256xf32> to vector<1xf32>
      %146 = vector.shape_cast %145 : vector<1xf32> to vector<1x1xf32>
      %c1_i32_94 = arith.constant 1 : i32
      %147 = vector.broadcast %c1_i32_94 : i32 to vector<1x128xi32>
      %148 = arith.cmpi eq, %123, %147 : vector<1x128xi32>
      %cst_95 = arith.constant 0.000000e+00 : f32
      %149 = vector.broadcast %cst_95 : f32 to vector<1x128xf32>
      %150 = arith.select %148, %124, %149 : vector<1x128xi1>, vector<1x128xf32>
      %cst_96 = arith.constant dense<0.000000e+00> : vector<1xf32>
      %151 = vector.multi_reduction <add>, %150, %cst_96 [1] : vector<1x128xf32> to vector<1xf32>
      %152 = vector.shape_cast %151 : vector<1xf32> to vector<1x1xf32>
      %153 = arith.addf %146, %152 : vector<1x1xf32>
      %c1_i32_97 = arith.constant 1 : i32
      %154 = vector.broadcast %c1_i32_97 : i32 to vector<1x128xi32>
      %155 = arith.cmpi eq, %123, %154 : vector<1x128xi32>
      %cst_98 = arith.constant 0.000000e+00 : f32
      %156 = vector.shape_cast %146 : vector<1x1xf32> to vector<1x1xf32>
      %157 = vector.broadcast %156 : vector<1x1xf32> to vector<1x128xf32>
      %158 = vector.broadcast %cst_98 : f32 to vector<1x128xf32>
      %159 = arith.select %155, %157, %158 : vector<1x128xi1>, vector<1x128xf32>
      %160 = arith.addf %142, %159 : vector<1x128xf32>
      %161 = arith.addf %118, %160 : vector<1x128xf32>
      %cst_99 = arith.constant dense<0.000000e+00> : vector<512xf32>
      %162 = vector.multi_reduction <add>, %33, %cst_99 [0] : vector<8x512xf32> to vector<512xf32>
      %163 = vector.shape_cast %162 : vector<512xf32> to vector<1x512xf32>
      %cst_100 = arith.constant 8.000000e+00 : f32
      %164 = vector.broadcast %cst_100 : f32 to vector<1x512xf32>
      %165 = arith.divf %163, %164 : vector<1x512xf32>
      %166 = tpu.iota {dimensions = array<i32: 1>} : vector<1x128xi32>
      %c0_101 = arith.constant 0 : index
      %c0_102 = arith.constant 0 : index
      %167 = vector.load %arg13[%c0_101, %c0_102] : memref<1x128xf32, #tpu.memory_space<vmem>>, vector<1x128xf32>
      %c0_103 = arith.constant 0 : index
      %c0_104 = arith.constant 0 : index
      %168 = vector.load %arg9[%c0_103, %c0_104] : memref<2x512xf32, #tpu.memory_space<vmem>>, vector<1x512xf32>
      %169 = arith.mulf %165, %168 : vector<1x512xf32>
      %cst_105 = arith.constant dense<0.000000e+00> : vector<1xf32>
      %170 = vector.multi_reduction <add>, %169, %cst_105 [1] : vector<1x512xf32> to vector<1xf32>
      %171 = vector.shape_cast %170 : vector<1xf32> to vector<1x1xf32>
      %c0_i32_106 = arith.constant 0 : i32
      %172 = vector.broadcast %c0_i32_106 : i32 to vector<1x128xi32>
      %173 = arith.cmpi eq, %166, %172 : vector<1x128xi32>
      %cst_107 = arith.constant 0.000000e+00 : f32
      %174 = vector.broadcast %cst_107 : f32 to vector<1x128xf32>
      %175 = arith.select %173, %167, %174 : vector<1x128xi1>, vector<1x128xf32>
      %cst_108 = arith.constant dense<0.000000e+00> : vector<1xf32>
      %176 = vector.multi_reduction <add>, %175, %cst_108 [1] : vector<1x128xf32> to vector<1xf32>
      %177 = vector.shape_cast %176 : vector<1xf32> to vector<1x1xf32>
      %178 = arith.addf %171, %177 : vector<1x1xf32>
      %c0_i32_109 = arith.constant 0 : i32
      %179 = vector.broadcast %c0_i32_109 : i32 to vector<1x128xi32>
      %180 = arith.cmpi eq, %166, %179 : vector<1x128xi32>
      %cst_110 = arith.constant 0.000000e+00 : f32
      %181 = vector.shape_cast %171 : vector<1x1xf32> to vector<1x1xf32>
      %182 = vector.broadcast %181 : vector<1x1xf32> to vector<1x128xf32>
      %183 = vector.broadcast %cst_110 : f32 to vector<1x128xf32>
      %184 = arith.select %180, %182, %183 : vector<1x128xi1>, vector<1x128xf32>
      %185 = arith.addf %167, %184 : vector<1x128xf32>
      %c1_111 = arith.constant 1 : index
      %c0_112 = arith.constant 0 : index
      %186 = vector.load %arg9[%c1_111, %c0_112] : memref<2x512xf32, #tpu.memory_space<vmem>>, vector<1x512xf32>
      %187 = arith.mulf %165, %186 : vector<1x512xf32>
      %cst_113 = arith.constant dense<0.000000e+00> : vector<1xf32>
      %188 = vector.multi_reduction <add>, %187, %cst_113 [1] : vector<1x512xf32> to vector<1xf32>
      %189 = vector.shape_cast %188 : vector<1xf32> to vector<1x1xf32>
      %c1_i32_114 = arith.constant 1 : i32
      %190 = vector.broadcast %c1_i32_114 : i32 to vector<1x128xi32>
      %191 = arith.cmpi eq, %166, %190 : vector<1x128xi32>
      %cst_115 = arith.constant 0.000000e+00 : f32
      %192 = vector.broadcast %cst_115 : f32 to vector<1x128xf32>
      %193 = arith.select %191, %167, %192 : vector<1x128xi1>, vector<1x128xf32>
      %cst_116 = arith.constant dense<0.000000e+00> : vector<1xf32>
      %194 = vector.multi_reduction <add>, %193, %cst_116 [1] : vector<1x128xf32> to vector<1xf32>
      %195 = vector.shape_cast %194 : vector<1xf32> to vector<1x1xf32>
      %196 = arith.addf %189, %195 : vector<1x1xf32>
      %c1_i32_117 = arith.constant 1 : i32
      %197 = vector.broadcast %c1_i32_117 : i32 to vector<1x128xi32>
      %198 = arith.cmpi eq, %166, %197 : vector<1x128xi32>
      %cst_118 = arith.constant 0.000000e+00 : f32
      %199 = vector.shape_cast %189 : vector<1x1xf32> to vector<1x1xf32>
      %200 = vector.broadcast %199 : vector<1x1xf32> to vector<1x128xf32>
      %201 = vector.broadcast %cst_118 : f32 to vector<1x128xf32>
      %202 = arith.select %198, %200, %201 : vector<1x128xi1>, vector<1x128xf32>
      %203 = arith.addf %185, %202 : vector<1x128xf32>
      %204 = arith.addf %161, %203 : vector<1x128xf32>
      %c0_119 = arith.constant 0 : index
      %c0_120 = arith.constant 0 : index
      %c0_121 = arith.constant 0 : index
      %205 = vector.load %arg23[%c0_119, %c0_120, %c0_121] : memref<1x1x128xf32, #tpu.memory_space<vmem>>, vector<1x1x128xf32>
      %206 = vector.shape_cast %205 : vector<1x1x128xf32> to vector<1x128xf32>
      %207 = vector.shape_cast %204 : vector<1x128xf32> to vector<1x1x128xf32>
      tpu.vector_store %arg23[%c0_119, %c0_120, %c0_121], %207 {strides = array<i32>} : memref<1x1x128xf32, #tpu.memory_space<vmem>>, vector<1x1x128xf32>,
      %208 = arith.maximumf %50, %68 : vector<1x1xf32>
      %209 = arith.subf %50, %208 : vector<1x1xf32>
      %210 = math.exp %209 : vector<1x1xf32>
      %211 = arith.subf %68, %208 : vector<1x1xf32>
      %212 = math.exp %211 : vector<1x1xf32>
      %213 = arith.addf %210, %212 : vector<1x1xf32>
      %214 = arith.divf %210, %213 : vector<1x1xf32>
      %215 = arith.divf %212, %213 : vector<1x1xf32>
      %cst_122 = arith.constant 0.000000e+00 : f32
      %216 = vector.broadcast %cst_122 : f32 to vector<1x1xf32>
      %217 = arith.subf %215, %214 : vector<1x1xf32>
      %218 = math.absf %217 : vector<1x1xf32>
      %219 = arith.addf %216, %218 : vector<1x1xf32>
      %220 = arith.maximumf %92, %110 : vector<1x1xf32>
      %221 = arith.subf %92, %220 : vector<1x1xf32>
      %222 = math.exp %221 : vector<1x1xf32>
      %223 = arith.subf %110, %220 : vector<1x1xf32>
      %224 = math.exp %223 : vector<1x1xf32>
      %225 = arith.addf %222, %224 : vector<1x1xf32>
      %226 = arith.divf %222, %225 : vector<1x1xf32>
      %227 = arith.divf %224, %225 : vector<1x1xf32>
      %cst_123 = arith.constant 0.000000e+00 : f32
      %228 = vector.broadcast %cst_123 : f32 to vector<1x1xf32>
      %229 = arith.subf %227, %226 : vector<1x1xf32>
      %230 = math.absf %229 : vector<1x1xf32>
      %231 = arith.addf %228, %230 : vector<1x1xf32>
      %232 = arith.maximumf %135, %153 : vector<1x1xf32>
      %233 = arith.subf %135, %232 : vector<1x1xf32>
      %234 = math.exp %233 : vector<1x1xf32>
      %235 = arith.subf %153, %232 : vector<1x1xf32>
      %236 = math.exp %235 : vector<1x1xf32>
      %237 = arith.addf %234, %236 : vector<1x1xf32>
      %238 = arith.divf %234, %237 : vector<1x1xf32>
      %239 = arith.divf %236, %237 : vector<1x1xf32>
      %cst_124 = arith.constant 0.000000e+00 : f32
      %240 = vector.broadcast %cst_124 : f32 to vector<1x1xf32>
      %241 = arith.subf %239, %238 : vector<1x1xf32>
      %242 = math.absf %241 : vector<1x1xf32>
      %243 = arith.addf %240, %242 : vector<1x1xf32>
      %244 = arith.maximumf %178, %196 : vector<1x1xf32>
      %245 = arith.subf %178, %244 : vector<1x1xf32>
      %246 = math.exp %245 : vector<1x1xf32>
      %247 = arith.subf %196, %244 : vector<1x1xf32>
      %248 = math.exp %247 : vector<1x1xf32>
      %249 = arith.addf %246, %248 : vector<1x1xf32>
      %250 = arith.divf %246, %249 : vector<1x1xf32>
      %251 = arith.divf %248, %249 : vector<1x1xf32>
      %cst_125 = arith.constant 0.000000e+00 : f32
      %252 = vector.broadcast %cst_125 : f32 to vector<1x1xf32>
      %253 = arith.subf %251, %250 : vector<1x1xf32>
      %254 = math.absf %253 : vector<1x1xf32>
      %255 = arith.addf %252, %254 : vector<1x1xf32>
      %256 = arith.maximumf %219, %231 : vector<1x1xf32>
      %257 = arith.maximumf %256, %243 : vector<1x1xf32>
      %258 = arith.maximumf %257, %255 : vector<1x1xf32>
      %259 = arith.subf %219, %258 : vector<1x1xf32>
      %260 = math.exp %259 : vector<1x1xf32>
      %261 = arith.subf %231, %258 : vector<1x1xf32>
      %262 = math.exp %261 : vector<1x1xf32>
      %263 = arith.subf %243, %258 : vector<1x1xf32>
      %264 = math.exp %263 : vector<1x1xf32>
      %265 = arith.subf %255, %258 : vector<1x1xf32>
      %266 = math.exp %265 : vector<1x1xf32>
      %267 = arith.addf %260, %262 : vector<1x1xf32>
      %268 = arith.addf %267, %264 : vector<1x1xf32>
      %269 = arith.addf %268, %266 : vector<1x1xf32>
      %270 = arith.divf %260, %269 : vector<1x1xf32>
      %271 = arith.divf %262, %269 : vector<1x1xf32>
      %272 = arith.divf %264, %269 : vector<1x1xf32>
      %273 = arith.divf %266, %269 : vector<1x1xf32>
      %c0_126 = arith.constant 0 : index
      %c0_127 = arith.constant 0 : index
      %274 = vector.load %arg14[%c0_126, %c0_127] : memref<64x128xbf16, #tpu.memory_space<vmem>>, vector<64x128xbf16>
      %c0_128 = arith.constant 0 : index
      %c0_129 = arith.constant 0 : index
      %275 = vector.load %arg17[%c0_128, %c0_129] : memref<1x128xf32, #tpu.memory_space<vmem>>, vector<1x128xf32>
      %276 = arith.truncf %30 : vector<256x64xf32> to vector<256x64xbf16>
      %cst_130 = arith.constant dense<0.000000e+00> : vector<256x128xf32>
      %277 = tpu.matmul %276, %274, %cst_130 {dimension_numbers = #tpu.dot_dimension_numbers<[1], [0], [0], [1], [0, 0, 1, 1], [], []>} : vector<256x64xbf16>, vector<64x128xbf16>, vector<256x128xf32> -> vector<256x128xf32>
      %278 = vector.extract_strided_slice %277 {offsets = [0, 0], sizes = [64, 128], strides = [1, 1]} : vector<256x128xf32> to vector<64x128xf32>
      %279 = vector.extract_strided_slice %277 {offsets = [64, 0], sizes = [64, 128], strides = [1, 1]} : vector<256x128xf32> to vector<64x128xf32>
      %280 = arith.maximumf %278, %279 : vector<64x128xf32>
      %281 = vector.extract_strided_slice %277 {offsets = [128, 0], sizes = [64, 128], strides = [1, 1]} : vector<256x128xf32> to vector<64x128xf32>
      %282 = vector.extract_strided_slice %277 {offsets = [192, 0], sizes = [64, 128], strides = [1, 1]} : vector<256x128xf32> to vector<64x128xf32>
      %283 = arith.maximumf %281, %282 : vector<64x128xf32>
      %284 = arith.maximumf %280, %283 : vector<64x128xf32>
      %285 = vector.broadcast %270 : vector<1x1xf32> to vector<64x128xf32>
      %286 = arith.mulf %284, %285 : vector<64x128xf32>
      %287 = vector.broadcast %275 : vector<1x128xf32> to vector<64x128xf32>
      %288 = arith.addf %286, %287 : vector<64x128xf32>
      %cst_131 = arith.constant 5.000000e-01 : f32
      %289 = vector.broadcast %cst_131 : f32 to vector<64x128xf32>
      %290 = arith.mulf %289, %288 : vector<64x128xf32>
      %cst_132 = arith.constant 0.707106769 : f32
      %291 = vector.broadcast %cst_132 : f32 to vector<64x128xf32>
      %292 = arith.mulf %288, %291 : vector<64x128xf32>
      %293 = math.erf %292 : vector<64x128xf32>
      %cst_133 = arith.constant 1.000000e+00 : f32
      %294 = vector.broadcast %cst_133 : f32 to vector<64x128xf32>
      %295 = arith.addf %294, %293 : vector<64x128xf32>
      %296 = arith.mulf %290, %295 : vector<64x128xf32>
      %297 = vector.broadcast %271 : vector<1x1xf32> to vector<64x128xf32>
      %298 = arith.mulf %31, %297 : vector<64x128xf32>
      %299 = arith.addf %296, %298 : vector<64x128xf32>
      %c0_134 = arith.constant 0 : index
      %c0_135 = arith.constant 0 : index
      %300 = vector.load %arg15[%c0_134, %c0_135] : memref<128x256xbf16, #tpu.memory_space<vmem>>, vector<128x256xbf16>
      %c0_136 = arith.constant 0 : index
      %c0_137 = arith.constant 0 : index
      %301 = vector.load %arg18[%c0_136, %c0_137] : memref<1x256xf32, #tpu.memory_space<vmem>>, vector<1x256xf32>
      %302 = arith.truncf %299 : vector<64x128xf32> to vector<64x128xbf16>
      %cst_138 = arith.constant dense<0.000000e+00> : vector<64x256xf32>
      %303 = tpu.matmul %302, %300, %cst_138 {dimension_numbers = #tpu.dot_dimension_numbers<[1], [0], [0], [1], [0, 0, 1, 1], [], []>} : vector<64x128xbf16>, vector<128x256xbf16>, vector<64x256xf32> -> vector<64x256xf32>
      %304 = vector.extract_strided_slice %303 {offsets = [0, 0], sizes = [16, 256], strides = [1, 1]} : vector<64x256xf32> to vector<16x256xf32>
      %305 = vector.extract_strided_slice %303 {offsets = [16, 0], sizes = [16, 256], strides = [1, 1]} : vector<64x256xf32> to vector<16x256xf32>
      %306 = arith.maximumf %304, %305 : vector<16x256xf32>
      %307 = vector.extract_strided_slice %303 {offsets = [32, 0], sizes = [16, 256], strides = [1, 1]} : vector<64x256xf32> to vector<16x256xf32>
      %308 = vector.extract_strided_slice %303 {offsets = [48, 0], sizes = [16, 256], strides = [1, 1]} : vector<64x256xf32> to vector<16x256xf32>
      %309 = arith.maximumf %307, %308 : vector<16x256xf32>
      %310 = arith.maximumf %306, %309 : vector<16x256xf32>
      %311 = vector.broadcast %301 : vector<1x256xf32> to vector<16x256xf32>
      %312 = arith.addf %310, %311 : vector<16x256xf32>
      %cst_139 = arith.constant 5.000000e-01 : f32
      %313 = vector.broadcast %cst_139 : f32 to vector<16x256xf32>
      %314 = arith.mulf %313, %312 : vector<16x256xf32>
      %cst_140 = arith.constant 0.707106769 : f32
      %315 = vector.broadcast %cst_140 : f32 to vector<16x256xf32>
      %316 = arith.mulf %312, %315 : vector<16x256xf32>
      %317 = math.erf %316 : vector<16x256xf32>
      %cst_141 = arith.constant 1.000000e+00 : f32
      %318 = vector.broadcast %cst_141 : f32 to vector<16x256xf32>
      %319 = arith.addf %318, %317 : vector<16x256xf32>
      %320 = arith.mulf %314, %319 : vector<16x256xf32>
      %321 = vector.broadcast %272 : vector<1x1xf32> to vector<16x256xf32>
      %322 = arith.mulf %32, %321 : vector<16x256xf32>
      %323 = arith.addf %320, %322 : vector<16x256xf32>
      %c0_142 = arith.constant 0 : index
      %c0_143 = arith.constant 0 : index
      %324 = vector.load %arg16[%c0_142, %c0_143] : memref<256x512xbf16, #tpu.memory_space<vmem>>, vector<256x512xbf16>
      %c0_144 = arith.constant 0 : index
      %c0_145 = arith.constant 0 : index
      %325 = vector.load %arg19[%c0_144, %c0_145] : memref<1x512xf32, #tpu.memory_space<vmem>>, vector<1x512xf32>
      %326 = arith.truncf %323 : vector<16x256xf32> to vector<16x256xbf16>
      %cst_146 = arith.constant dense<0.000000e+00> : vector<16x512xf32>
      %327 = tpu.matmul %326, %324, %cst_146 {dimension_numbers = #tpu.dot_dimension_numbers<[1], [0], [0], [1], [0, 0, 1, 1], [], []>} : vector<16x256xbf16>, vector<256x512xbf16>, vector<16x512xf32> -> vector<16x512xf32>
      %328 = vector.extract_strided_slice %327 {offsets = [0, 0], sizes = [8, 512], strides = [1, 1]} : vector<16x512xf32> to vector<8x512xf32>
      %329 = vector.extract_strided_slice %327 {offsets = [8, 0], sizes = [8, 512], strides = [1, 1]} : vector<16x512xf32> to vector<8x512xf32>
      %330 = arith.maximumf %328, %329 : vector<8x512xf32>
      %c4_i32 = arith.constant 4 : i32
      %331 = tpu.dynamic_rotate %330 by %c4_i32 dim 0 : vector<8x512xf32>, i32 -> vector<8x512xf32>
      %332 = arith.maximumf %330, %331 : vector<8x512xf32>
      %333 = vector.broadcast %325 : vector<1x512xf32> to vector<8x512xf32>
      %334 = arith.addf %332, %333 : vector<8x512xf32>
      %cst_147 = arith.constant 5.000000e-01 : f32
      %335 = vector.broadcast %cst_147 : f32 to vector<8x512xf32>
      %336 = arith.mulf %335, %334 : vector<8x512xf32>
      %cst_148 = arith.constant 0.707106769 : f32
      %337 = vector.broadcast %cst_148 : f32 to vector<8x512xf32>
      %338 = arith.mulf %334, %337 : vector<8x512xf32>
      %339 = math.erf %338 : vector<8x512xf32>
      %cst_149 = arith.constant 1.000000e+00 : f32
      %340 = vector.broadcast %cst_149 : f32 to vector<8x512xf32>
      %341 = arith.addf %340, %339 : vector<8x512xf32>
      %342 = arith.mulf %336, %341 : vector<8x512xf32>
      %343 = vector.broadcast %273 : vector<1x1xf32> to vector<8x512xf32>
      %344 = arith.mulf %33, %343 : vector<8x512xf32>
      %345 = arith.addf %342, %344 : vector<8x512xf32>
      %cst_150 = arith.constant dense<0.000000e+00> : vector<512xf32>
      %346 = vector.multi_reduction <add>, %345, %cst_150 [0] : vector<8x512xf32> to vector<512xf32>
      %347 = vector.shape_cast %346 : vector<512xf32> to vector<1x512xf32>
      %cst_151 = arith.constant 8.000000e+00 : f32
      %348 = vector.broadcast %cst_151 : f32 to vector<1x512xf32>
      %349 = arith.divf %347, %348 : vector<1x512xf32>
      %350 = tpu.iota {dimensions = array<i32: 1>} : vector<1x128xi32>
      %c0_152 = arith.constant 0 : index
      %c0_153 = arith.constant 0 : index
      %351 = vector.load %arg21[%c0_152, %c0_153] : memref<1x128xf32, #tpu.memory_space<vmem>>, vector<1x128xf32>
      %c0_154 = arith.constant 0 : index
      %c0_155 = arith.constant 0 : index
      %352 = vector.load %arg20[%c0_154, %c0_155] : memref<2x512xf32, #tpu.memory_space<vmem>>, vector<1x512xf32>
      %353 = arith.mulf %349, %352 : vector<1x512xf32>
      %cst_156 = arith.constant dense<0.000000e+00> : vector<1xf32>
      %354 = vector.multi_reduction <add>, %353, %cst_156 [1] : vector<1x512xf32> to vector<1xf32>
      %355 = vector.shape_cast %354 : vector<1xf32> to vector<1x1xf32>
      %c0_i32_157 = arith.constant 0 : i32
      %356 = vector.broadcast %c0_i32_157 : i32 to vector<1x128xi32>
      %357 = arith.cmpi eq, %350, %356 : vector<1x128xi32>
      %cst_158 = arith.constant 0.000000e+00 : f32
      %358 = vector.shape_cast %355 : vector<1x1xf32> to vector<1x1xf32>
      %359 = vector.broadcast %358 : vector<1x1xf32> to vector<1x128xf32>
      %360 = vector.broadcast %cst_158 : f32 to vector<1x128xf32>
      %361 = arith.select %357, %359, %360 : vector<1x128xi1>, vector<1x128xf32>
      %362 = arith.addf %351, %361 : vector<1x128xf32>
      %c1_159 = arith.constant 1 : index
      %c0_160 = arith.constant 0 : index
      %363 = vector.load %arg20[%c1_159, %c0_160] : memref<2x512xf32, #tpu.memory_space<vmem>>, vector<1x512xf32>
      %364 = arith.mulf %349, %363 : vector<1x512xf32>
      %cst_161 = arith.constant dense<0.000000e+00> : vector<1xf32>
      %365 = vector.multi_reduction <add>, %364, %cst_161 [1] : vector<1x512xf32> to vector<1xf32>
      %366 = vector.shape_cast %365 : vector<1xf32> to vector<1x1xf32>
      %c1_i32_162 = arith.constant 1 : i32
      %367 = vector.broadcast %c1_i32_162 : i32 to vector<1x128xi32>
      %368 = arith.cmpi eq, %350, %367 : vector<1x128xi32>
      %cst_163 = arith.constant 0.000000e+00 : f32
      %369 = vector.shape_cast %366 : vector<1x1xf32> to vector<1x1xf32>
      %370 = vector.broadcast %369 : vector<1x1xf32> to vector<1x128xf32>
      %371 = vector.broadcast %cst_163 : f32 to vector<1x128xf32>
      %372 = arith.select %368, %370, %371 : vector<1x128xi1>, vector<1x128xf32>
      %373 = arith.addf %362, %372 : vector<1x128xf32>
      %c0_164 = arith.constant 0 : index
      %c0_165 = arith.constant 0 : index
      %c0_166 = arith.constant 0 : index
      %374 = vector.load %arg22[%c0_164, %c0_165, %c0_166] : memref<1x1x128xf32, #tpu.memory_space<vmem>>, vector<1x1x128xf32>
      %375 = vector.shape_cast %374 : vector<1x1x128xf32> to vector<1x128xf32>
      %376 = vector.shape_cast %373 : vector<1x128xf32> to vector<1x1x128xf32>
      tpu.vector_store %arg22[%c0_164, %c0_165, %c0_166], %376 {strides = array<i32>} : memref<1x1x128xf32, #tpu.memory_space<vmem>>, vector<1x1x128xf32>,
    } else {
    }
    return
  }
  func.func @transform_0(%arg0: i32, %arg1: i32) -> (i32, i32, i32, i32) {
    %c0_i32 = arith.constant 0 : i32
    %c0_i32_0 = arith.constant 0 : i32
    %c0_i32_1 = arith.constant 0 : i32
    return %arg0, %arg1, %c0_i32, %c0_i32_0 : i32, i32, i32, i32
  }
  func.func @transform_1(%arg0: i32, %arg1: i32) -> (i32, i32, i32, i32) {
    %c0_i32 = arith.constant 0 : i32
    %c0_i32_0 = arith.constant 0 : i32
    %c0_i32_1 = arith.constant 0 : i32
    return %arg0, %arg1, %c0_i32, %c0_i32_0 : i32, i32, i32, i32
  }
  func.func @transform_2(%arg0: i32, %arg1: i32) -> (i32, i32, i32, i32) {
    %c0_i32 = arith.constant 0 : i32
    %c0_i32_0 = arith.constant 0 : i32
    %c0_i32_1 = arith.constant 0 : i32
    return %arg0, %arg1, %c0_i32, %c0_i32_0 : i32, i32, i32, i32
  }
  func.func @transform_3(%arg0: i32, %arg1: i32) -> (i32, i32, i32, i32) {
    %c0_i32 = arith.constant 0 : i32
    %c0_i32_0 = arith.constant 0 : i32
    %c0_i32_1 = arith.constant 0 : i32
    return %arg0, %arg1, %c0_i32, %c0_i32_0 : i32, i32, i32, i32
  }
  func.func @transform_4(%arg0: i32, %arg1: i32) -> (i32, i32) {
    %c0_i32 = arith.constant 0 : i32
    %c0_i32_0 = arith.constant 0 : i32
    %c0_i32_1 = arith.constant 0 : i32
    return %c0_i32, %c0_i32_0 : i32, i32
  }
  func.func @transform_5(%arg0: i32, %arg1: i32) -> (i32, i32) {
    %c0_i32 = arith.constant 0 : i32
    %c0_i32_0 = arith.constant 0 : i32
    %c0_i32_1 = arith.constant 0 : i32
    return %c0_i32, %c0_i32_0 : i32, i32
  }
  func.func @transform_6(%arg0: i32, %arg1: i32) -> (i32, i32) {
    %c0_i32 = arith.constant 0 : i32
    %c0_i32_0 = arith.constant 0 : i32
    %c0_i32_1 = arith.constant 0 : i32
    return %c0_i32, %c0_i32_0 : i32, i32
  }
  func.func @transform_7(%arg0: i32, %arg1: i32) -> (i32, i32) {
    %c0_i32 = arith.constant 0 : i32
    %c0_i32_0 = arith.constant 0 : i32
    %c0_i32_1 = arith.constant 0 : i32
    return %c0_i32, %c0_i32_0 : i32, i32
  }
  func.func @transform_8(%arg0: i32, %arg1: i32) -> (i32, i32) {
    %c0_i32 = arith.constant 0 : i32
    %c0_i32_0 = arith.constant 0 : i32
    %c0_i32_1 = arith.constant 0 : i32
    return %c0_i32, %c0_i32_0 : i32, i32
  }
  func.func @transform_9(%arg0: i32, %arg1: i32) -> (i32, i32) {
    %c0_i32 = arith.constant 0 : i32
    %c0_i32_0 = arith.constant 0 : i32
    %c0_i32_1 = arith.constant 0 : i32
    return %c0_i32, %c0_i32_0 : i32, i32
  }
  func.func @transform_10(%arg0: i32, %arg1: i32) -> (i32, i32) {
    %c0_i32 = arith.constant 0 : i32
    %c0_i32_0 = arith.constant 0 : i32
    %c0_i32_1 = arith.constant 0 : i32
    return %c0_i32, %c0_i32_0 : i32, i32
  }
  func.func @transform_11(%arg0: i32, %arg1: i32) -> (i32, i32) {
    %c0_i32 = arith.constant 0 : i32
    %c0_i32_0 = arith.constant 0 : i32
    %c0_i32_1 = arith.constant 0 : i32
    return %c0_i32, %c0_i32_0 : i32, i32
  }
  func.func @transform_12(%arg0: i32, %arg1: i32) -> (i32, i32) {
    %c0_i32 = arith.constant 0 : i32
    %c0_i32_0 = arith.constant 0 : i32
    %c0_i32_1 = arith.constant 0 : i32
    return %c0_i32, %c0_i32_0 : i32, i32
  }
  func.func @transform_13(%arg0: i32, %arg1: i32) -> (i32, i32) {
    %c0_i32 = arith.constant 0 : i32
    %c0_i32_0 = arith.constant 0 : i32
    %c0_i32_1 = arith.constant 0 : i32
    return %c0_i32, %c0_i32_0 : i32, i32
  }
  func.func @transform_14(%arg0: i32, %arg1: i32) -> (i32, i32) {
    %c0_i32 = arith.constant 0 : i32
    %c0_i32_0 = arith.constant 0 : i32
    %c0_i32_1 = arith.constant 0 : i32
    return %c0_i32, %c0_i32_0 : i32, i32
  }
  func.func @transform_15(%arg0: i32, %arg1: i32) -> (i32, i32) {
    %c0_i32 = arith.constant 0 : i32
    %c0_i32_0 = arith.constant 0 : i32
    %c0_i32_1 = arith.constant 0 : i32
    return %c0_i32, %c0_i32_0 : i32, i32
  }
  func.func @transform_16(%arg0: i32, %arg1: i32) -> (i32, i32) {
    %c0_i32 = arith.constant 0 : i32
    %c0_i32_0 = arith.constant 0 : i32
    %c0_i32_1 = arith.constant 0 : i32
    return %c0_i32, %c0_i32_0 : i32, i32
  }
  func.func @transform_17(%arg0: i32, %arg1: i32) -> (i32, i32) {
    %c0_i32 = arith.constant 0 : i32
    %c0_i32_0 = arith.constant 0 : i32
    %c0_i32_1 = arith.constant 0 : i32
    return %c0_i32, %c0_i32_0 : i32, i32
  }
  func.func @transform_18(%arg0: i32, %arg1: i32) -> (i32, i32) {
    %c0_i32 = arith.constant 0 : i32
    %c0_i32_0 = arith.constant 0 : i32
    %c0_i32_1 = arith.constant 0 : i32
    return %c0_i32, %c0_i32_0 : i32, i32
  }
  func.func @transform_19(%arg0: i32, %arg1: i32) -> (i32, i32) {
    %c0_i32 = arith.constant 0 : i32
    %c0_i32_0 = arith.constant 0 : i32
    %c0_i32_1 = arith.constant 0 : i32
    return %c0_i32, %c0_i32_0 : i32, i32
  }
  func.func @transform_20(%arg0: i32, %arg1: i32) -> (i32, i32, i32) {
    %c0_i32 = arith.constant 0 : i32
    %c0_i32_0 = arith.constant 0 : i32
    %c0_i32_1 = arith.constant 0 : i32
    return %arg0, %c0_i32, %c0_i32_0 : i32, i32, i32
  }
  func.func @transform_21(%arg0: i32, %arg1: i32) -> (i32, i32, i32) {
    %c0_i32 = arith.constant 0 : i32
    %c0_i32_0 = arith.constant 0 : i32
    %c0_i32_1 = arith.constant 0 : i32
    return %arg0, %c0_i32, %c0_i32_0 : i32, i32, i32
  }
}

</mosaic_0001>

<bundles_post_ra>
// kernel: tpu_custom_call.1
= control target key start
LH: loop header
LB: loop body
LE: loop exit
PB: predicated region body
PF: predicated region fallthrough
CT: control target
= control target key end

     0   :  { %s5558_s0 = inlined_call_operand.vmem [shape: bf16[2,2,256,64], index: 0, kind: input, shape index: {}]   ;;  %s5559_s1 = inlined_call_operand.vmem [shape: bf16[2,2,64,128], index: 1, kind: input, shape index: {}]   ;;  %s5560_s2 = inlined_call_operand.hbm [shape: bf16[2,2,16,256], index: 2, kind: input, shape index: {}]   ;;  %s5561_s3 = inlined_call_operand.hbm [shape: bf16[2,2,8,512], index: 3, kind: input, shape index: {}]   ;;  %s5562_s4 = inlined_call_operand.hbm [shape: f32[2,64], index: 4, kind: input, shape index: {}]   ;;  %s5563_s5 = inlined_call_operand.hbm [shape: f32[2,128], index: 5, kind: input, shape index: {}]   ;;  %s5564_s6 = inlined_call_operand.vmem [shape: f32[2,256], index: 6, kind: input, shape index: {}]   ;;  %s5565_s7 = inlined_call_operand.vmem [shape: f32[2,512], index: 7, kind: input, shape index: {}]   ;;  %s5566_s8 = inlined_call_operand.vmem [shape: f32[1,128], index: 8, kind: input, shape index: {}]   ;;  %s5567_s9 = inlined_call_operand.hbm [shape: f32[1,128], index: 9, kind: input, shape index: {}]   ;;  %s5568_s10 = inlined_call_operand.hbm [shape: f32[1,128], index: 10, kind: input, shape index: {}]   ;;  %s5569_s11 = inlined_call_operand.hbm [shape: f32[1,128], index: 11, kind: input, shape index: {}]   ;;  %s5570_s12 = inlined_call_operand.hbm [shape: bf16[64,128], index: 12, kind: input, shape index: {}]   ;;  %s5571_s13 = inlined_call_operand.vmem [shape: bf16[128,256], index: 13, kind: input, shape index: {}]   ;;  %s5572_s14 = inlined_call_operand.vmem [shape: bf16[256,512], index: 14, kind: input, shape index: {}]   ;;  %s5573_s15 = inlined_call_operand.hbm [shape: f32[1,128], index: 15, kind: input, shape index: {}]   ;;  %s5574_s16 = inlined_call_operand.vmem [shape: f32[1,256], index: 16, kind: input, shape index: {}]   ;;  %s5575_s17 = inlined_call_operand.vmem [shape: f32[1,512], index: 17, kind: input, shape index: {}]   ;;  %s5576_s18 = inlined_call_operand.vmem [shape: f32[2,512], index: 18, kind: input, shape index: {}]   ;;  %s5577_s19 = inlined_call_operand.hbm [shape: f32[1,128], index: 19, kind: input, shape index: {}]   ;;  %s5578_s20 = inlined_call_operand.hbm [shape: f32[2,1,128], index: 20, kind: output, shape index: {0}]   ;;  %s5579_s21 = inlined_call_operand.hbm [shape: f32[2,1,128], index: 21, kind: output, shape index: {1}]  }
   0x1   :  { %5595 = sst [smem:[#allocation43_spill]] %s5558_s0 }
   0x2   :  { %5596 = sst [smem:[#allocation44_spill]] %s5559_s1 }
   0x3   :  { %5597 = sst [smem:[#allocation45_spill]] %s5560_s2 }
   0x4   :  { %5598 = sst [smem:[#allocation46_spill]] %s5561_s3 }
   0x5   :  { %5599 = sst [smem:[#allocation47_spill]] %s5562_s4 }
   0x6   :  { %5600 = sst [smem:[#allocation48_spill]] %s5563_s5 }
   0x7   :  { %5601 = sst [smem:[#allocation49_spill]] %s5564_s6 }
   0x8   :  { %5602 = sst [smem:[#allocation50_spill]] %s5565_s7 }
   0x9   :  { %5603 = sst [smem:[#allocation51_spill]] %s5566_s8 }
   0xa   :  { %5604 = sst [smem:[#allocation52_spill]] %s5567_s9 }
   0xb   :  { %5605 = sst [smem:[#allocation53_spill]] %s5568_s10 }
   0xc   :  { %5606 = sst [smem:[#allocation54_spill]] %s5569_s11 }
   0xd   :  { %5607 = sst [smem:[#allocation55_spill]] %s5570_s12 }
   0xe   :  { %5608 = sst [smem:[#allocation56_spill]] %s5571_s13 }
   0xf   :  { %5609 = sst [smem:[#allocation57_spill]] %s5572_s14 }
  0x10   :  { %5610 = sst [smem:[#allocation58_spill]] %s5573_s15 }
  0x11   :  { %5611 = sst [smem:[#allocation59_spill]] %s5574_s16 }
  0x12   :  { %5612 = sst [smem:[#allocation60_spill]] %s5575_s17 }
  0x13   :  { %5613 = sst [smem:[#allocation61_spill]] %s5576_s18 }
  0x14   :  { %5614 = sst [smem:[#allocation62_spill]] %s5577_s19 }
  0x15   :  { %5615 = sst [smem:[#allocation63_spill]] %s5578_s20 }
  0x16   :  { %5616 = sst [smem:[#allocation64_spill]] %s5579_s21 }
  0x17   :  { %27 = vsyncpa [#allocation7], 0 }
  0x18   :  { %29 = vsyncpa [#allocation7 + $0x1], 0 }
  0x19   :  { %30 = vsyncpa [#allocation10], 0 }
  0x1a   :  { %32 = vsyncpa [#allocation10 + $0x1], 0 }
  0x1b   :  { %33 = vsyncpa [#allocation13], 0 }
  0x1c   :  { %34 = vsyncpa [#allocation16], 0 }
  0x1d   :  { %35 = vsyncpa [#allocation19], 0 }
  0x1e   :  { %36 = vsyncpa [#allocation22], 0 }
  0x1f   :  { %37 = vsyncpa [#allocation8], 0 }
  0x20   :  { %39 = vsyncpa [#allocation8 + $0x1], 0 }
  0x21   :  { %40 = vsyncpa [#allocation25], 0 }
  0x22   :  { %42 = vsyncpa [#allocation25 + $0x1], 0  ;;  %s4471_s2 = smov 0   ;;  %s4473_s25 = smov 0  }
  0x23   :  { %s4475_s26 = smov 0   ;;  %s4477_s27 = smov 0  }
  0x24   :  { %s4479_s3 = smov 0   ;;  %s4481_s28 = smov 0  }
  0x25   :  { %s4483_s29 = smov 0   ;;  %s4485_s0 = smov 0  }
  0x26   :  { %s4487_s4 = smov 0   ;;  %s4489_s30 = smov 0  }
  0x27   :  { %s4491_s5 = smov 0  }
  0x28 LB: > { %5617 = sst [smem:[#allocation35_spill]] %s4309_s26  ;;  %s4527_s22 = sadd.s32 4294967295, %s4341_s5   ;;  %s4341_s5 = sphi %s4491_s5, %s48_s5   ;;  %s4337_s30 = sphi %s4489_s30, %s5678_s30   ;;  %s4333_s4 = sphi %s4487_s4, %s5683_s4   ;;  %s4329_s0 = sphi %s4485_s0, %s5676_s0   ;;  %s4325_s29 = sphi %s4483_s29, %s5675_s29   ;;  %s4321_s28 = sphi %s4481_s28, %s5674_s28   ;;  %s4317_s3 = sphi %s4479_s3, %s5682_s3   ;;  %s4313_s27 = sphi %s4477_s27, %s5681_s27   ;;  %s4309_s26 = sphi %s4475_s26, %s5672_s26   ;;  %s4305_s25 = sphi %s4473_s25, %s5680_s25   ;;  %s4301_s2 = sphi %s4471_s2, %s5679_s2  }
  0x29   : > { %5618 = sst [smem:[#allocation36_spill]] %s4321_s28  ;;  %p3198_p0 = scmp.ge.s32.totalorder %s4341_s5, 1 }
  0x2a   : > { %5619 = sst [smem:[#allocation37_spill]] %s4333_s4  ;;  %p5586_p1 = scmp.eq.s32.totalorder %s4527_s22, 0 }
  0x2b   : > { %5620 = sst [smem:[#allocation38_spill]] %s4337_s30  ;;  %p565_p2 = scmp.lt.s32.totalorder %s4341_s5, 5 }
  0x2c   : > { %s4343_s1 = smov [#allocation11]   ;;  %s4344_s21 = smov [#allocation12]  }
  0x2d   : > { %p4532_p3 = pnand %p3198_p0, %p565_p2  ;;  %s578_s24 = sshll.u32 %s4343_s1, 4  ;;  %s579_s24 = int_to_ptr.vmem [resolvable:$true] %s578_s24 }
  0x2e   : > { %s589_s20 = sshll.u32 %s4344_s21, 4  ;;  %s4345_s17 = smov [#allocation15]   ;;  %s590_s20 = int_to_ptr.vmem [resolvable:$true] %s589_s20 }
  0x2f   : > { %s5621_s23 = scalar_select %p4532_p3, 1, 0 }
  0x30   : > { %p3541_p4 = pneg %p4532_p3  ;;  %s620_s16 = sshll.u32 %s4345_s17, 4  ;;  %s4544_s16 = int_to_ptr.vmem [resolvable:$true] %s620_s16 }
  0x31   : > { %s3914_s1 = scalar_lea.vmem %s579_s24, 32  ;;  %p3922_p10 = scmp.lt.s32.totalorder %s579_s24, %s579_s24 }
  0x32   : > { %p4540_p5 = pnand %p3541_p4, %p5586_p1  ;;  %p3915_p7 = scmp.ne.s32.totalorder %s579_s24, %s3914_s1 }
  0x33   : > { %p3923_p11 = scmp.lt.s32.totalorder %s3914_s1, %s3914_s1 }
  0x34   : > { %p4548_p6 = pneg %p4540_p5 }
  0x35   : > { %p3924_p12 = por %p3923_p11, %p3922_p10 }
  0x36   : > { %p3917_p8 = pnand %p3915_p7, %p4548_p6 }
  0x38   : > { %p3918_p9 = pneg %p3917_p8 }
  0x3a   : > { %p3925_p13 = pnand %p3924_p12, %p3918_p9 }
  0x3c   : > { %3928 = shalt.err (!%p3925_p13)
}
  0x3d   : > { %s5624_s13 = sld [smem:[#allocation47_spill]]  ;;  %s3940_s7 = scalar_lea.vmem %s590_s20, 32 }
  0x3e   : > { %p3941_p0 = scmp.ne.s32.totalorder %s590_s20, %s3940_s7  ;;  %p3948_p1 = scmp.lt.s32.totalorder %s590_s20, %s590_s20 }
  0x3f   : > { %p3949_p7 = scmp.lt.s32.totalorder %s3940_s7, %s3940_s7 }
  0x40   : > { %p3943_p2 = pnand %p3941_p0, %p4548_p6 }
  0x41   : > { %p3950_p8 = por %p3949_p7, %p3948_p1 }
  0x42   : > { %p3944_p4 = pneg %p3943_p2 }
  0x43   : > { %3544 = dma.hbm_to_vmem [thread:$0]  (!%p4540_p5), %s5624_s13, 32, %s579_s24, [#allocation10]  }
  0x44   : > { %p3951_p3 = pnand %p3950_p8, %p3944_p4 }
  0x46   : > { %3954 = shalt.err (!%p3951_p3)
}
  0x47   : > { %s5625_s8 = sld [smem:[#allocation48_spill]]  ;;  %s3966_s13 = scalar_lea.vmem %s4544_s16, 16 }
  0x48   : > { %p3967_p9 = scmp.ne.s32.totalorder %s4544_s16, %s3966_s13  ;;  %s3973_s7 = scalar_lea.vmem %s4544_s16, 32 }
  0x49   : > { %p3974_p1 = scmp.lt.s32.totalorder %s4544_s16, %s4544_s16  ;;  %p3975_p3 = scmp.lt.s32.totalorder %s3973_s7, %s3966_s13 }
  0x4a   : > { %p3969_p10 = pnand %p3967_p9, %p4548_p6 }
  0x4b   : > { %p3976_p12 = por %p3975_p3, %p3974_p1 }
  0x4c   : > { %p3970_p11 = pneg %p3969_p10 }
  0x4d   : > { %3547 = dma.hbm_to_vmem [thread:$0]  (!%p4540_p5), %s5625_s8, 32, %s590_s20, [#allocation13]  }
  0x4e   : > { %p3977_p13 = pnand %p3976_p12, %p3970_p11 }
  0x50   : > { %3980 = shalt.err (!%p3977_p13)
}
  0x51   : > { %s5626_s10 = sld [smem:[#allocation53_spill]]  ;;  %s4346_s8 = smov [#allocation18]  }
  0x52   : > { %s641_s20 = sshll.u32 %s4346_s8, 4  ;;  %s642_s20 = int_to_ptr.vmem [resolvable:$true] %s641_s20 }
  0x53   : > { %s3992_s17 = scalar_lea.vmem %s642_s20, 512  ;;  %p4000_p7 = scmp.lt.s32.totalorder %s642_s20, %s642_s20 }
  0x54   : > { %p3993_p0 = scmp.ne.s32.totalorder %s642_s20, %s3992_s17  ;;  %p4001_p8 = scmp.lt.s32.totalorder %s3992_s17, %s3992_s17 }
  0x56   : > { %p3995_p2 = pnand %p3993_p0, %p4548_p6  ;;  %p4002_p9 = por %p4001_p8, %p4000_p7 }
  0x57   : > { %3553 = dma.hbm_to_vmem [thread:$0]  (!%p4540_p5), %s5626_s10, 16, %s4544_s16, [#allocation16]  }
  0x58   : > { %p3996_p4 = pneg %p3995_p2 }
  0x5a   : > { %p4003_p10 = pnand %p4002_p9, %p3996_p4 }
  0x5c   : > { %4006 = shalt.err (!%p4003_p10)
}
  0x5d   : > { %s4347_s21 = smov 64   ;;  %s4348_s1 = smov 4  }
  0x5e   : > { %s5627_s12 = sld [smem:[#allocation55_spill]]  ;;  %s4349_s7 = smov [#allocation14]  }
  0x5f   : > { %s609_s6 = sshll.u32 %s4349_s7, 4  ;;  %s4350_s24 = smov [#allocation17]   ;;  %s610_s6 = int_to_ptr.vmem [resolvable:$true] %s609_s6 }
  0x60   : > { %s631_s8 = sshll.u32 %s4350_s24, 4  ;;  %s4018_s10 = scalar_lea.vmem %s610_s6, 16  ;;  %s632_s8 = int_to_ptr.vmem [resolvable:$true] %s631_s8 }
  0x61   : > { %p4019_p11 = scmp.ne.s32.totalorder %s610_s6, %s4018_s10  ;;  %s4025_s17 = scalar_lea.vmem %s610_s6, 32 }
  0x62   : > { %p4026_p12 = scmp.lt.s32.totalorder %s610_s6, %s610_s6  ;;  %p4027_p13 = scmp.lt.s32.totalorder %s4025_s17, %s4018_s10 }
  0x63   : > { %p4021_p1 = pnand %p4019_p11, %p4548_p6 }
  0x64   : > { %3559 = dma.hbm_to_vmem [thread:$0]  (!%p4540_p5), %s5627_s12, 512, %s642_s20, [#allocation19], %s4347_s21, %s4347_s21, %s4348_s1  }
  0x65   : > { %p4022_p3 = pneg %p4021_p1  ;;  %p4028_p0 = por %p4027_p13, %p4026_p12 }
  0x67   : > { %p4029_p2 = pnand %p4028_p0, %p4022_p3 }
  0x69   : > { %4032 = shalt.err (!%p4029_p2)
}
  0x6a   : > { %s5628_s9 = sld [smem:[#allocation52_spill]]  ;;  %s4044_s1 = scalar_lea.vmem %s632_s8, 16 }
  0x6b   : > { %p4045_p4 = scmp.ne.s32.totalorder %s632_s8, %s4044_s1  ;;  %s4051_s13 = scalar_lea.vmem %s632_s8, 32 }
  0x6c   : > { %p4052_p9 = scmp.lt.s32.totalorder %s632_s8, %s632_s8  ;;  %p4053_p10 = scmp.lt.s32.totalorder %s4051_s13, %s4044_s1 }
  0x6d   : > { %p4047_p7 = pnand %p4045_p4, %p4548_p6 }
  0x6e   : > { %p4054_p11 = por %p4053_p10, %p4052_p9 }
  0x6f   : > { %p4048_p8 = pneg %p4047_p7 }
  0x70   : > { %3550 = dma.hbm_to_vmem [thread:$0]  (!%p4540_p5), %s5628_s9, 16, %s610_s6, [#allocation13]  }
  0x71   : > { %p4055_p1 = pnand %p4054_p11, %p4048_p8 }
  0x73   : > { %4058 = shalt.err (!%p4055_p1)
}
  0x74   : > { %s5629_s11 = sld [smem:[#allocation54_spill]]  ;;  %s4351_s7 = smov [#allocation20]  }
  0x75   : > { %s661_s6 = sshll.u32 %s4351_s7, 4  ;;  %s4352_s24 = smov [#allocation21]   ;;  %s662_s6 = int_to_ptr.vmem [resolvable:$true] %s661_s6 }
  0x76   : > { %s681_s17 = sshll.u32 %s4352_s24, 4  ;;  %s4070_s20 = scalar_lea.vmem %s662_s6, 16  ;;  %s682_s17 = int_to_ptr.vmem [resolvable:$true] %s681_s17 }
  0x77   : > { %p4071_p3 = scmp.ne.s32.totalorder %s662_s6, %s4070_s20  ;;  %s4077_s21 = scalar_lea.vmem %s662_s6, 32 }
  0x78   : > { %p4078_p0 = scmp.lt.s32.totalorder %s662_s6, %s662_s6  ;;  %p4079_p2 = scmp.lt.s32.totalorder %s4077_s21, %s4070_s20 }
  0x79   : > { %p4073_p12 = pnand %p4071_p3, %p4548_p6 }
  0x7a   : > { %3556 = dma.hbm_to_vmem [thread:$0]  (!%p4540_p5), %s5629_s11, 16, %s632_s8, [#allocation16]  }
  0x7b   : > { %p4074_p13 = pneg %p4073_p12  ;;  %p4080_p4 = por %p4079_p2, %p4078_p0 }
  0x7d   : > { %p4081_p7 = pnand %p4080_p4, %p4074_p13 }
  0x7f   : > { %4084 = shalt.err (!%p4081_p7)
}
  0x80   : > { %s5630_s15 = sld [smem:[#allocation58_spill]]  ;;  %s4096_s13 = scalar_lea.vmem %s682_s17, 16 }
  0x81   : > { %p4097_p8 = scmp.ne.s32.totalorder %s682_s17, %s4096_s13  ;;  %s4103_s10 = scalar_lea.vmem %s682_s17, 32 }
  0x82   : > { %p4104_p11 = scmp.lt.s32.totalorder %s682_s17, %s682_s17  ;;  %p4105_p1 = scmp.lt.s32.totalorder %s4103_s10, %s4096_s13 }
  0x83   : > { %p4099_p9 = pnand %p4097_p8, %p4548_p6 }
  0x84   : > { %p4106_p3 = por %p4105_p1, %p4104_p11 }
  0x85   : > { %p4100_p10 = pneg %p4099_p9 }
  0x86   : > { %3562 = dma.hbm_to_vmem [thread:$0]  (!%p4540_p5), %s5630_s15, 16, %s662_s6, [#allocation19]  }
  0x87   : > { %p4107_p12 = pnand %p4106_p3, %p4100_p10 }
  0x89   : > { %4110 = shalt.err (!%p4107_p12)
}
  0x8a   : > { %s5631_s19 = sld [smem:[#allocation62_spill]]  ;;  %s3197_s14 = sadd.s32 4294967294, %s4341_s5  }
  0x8b   : > { %s57_s18 = sadd.s32 1, %s4333_s4  ;;  %s60_s6 = sadd.s32 1, %s4337_s30 }
  0x8c   : > { %p58_p6 = scmp.ge.s32.totalorder %s57_s18, 2  ;;  %s125_s24 = sadd.s32 1, %s4321_s28 }
  0x8d   : > { %p132_p13 = scmp.ne.s32.totalorder %s4321_s28, %s4317_s3  ;;  %p133_p0 = scmp.eq.s32.totalorder %s4341_s5, 0 }
  0x8e   : > { %s5685_s18 = smov (%p58_p6, %s57_s18), 0  ;;  %s5687_s6 = smov (!%p58_p6, %s60_s6), %s4337_s30 }
  0x8f   : > { %5632 = sst [smem:[#allocation39_spill]] %s5685_s18  ;;  %s121_s20 = ssub.s32 %s4333_s4, %s5685_s18 }
  0x90   : > { %3565 = dma.hbm_to_vmem [thread:$0]  (!%p4540_p5), %s5631_s19, 16, %s682_s17, [#allocation22]  }
  0x91   : > { %p62_p5 = scmp.ge.s32.totalorder %s5687_s6, 2  ;;  %p138_p2 = scmp.ne.s32.totalorder %s4317_s3, %s4313_s27 }
  0x92   : > { %p4628_p4 = por %p133_p0, %p132_p13  ;;  %s515_s21 = sadd.s32 1, %s4309_s26 }
  0x93   : > { %s5689_s6 = smov (%p62_p5, %s5687_s6), 0  ;;  %p5635_p7 = scmp.eq.s32.totalorder %s4527_s22, 0 }
  0x94   : > { %5634 = sst [smem:[#allocation40_spill]] %s5689_s6  ;;  %p525_p9 = scmp.ne.s32.totalorder %s4309_s26, %s4305_s25 }
  0x95   : > { %p4637_p8 = por %p5635_p7, %p138_p2  ;;  %s120_s1 = ssub.s32 %s4337_s30, %s5689_s6 }
  0x96   : > { %p526_p10 = scmp.eq.s32.totalorder %s4527_s22, 3  ;;  %s122_s27 = sor.u32 %s121_s20, %s120_s1 }
  0x97   : > { %p513_p11 = scmp.eq.s32.totalorder %s120_s1, 0  ;;  %p123_p1 = scmp.eq.s32.totalorder %s122_s27, 0 }
  0x98   : > { %p4646_p3 = por %p526_p10, %p525_p9  ;;  %p531_p12 = scmp.ne.s32.totalorder %s4305_s25, %s4301_s2 }
  0x99   : > { %s4651_s10 = scalar_select %p513_p11, %s4309_s26, %s515_s21  }
  0x9a   : > { %s4654_s16 = scalar_select %p123_p1, %s4321_s28, %s125_s24  }
  0x9b   : > { %5638 = sst [smem:[#allocation41_spill]] %s4651_s10  ;;  %p532_p6 = scmp.eq.s32.totalorder %s3197_s14, 3 }
  0x9c   : > { %5639 = sst [smem:[#allocation42_spill]] %s4654_s16  ;;  %p3588_p13 = scmp.lt.s32.totalorder %s4341_s5, 4 }
  0x9d   : > { %s716_s7 = sand.u32 1, %s4321_s28   ;;  %p4660_p0 = por %p532_p6, %p531_p12 }
  0x9e   : > { %s4664_s20 = sshll.u32 %s716_s7, 4  ;;  %s3209_s1 = sshll.u32 %s4333_s4, 2 }
  0x9f   : > { %s3210_s27 = sshll.u32 %s4337_s30, 3  ;;  %s720_s21 = scalar_lea.vmem [#allocation6], %s4664_s20 }
  0xa0   : > { %s4668_s11 = sadd.s32 %s3210_s27, %s3209_s1  ;;  %s729_s24 = sshll.u32 %s720_s21, 4  ;;  %s730_s24 = int_to_ptr.vmem [resolvable:$true] %s729_s24 }
  0xa1   : > { %s3211_s12 = sshll.u32 %s4668_s11, 6  ;;  %s5641_s19 = sld [smem:[#allocation45_spill]] }
  0xa2   : > { %p4677_p5 = pnand %p3588_p13, %p4628_p4  ;;  %s739_s4 = sand.u32 1, %s4341_s5  }
  0xa3   : > { %s717_s30 = scalar_lea.sflag [#allocation7], %s716_s7  ;;  %s4124_s1 = scalar_lea.vmem %s730_s24, 256 }
  0xa4   : > { %p4113_p2 = pneg %p4677_p5  ;;  %p4125_p7 = scmp.ne.s32.totalorder %s730_s24, %s4124_s1 }
  0xa5   : > { %s4353_s11 = smov [#allocation6]  }
  0xa6   : > { %p4127_p9 = pnand %p4125_p7, %p4113_p2  ;;  %s4129_s15 = sshll.u32 %s4353_s11, 4  ;;  %s4130_s15 = int_to_ptr.vmem [resolvable:$false] %s4129_s15 }
  0xa7   : > { %s728_s6 = scalar_lea.hbm %s5641_s19, %s3211_s12  ;;  %s4131_s19 = scalar_lea.vmem %s4130_s15, 512 }
  0xa8   : > { %p4128_p10 = pneg %p4127_p9  ;;  %p4132_p4 = scmp.lt.s32.totalorder %s730_s24, %s4130_s15 }
  0xa9   : > { %p4133_p11 = scmp.lt.s32.totalorder %s4131_s19, %s4124_s1 }
  0xab   : > { %p4134_p1 = por %p4133_p11, %p4132_p4 }
  0xad   : > { %p4135_p12 = pnand %p4134_p1, %p4128_p10 }
  0xaf   : > { %4138 = shalt.err (!%p4135_p12)
}
  0xb0   : > { %s4354_s17 = smov 128   ;;  %s4355_s7 = smov 8  }
  0xb1   : > { %3569 = dma.hbm_to_vmem [thread:$0]  (!%p4677_p5), %s728_s6, 256, %s730_s24, %s717_s30, %s4354_s17, %s4354_s17, %s4355_s7  }
  0xb2   : > { %s5643_s14 = sld [smem:[#allocation46_spill]]  ;;  %s743_s28 = scalar_lea.vmem [#allocation9], %s4664_s20 }
  0xb3   : > { %s753_s11 = sshll.u32 %s743_s28, 4  ;;  %s740_s10 = scalar_lea.sflag [#allocation10], %s739_s4  ;;  %s754_s11 = int_to_ptr.vmem [resolvable:$true] %s753_s11 }
  0xb4   : > { %s4152_s15 = scalar_lea.vmem %s754_s11, 256  ;;  %s4356_s1 = smov [#allocation9]  }
  0xb5   : > { %p4153_p6 = scmp.ne.s32.totalorder %s754_s11, %s4152_s15  ;;  %s4157_s19 = sshll.u32 %s4356_s1, 4  ;;  %s4158_s19 = int_to_ptr.vmem [resolvable:$false] %s4157_s19 }
  0xb6   : > { %s4159_s26 = scalar_lea.vmem %s4158_s19, 512  ;;  %p4160_p9 = scmp.lt.s32.totalorder %s754_s11, %s4158_s19 }
  0xb7   : > { %p4155_p13 = pnand %p4153_p6, %p4113_p2  ;;  %p4161_p10 = scmp.lt.s32.totalorder %s4159_s26, %s4152_s15 }
  0xb8   : > { %s751_s16 = scalar_lea.hbm %s5643_s14, %s3211_s12 }
  0xb9   : > { %p4156_p7 = pneg %p4155_p13  ;;  %p4162_p4 = por %p4161_p10, %p4160_p9 }
  0xbb   : > { %p4163_p11 = pnand %p4162_p4, %p4156_p7 }
  0xbd   : > { %4166 = shalt.err (!%p4163_p11)
}
  0xbe   : > { %3572 = dma.hbm_to_vmem [thread:$0]  (!%p4677_p5), %s751_s16, 256, %s754_s11, %s740_s10  }
  0xbf   : > { %p5644_p1 = scmp.ne.s32.totalorder %s5621_s23, 0 }
  0xc0   : > { %s764_s12 = sand.u32 (!%p5644_p1), 1, %s4317_s3  }
  0xc1   : > { %762 = sbr.rel (%p5644_p1) target bundleno = 1342 (0x53e), region = 100  ;;  %s4701_s28 = sshll.u32 (!%p5644_p1), %s764_s12, 4 }
  0xc2   : > { %s765_s4 = scalar_lea.sflag (!%p5644_p1), [#allocation7], %s764_s12  ;;  %s768_s30 = scalar_lea.vmem (!%p5644_p1), [#allocation6], %s4701_s28 }
  0xc6   : > { %4264 = dma.done.wait (%p4637_p8), %s765_s4, 256  }
  0xc7   : > { %4266 = vsyncadd (%p4637_p8), %s765_s4, 4294967040  ;;  %s773_s26 = sand.u32 1, %s4527_s22  }
  0xc8   : > { %s774_s18 = scalar_lea.sflag [#allocation10], %s773_s26 }
  0xc9   : > { %4268 = dma.done.wait (%p4637_p8), %s774_s18, 256  }
  0xca   : > { %4270 = vsyncadd (%p4637_p8), %s774_s18, 4294967040  ;;  %p5645_p5 = scmp.eq.s32.totalorder %s4527_s22, 0 }
  0xcc   : > { %4272 = dma.done.wait (%p5645_p5), [#allocation10], 32   ;;  %p5646_p2 = pmov %p5645_p5 }
  0xce   : > { %4274 = vsyncadd (%p5646_p2), [#allocation10], 4294967264  ;;  %p5647_p12 = pmov %p5646_p2 }
  0xcf   : > { %p5648_p6 = pmov %p5646_p2 }
  0xd0   : > { %4276 = dma.done.wait (%p5647_p12), [#allocation13], 48  }
  0xd1   : > { %4278 = vsyncadd (%p5648_p6), [#allocation13], 4294967248  ;;  %p5649_p13 = pmov %p5646_p2 }
  0xd2   : > { %p5650_p7 = pmov %p5646_p2 }
  0xd3   : > { %4280 = dma.done.wait (%p5649_p13), [#allocation16], 32  }
  0xd4   : > { %4282 = vsyncadd (%p5650_p7), [#allocation16], 4294967264  ;;  %p5651_p8 = pmov %p5646_p2 }
  0xd5   : > { %p5652_p9 = pmov %p5646_p2 }
  0xd6   : > { %4284 = dma.done.wait (%p5651_p8), [#allocation19], 528  }
  0xd7   : > { %4286 = vsyncadd (%p5652_p9), [#allocation19], 4294966768  ;;  %p5653_p10 = pmov %p5646_p2 }
  0xd8   : > { %p5654_p4 = pmov %p5646_p2 }
  0xd9   : > { %4288 = dma.done.wait (%p5653_p10), [#allocation22], 16  }
  0xda   : > { %4290 = vsyncadd (%p5654_p4), [#allocation22], 4294967280  ;;  %s4735_s6 = sand.u32 1, %s4305_s25   ;;  %p894_p11 = scmp.lt.s32.totalorder %s4329_s0, 1 }
  0xdb   : > { %p896_p1 = scmp.lt.s32.totalorder %s4325_s29, 1  ;;  %s5655_s15 = sld [smem:[#allocation43_spill]] }
  0xdc   : > { %s895_s8 = scalar_select %p894_p11, %s4329_s0, 1 }
  0xdd   : > { %s897_s20 = scalar_select %p896_p1, %s4325_s29, 1 }
  0xde   : > { %s3228_s10 = sshll.u32 %s895_s8, 6  ;;  %s3231_s16 = sshll.u32 %s895_s8, 4 }
  0xdf   : > { %s3227_s24 = sshll.u32 %s897_s20, 5  ;;  %s3230_s17 = sshll.u32 %s897_s20, 3 }
  0xe0   : > { %s900_s7 = sadd.s32 %s3228_s10, %s3227_s24  ;;  %s909_s22 = sadd.s32 %s3231_s16, %s3230_s17 }
  0xe1   : > { %s3229_s27 = sshll.u32 %s900_s7, 2  ;;  %s3232_s21 = sshll.u32 %s909_s22, 2 }
  0xe2   : > { %s4744_s1 = scalar_lea.vmem %s5655_s15, %s3229_s27  ;;  %s5656_s4 = sld [smem:[#allocation44_spill]] }
  0xe3   : > { %s887_s18 = scalar_lea.vmem [#allocation23], %s4735_s6  ;;  %s893_s23 = scalar_lea.vmem [#allocation24], %s4735_s6 }
  0xe4   : > { %p3233_p5 = scmp.ne.s32.totalorder %s4325_s29, 0 }
  0xe6   : > { %916 = sbr.rel (%p3233_p5) target bundleno = 260 (0x104), region = 144 }
  0xe8   : > { %s4749_s26 = scalar_lea.vmem %s5656_s4, %s3232_s21 }
  0xeb   : > { %vm917_vm0 = vcmask 523264   ;;  %v4357_v0 = vmov 0.0  }
  0xec   : > { %918 = vst.msk [vmem:[#allocation2] sm:$0xff] %vm917_vm0, %v4357_v0  ;;  %919 = vst.msk [vmem:[#allocation2 + $0x8] sm:$0xff] %vm917_vm0, %v4357_v0 }
  0xed   : > { %920 = vst.msk [vmem:[#allocation2 + $0x10] sm:$0xff] %vm917_vm0, %v4357_v0  ;;  %921 = vst.msk [vmem:[#allocation2 + $0x18] sm:$0xff] %vm917_vm0, %v4357_v0 }
  0xee   : > { %922 = vst.msk [vmem:[#allocation2 + $0x20] sm:$0xff] %vm917_vm0, %v4357_v0  ;;  %923 = vst.msk [vmem:[#allocation2 + $0x28] sm:$0xff] %vm917_vm0, %v4357_v0 }
  0xef   : > { %924 = vst.msk [vmem:[#allocation2 + $0x30] sm:$0xff] %vm917_vm0, %v4357_v0  ;;  %925 = vst.msk [vmem:[#allocation2 + $0x38] sm:$0xff] %vm917_vm0, %v4357_v0 }
  0xf0   : > { %926 = vst.msk [vmem:[#allocation2 + $0x40] sm:$0xff] %vm917_vm0, %v4357_v0  ;;  %927 = vst.msk [vmem:[#allocation2 + $0x48] sm:$0xff] %vm917_vm0, %v4357_v0 }
  0xf1   : > { %928 = vst.msk [vmem:[#allocation2 + $0x50] sm:$0xff] %vm917_vm0, %v4357_v0  ;;  %929 = vst.msk [vmem:[#allocation2 + $0x58] sm:$0xff] %vm917_vm0, %v4357_v0 }
  0xf2   : > { %930 = vst.msk [vmem:[#allocation2 + $0x60] sm:$0xff] %vm917_vm0, %v4357_v0  ;;  %931 = vst.msk [vmem:[#allocation2 + $0x68] sm:$0xff] %vm917_vm0, %v4357_v0 }
  0xf3   : > { %932 = vst.msk [vmem:[#allocation2 + $0x70] sm:$0xff] %vm917_vm0, %v4357_v0  ;;  %933 = vst.msk [vmem:[#allocation2 + $0x78] sm:$0xff] %vm917_vm0, %v4357_v0 }
  0xf4   : > { %934 = vst.msk [vmem:[#allocation2 + $0x80] sm:$0xff] %vm917_vm0, %v4357_v0  ;;  %935 = vst.msk [vmem:[#allocation2 + $0x88] sm:$0xff] %vm917_vm0, %v4357_v0 }
  0xf5   : > { %936 = vst.msk [vmem:[#allocation2 + $0x90] sm:$0xff] %vm917_vm0, %v4357_v0  ;;  %937 = vst.msk [vmem:[#allocation2 + $0x98] sm:$0xff] %vm917_vm0, %v4357_v0 }
  0xf6   : > { %938 = vst.msk [vmem:[#allocation2 + $0xa0] sm:$0xff] %vm917_vm0, %v4357_v0  ;;  %939 = vst.msk [vmem:[#allocation2 + $0xa8] sm:$0xff] %vm917_vm0, %v4357_v0 }
  0xf7   : > { %940 = vst.msk [vmem:[#allocation2 + $0xb0] sm:$0xff] %vm917_vm0, %v4357_v0  ;;  %941 = vst.msk [vmem:[#allocation2 + $0xb8] sm:$0xff] %vm917_vm0, %v4357_v0 }
  0xf8   : > { %942 = vst.msk [vmem:[#allocation2 + $0xc0] sm:$0xff] %vm917_vm0, %v4357_v0  ;;  %943 = vst.msk [vmem:[#allocation2 + $0xc8] sm:$0xff] %vm917_vm0, %v4357_v0 }
  0xf9   : > { %944 = vst.msk [vmem:[#allocation2 + $0xd0] sm:$0xff] %vm917_vm0, %v4357_v0  ;;  %945 = vst.msk [vmem:[#allocation2 + $0xd8] sm:$0xff] %vm917_vm0, %v4357_v0 }
  0xfa   : > { %946 = vst.msk [vmem:[#allocation2 + $0xe0] sm:$0xff] %vm917_vm0, %v4357_v0  ;;  %947 = vst.msk [vmem:[#allocation2 + $0xe8] sm:$0xff] %vm917_vm0, %v4357_v0 }
  0xfb   : > { %948 = vst.msk [vmem:[#allocation2 + $0xf0] sm:$0xff] %vm917_vm0, %v4357_v0  ;;  %949 = vst.msk [vmem:[#allocation2 + $0xf8] sm:$0xff] %vm917_vm0, %v4357_v0 }
  0xfc   : > { %950 = vst [vmem:[#allocation3 + $0x30] sm:$0xff] %v4357_v0  ;;  %951 = vst [vmem:[#allocation3] sm:$0xff] %v4357_v0 }
  0xfd   : > { %952 = vst [vmem:[#allocation3 + $0x18] sm:$0xff] %v4357_v0  ;;  %953 = vst [vmem:[#allocation3 + $0x10] sm:$0xff] %v4357_v0 }
  0xfe   : > { %954 = vst [vmem:[#allocation3 + $0x8] sm:$0xff] %v4357_v0  ;;  %955 = vst [vmem:[#allocation3 + $0x20] sm:$0xff] %v4357_v0 }
  0xff   : > { %956 = vst [vmem:[#allocation3 + $0x28] sm:$0xff] %v4357_v0  ;;  %957 = vst [vmem:[#allocation3 + $0x38] sm:$0xff] %v4357_v0 }
 0x100   : > { %958 = vst [vmem:[#allocation4] sm:$0xff] %v4357_v0  ;;  %959 = vst [vmem:[#allocation4 + $0x18] sm:$0xff] %v4357_v0 }
 0x101   : > { %960 = vst [vmem:[#allocation4 + $0x10] sm:$0xff] %v4357_v0  ;;  %961 = vst [vmem:[#allocation4 + $0x8] sm:$0xff] %v4357_v0 }
 0x102   : > { %962 = vst [vmem:[#allocation5 + $0x8] sm:$0xff] %v4357_v0  ;;  %963 = vst [vmem:[#allocation5 + $0x10] sm:$0xff] %v4357_v0 }
 0x103   : > { %964 = vst [vmem:[#allocation5] sm:$0xff] %v4357_v0  ;;  %965 = vst [vmem:[#allocation5 + $0x18] sm:$0xff] %v4357_v0 }
 0x104 PF: > { %v966_v1 = vld [vmem:[#allocation2] sm:$0xff]  ;;  %v967_v3 = vld [vmem:[#allocation2 + $0x8] sm:$0xff]  ;;  %v968_v6 = vld [vmem:[#allocation2 + $0x10] sm:$0xff]  ;;  %vm1094_vm1 = vcmask 523264   ;;  %s5657_s8 = scalar_lea.vmem [#allocation9], %s4701_s28  ;;  %p3234_p2 = scmp.ne.s32.totalorder %s4325_s29, 1 }
 0x105   : > { %v3344_v2 = vld [vmem:[%s4744_s1] sm:$0xff]   ;;  %v3423_v7 = vld [vmem:[%s4744_s1 + $0x8] sm:$0xff]   ;;  %v969_v8 = vld [vmem:[#allocation2 + $0x18] sm:$0xff]  ;;  %s5659_s10 = sld [smem:[#allocation51_spill]] (!%p3234_p2) }
 0x106   : > { %v3345_v4 = vunpack.c.l.bf16 %v3344_v2  ;;  %v3346_v5 = vunpack.c.h.bf16 %v3344_v2  ;;  %v3349_v9 = vunpack.c.l.bf16 %v3423_v7  ;;  %v3350_v10 = vunpack.c.h.bf16 %v3423_v7  ;;  %v970_v11 = vld [vmem:[#allocation2 + $0x20] sm:$0xff]  ;;  %v3424_v12 = vld [vmem:[%s4744_s1 + $0x10] sm:$0xff]   ;;  %v971_v13 = vld [vmem:[#allocation2 + $0x28] sm:$0xff]  ;;  %s5660_s24 = sld [smem:[#allocation49_spill]] (!%p3234_p2) }
 0x107   : > { %v3353_v16 = vunpack.c.l.bf16 %v3424_v12  ;;  %v3354_v17 = vunpack.c.h.bf16 %v3424_v12  ;;  %v972_v18 = vld [vmem:[#allocation2 + $0x30] sm:$0xff]  ;;  %v3425_v19 = vld [vmem:[%s4744_s1 + $0x18] sm:$0xff]   ;;  %v974_v25 = vld [vmem:[#allocation2 + $0x40] sm:$0xff]  ;;  %s5661_s21 = sld [smem:[#allocation50_spill]] (!%p3234_p2) }
 0x108   : > { %v1062_v14 = vadd.f32 %v3345_v4, %v966_v1  ;;  %v1063_v15 = vadd.f32 %v3346_v5, %v967_v3  ;;  %v973_v20 = vld [vmem:[#allocation2 + $0x38] sm:$0xff]  ;;  %v1064_v21 = vadd.f32 %v3349_v9, %v968_v6  ;;  %v1065_v22 = vadd.f32 %v3350_v10, %v969_v8  ;;  %v3426_v26 = vld [vmem:[%s4744_s1 + $0x20] sm:$0xff]   ;;  %v975_v27 = vld [vmem:[#allocation2 + $0x48] sm:$0xff]  ;;  %s5662_s19 = sld [smem:[#allocation56_spill]] (!%p3234_p2) }
 0x109   : > { %v3357_v23 = vunpack.c.l.bf16 %v3425_v19  ;;  %v3358_v24 = vunpack.c.h.bf16 %v3425_v19  ;;  %v1066_v28 = vadd.f32 %v3353_v16, %v970_v11  ;;  %v1067_v29 = vadd.f32 %v3354_v17, %v971_v13  ;;  %v976_v32 = vld [vmem:[#allocation2 + $0x50] sm:$0xff]  ;;  %v3427_v33 = vld [vmem:[%s4744_s1 + $0x28] sm:$0xff]   ;;  %v977_v34 = vld [vmem:[#allocation2 + $0x58] sm:$0xff]  ;;  %s5663_s14 = sld [smem:[#allocation57_spill]] (!%p3234_p2) }
 0x10a   : > { %1095 = vst.msk [vmem:[#allocation2] sm:$0xff] %vm1094_vm1, %v1062_v14  ;;  %1096 = vst.msk [vmem:[#allocation2 + $0x8] sm:$0xff] %vm1094_vm1, %v1063_v15  ;;  %v3361_v30 = vunpack.c.l.bf16 %v3426_v26  ;;  %v3362_v31 = vunpack.c.h.bf16 %v3426_v26  ;;  %v3365_v37 = vunpack.c.l.bf16 %v3427_v33  ;;  %v3366_v38 = vunpack.c.h.bf16 %v3427_v33  ;;  %v978_v39 = vld [vmem:[#allocation2 + $0x60] sm:$0xff]  ;;  %v3428_v40 = vld [vmem:[%s4744_s1 + $0x30] sm:$0xff]   ;;  %s5664_s28 = sld [smem:[#allocation59_spill]] (!%p3234_p2) }
 0x10b   : > { %1097 = vst.msk [vmem:[#allocation2 + $0x10] sm:$0xff] %vm1094_vm1, %v1064_v21  ;;  %1098 = vst.msk [vmem:[#allocation2 + $0x18] sm:$0xff] %vm1094_vm1, %v1065_v22  ;;  %v1068_v35 = vadd.f32 %v3357_v23, %v972_v18  ;;  %v1069_v36 = vadd.f32 %v3358_v24, %v973_v20  ;;  %v979_v41 = vld [vmem:[#allocation2 + $0x68] sm:$0xff]  ;;  %v3369_v44 = vunpack.c.l.bf16 %v3428_v40  ;;  %v3370_v45 = vunpack.c.h.bf16 %v3428_v40  ;;  %v980_v46 = vld [vmem:[#allocation2 + $0x70] sm:$0xff]  ;;  %s5665_s20 = sld [smem:[#allocation60_spill]] (!%p3234_p2) }
 0x10c   : > { %1099 = vst.msk [vmem:[#allocation2 + $0x20] sm:$0xff] %vm1094_vm1, %v1066_v28  ;;  %1100 = vst.msk [vmem:[#allocation2 + $0x28] sm:$0xff] %vm1094_vm1, %v1067_v29  ;;  %v1070_v42 = vadd.f32 %v3361_v30, %v974_v25  ;;  %v1071_v43 = vadd.f32 %v3362_v31, %v975_v27  ;;  %v3429_v47 = vld [vmem:[%s4744_s1 + $0x38] sm:$0xff]   ;;  %v1072_v49 = vadd.f32 %v3365_v37, %v976_v32  ;;  %v982_v53 = vld [vmem:[#allocation2 + $0x80] sm:$0xff]  ;;  %s5666_s22 = sld [smem:[#allocation61_spill]] (!%p3234_p2) }
 0x10d   : > { %v981_v48 = vld [vmem:[#allocation2 + $0x78] sm:$0xff]  ;;  %1101 = vst.msk [vmem:[#allocation2 + $0x30] sm:$0xff] %vm1094_vm1, %v1068_v35  ;;  %1102 = vst.msk [vmem:[#allocation2 + $0x38] sm:$0xff] %vm1094_vm1, %v1069_v36  ;;  %v1073_v50 = vadd.f32 %v3366_v38, %v977_v34  ;;  %v3373_v51 = vunpack.c.l.bf16 %v3429_v47  ;;  %v3374_v52 = vunpack.c.h.bf16 %v3429_v47  ;;  %v3430_v54 = vld [vmem:[%s4744_s1 + $0x40] sm:$0xff]   ;;  %v1074_v56 = vadd.f32 %v3369_v44, %v978_v39 }
 0x10e   : > { %v983_v55 = vld [vmem:[#allocation2 + $0x88] sm:$0xff]  ;;  %1103 = vst.msk [vmem:[#allocation2 + $0x40] sm:$0xff] %vm1094_vm1, %v1070_v42  ;;  %1104 = vst.msk [vmem:[#allocation2 + $0x48] sm:$0xff] %vm1094_vm1, %v1071_v43  ;;  %v1075_v57 = vadd.f32 %v3370_v45, %v979_v41  ;;  %v3377_v58 = vunpack.c.l.bf16 %v3430_v54  ;;  %v3378_v59 = vunpack.c.h.bf16 %v3430_v54  ;;  %v984_v60 = vld [vmem:[#allocation2 + $0x90] sm:$0xff] }
 0x10f   : > { %v3431_v61 = vld [vmem:[%s4744_s1 + $0x48] sm:$0xff]   ;;  %v985_v62 = vld [vmem:[#allocation2 + $0x98] sm:$0xff]  ;;  %1105 = vst.msk [vmem:[#allocation2 + $0x50] sm:$0xff] %vm1094_vm1, %v1072_v49  ;;  %1106 = vst.msk [vmem:[#allocation2 + $0x58] sm:$0xff] %vm1094_vm1, %v1073_v50  ;;  %v1076_v63 = vadd.f32 %v3373_v51, %v980_v46  ;;  %v1077_v0 = vadd.f32 %v3374_v52, %v981_v48 }
 0x110   : > { %v3381_v1 = vunpack.c.l.bf16 %v3431_v61  ;;  %v3382_v2 = vunpack.c.h.bf16 %v3431_v61  ;;  %v986_v3 = vld [vmem:[#allocation2 + $0xa0] sm:$0xff]  ;;  %v3432_v4 = vld [vmem:[%s4744_s1 + $0x50] sm:$0xff]   ;;  %v987_v5 = vld [vmem:[#allocation2 + $0xa8] sm:$0xff]  ;;  %1107 = vst.msk [vmem:[#allocation2 + $0x60] sm:$0xff] %vm1094_vm1, %v1074_v56  ;;  %v1078_v6 = vadd.f32 %v3377_v58, %v982_v53  ;;  %v1079_v7 = vadd.f32 %v3378_v59, %v983_v55 }
 0x111   : > { %1108 = vst.msk [vmem:[#allocation2 + $0x68] sm:$0xff] %vm1094_vm1, %v1075_v57  ;;  %v3385_v8 = vunpack.c.l.bf16 %v3432_v4  ;;  %v3386_v9 = vunpack.c.h.bf16 %v3432_v4  ;;  %v988_v10 = vld [vmem:[#allocation2 + $0xb0] sm:$0xff]  ;;  %v3433_v11 = vld [vmem:[%s4744_s1 + $0x58] sm:$0xff]   ;;  %1109 = vst.msk [vmem:[#allocation2 + $0x70] sm:$0xff] %vm1094_vm1, %v1076_v63 }
 0x112   : > { %v989_v12 = vld [vmem:[#allocation2 + $0xb8] sm:$0xff]  ;;  %1110 = vst.msk [vmem:[#allocation2 + $0x78] sm:$0xff] %vm1094_vm1, %v1077_v0  ;;  %v1080_v13 = vadd.f32 %v3381_v1, %v984_v60  ;;  %v1081_v14 = vadd.f32 %v3382_v2, %v985_v62  ;;  %v3389_v15 = vunpack.c.l.bf16 %v3433_v11  ;;  %v3390_v16 = vunpack.c.h.bf16 %v3433_v11  ;;  %v990_v17 = vld [vmem:[#allocation2 + $0xc0] sm:$0xff]  ;;  %v991_v19 = vld [vmem:[#allocation2 + $0xc8] sm:$0xff] }
 0x113   : > { %v3434_v18 = vld [vmem:[%s4744_s1 + $0x60] sm:$0xff]   ;;  %1111 = vst.msk [vmem:[#allocation2 + $0x80] sm:$0xff] %vm1094_vm1, %v1078_v6  ;;  %1112 = vst.msk [vmem:[#allocation2 + $0x88] sm:$0xff] %vm1094_vm1, %v1079_v7  ;;  %v1082_v20 = vadd.f32 %v3385_v8, %v986_v3  ;;  %v1083_v21 = vadd.f32 %v3386_v9, %v987_v5  ;;  %v992_v24 = vld [vmem:[#allocation2 + $0xd0] sm:$0xff] }
 0x114   : > { %v3393_v22 = vunpack.c.l.bf16 %v3434_v18  ;;  %v3394_v23 = vunpack.c.h.bf16 %v3434_v18  ;;  %v3435_v25 = vld [vmem:[%s4744_s1 + $0x68] sm:$0xff]   ;;  %v993_v26 = vld [vmem:[#allocation2 + $0xd8] sm:$0xff]  ;;  %1113 = vst.msk [vmem:[#allocation2 + $0x90] sm:$0xff] %vm1094_vm1, %v1080_v13  ;;  %1114 = vst.msk [vmem:[#allocation2 + $0x98] sm:$0xff] %vm1094_vm1, %v1081_v14  ;;  %v1084_v27 = vadd.f32 %v3389_v15, %v988_v10  ;;  %v1085_v28 = vadd.f32 %v3390_v16, %v989_v12 }
 0x115   : > { %v3397_v29 = vunpack.c.l.bf16 %v3435_v25  ;;  %v3398_v30 = vunpack.c.h.bf16 %v3435_v25  ;;  %v994_v31 = vld [vmem:[#allocation2 + $0xe0] sm:$0xff]  ;;  %v3436_v32 = vld [vmem:[%s4744_s1 + $0x70] sm:$0xff]   ;;  %v995_v33 = vld [vmem:[#allocation2 + $0xe8] sm:$0xff]  ;;  %1115 = vst.msk [vmem:[#allocation2 + $0xa0] sm:$0xff] %vm1094_vm1, %v1082_v20 }
 0x116   : > { %1116 = vst.msk [vmem:[#allocation2 + $0xa8] sm:$0xff] %vm1094_vm1, %v1083_v21  ;;  %v1086_v34 = vadd.f32 %v3393_v22, %v990_v17  ;;  %v1087_v35 = vadd.f32 %v3394_v23, %v991_v19  ;;  %v3401_v36 = vunpack.c.l.bf16 %v3436_v32  ;;  %v3402_v37 = vunpack.c.h.bf16 %v3436_v32  ;;  %v996_v38 = vld [vmem:[#allocation2 + $0xf0] sm:$0xff]  ;;  %v3437_v39 = vld [vmem:[%s4744_s1 + $0x78] sm:$0xff]   ;;  %1117 = vst.msk [vmem:[#allocation2 + $0xb0] sm:$0xff] %vm1094_vm1, %v1084_v27 }
 0x117   : > { %v997_v40 = vld [vmem:[#allocation2 + $0xf8] sm:$0xff]  ;;  %1118 = vst.msk [vmem:[#allocation2 + $0xb8] sm:$0xff] %vm1094_vm1, %v1085_v28  ;;  %v1088_v41 = vadd.f32 %v3397_v29, %v992_v24  ;;  %v1089_v42 = vadd.f32 %v3398_v30, %v993_v26  ;;  %v3405_v43 = vunpack.c.l.bf16 %v3437_v39  ;;  %v3406_v44 = vunpack.c.h.bf16 %v3437_v39  ;;  %v1127_v45 = vld [vmem:[#allocation3 + $0x30] sm:$0xff]  ;;  %v3408_v46 = vld [vmem:[%s4749_s26] sm:$0xff]  }
 0x118   : > { %v1128_v47 = vld [vmem:[#allocation3] sm:$0xff]  ;;  %1119 = vst.msk [vmem:[#allocation2 + $0xc0] sm:$0xff] %vm1094_vm1, %v1086_v34  ;;  %1120 = vst.msk [vmem:[#allocation2 + $0xc8] sm:$0xff] %vm1094_vm1, %v1087_v35  ;;  %v1090_v48 = vadd.f32 %v3401_v36, %v994_v31  ;;  %v1091_v49 = vadd.f32 %v3402_v37, %v995_v33  ;;  %v3409_v50 = vunpack.c.l.bf16 %v3408_v46  ;;  %v3410_v51 = vunpack.c.h.bf16 %v3408_v46  ;;  %v1129_v52 = vld [vmem:[#allocation3 + $0x18] sm:$0xff] }
 0x119   : > { %v3438_v53 = vld [vmem:[%s4749_s26 + $0x8] sm:$0xff]   ;;  %v1130_v54 = vld [vmem:[#allocation3 + $0x10] sm:$0xff]  ;;  %1121 = vst.msk [vmem:[#allocation2 + $0xd0] sm:$0xff] %vm1094_vm1, %v1088_v41  ;;  %1122 = vst.msk [vmem:[#allocation2 + $0xd8] sm:$0xff] %vm1094_vm1, %v1089_v42  ;;  %v1092_v55 = vadd.f32 %v3405_v43, %v996_v38  ;;  %v1093_v56 = vadd.f32 %v3406_v44, %v997_v40 }
 0x11a   : > { %v3413_v57 = vunpack.c.l.bf16 %v3438_v53  ;;  %v3414_v58 = vunpack.c.h.bf16 %v3438_v53  ;;  %v1131_v59 = vld [vmem:[#allocation3 + $0x8] sm:$0xff]  ;;  %v3439_v60 = vld [vmem:[%s4749_s26 + $0x10] sm:$0xff]   ;;  %v1132_v61 = vld [vmem:[#allocation3 + $0x20] sm:$0xff]  ;;  %1123 = vst.msk [vmem:[#allocation2 + $0xe0] sm:$0xff] %vm1094_vm1, %v1090_v48  ;;  %v1151_v62 = vadd.f32 %v3409_v50, %v1127_v45  ;;  %v1152_v63 = vadd.f32 %v3410_v51, %v1128_v47 }
 0x11b   : > { %1124 = vst.msk [vmem:[#allocation2 + $0xe8] sm:$0xff] %vm1094_vm1, %v1091_v49  ;;  %v3417_v0 = vunpack.c.l.bf16 %v3439_v60  ;;  %v3418_v1 = vunpack.c.h.bf16 %v3439_v60  ;;  %v1133_v2 = vld [vmem:[#allocation3 + $0x28] sm:$0xff]  ;;  %v3440_v3 = vld [vmem:[%s4749_s26 + $0x18] sm:$0xff]   ;;  %1125 = vst.msk [vmem:[#allocation2 + $0xf0] sm:$0xff] %vm1094_vm1, %v1092_v55 }
 0x11c   : > { %v1134_v4 = vld [vmem:[#allocation3 + $0x38] sm:$0xff]  ;;  %1126 = vst.msk [vmem:[#allocation2 + $0xf8] sm:$0xff] %vm1094_vm1, %v1093_v56  ;;  %v1153_v5 = vadd.f32 %v3413_v57, %v1129_v52  ;;  %v1154_v6 = vadd.f32 %v3414_v58, %v1130_v54  ;;  %v3421_v7 = vunpack.c.l.bf16 %v3440_v3  ;;  %v3422_v8 = vunpack.c.h.bf16 %v3440_v3  ;;  %v1167_v9 = vld [vmem:[#allocation4] sm:$0xff]  ;;  %1159 = vst [vmem:[#allocation3 + $0x30] sm:$0xff] %v1151_v62 }
 0x11d   : > { %v1171_v10 = vld [vmem:[%s768_s30] sm:$0xff]  ;;  %v1168_v11 = vld [vmem:[#allocation4 + $0x18] sm:$0xff]  ;;  %1160 = vst [vmem:[#allocation3] sm:$0xff] %v1152_v63  ;;  %v1155_v12 = vadd.f32 %v3417_v0, %v1131_v59  ;;  %v1156_v13 = vadd.f32 %v3418_v1, %v1132_v61  ;;  %v1170_v18 = vld [vmem:[#allocation4 + $0x8] sm:$0xff] }
 0x11e   : > { %v1173_v14 = vunpack.c.l.bf16 %v1171_v10  ;;  %v1174_v15 = vunpack.c.h.bf16 %v1171_v10  ;;  %v1169_v16 = vld [vmem:[#allocation4 + $0x10] sm:$0xff]  ;;  %v1172_v17 = vld [vmem:[%s768_s30 + $0x8] sm:$0xff]  ;;  %1161 = vst [vmem:[#allocation3 + $0x18] sm:$0xff] %v1153_v5  ;;  %1162 = vst [vmem:[#allocation3 + $0x10] sm:$0xff] %v1154_v6  ;;  %v1157_v19 = vadd.f32 %v3421_v7, %v1133_v2  ;;  %v1158_v20 = vadd.f32 %v3422_v8, %v1134_v4  ;;  %s5658_s30 = smov %s5657_s8 }
 0x11f   : > { %v1175_v21 = vunpack.c.l.bf16 %v1172_v17  ;;  %v1176_v22 = vunpack.c.h.bf16 %v1172_v17  ;;  %v1185_v23 = vld [vmem:[#allocation5 + $0x8] sm:$0xff]  ;;  %v1189_v24 = vld [vmem:[%s5657_s8] sm:$0xff]  ;;  %1163 = vst [vmem:[#allocation3 + $0x8] sm:$0xff] %v1155_v12  ;;  %1164 = vst [vmem:[#allocation3 + $0x20] sm:$0xff] %v1156_v13 }
 0x120   : > { %v1186_v25 = vld [vmem:[#allocation5 + $0x10] sm:$0xff]  ;;  %v1177_v26 = vadd.f32 %v1173_v14, %v1167_v9  ;;  %v1178_v27 = vadd.f32 %v1174_v15, %v1168_v11  ;;  %v1191_v28 = vunpack.c.l.bf16 %v1189_v24  ;;  %v1192_v29 = vunpack.c.h.bf16 %v1189_v24  ;;  %v1187_v30 = vld [vmem:[#allocation5] sm:$0xff]  ;;  %v1190_v31 = vld [vmem:[%s5658_s30 + $0x8] sm:$0xff]  ;;  %1165 = vst [vmem:[#allocation3 + $0x28] sm:$0xff] %v1157_v19 }
 0x121   : > { %v1188_v32 = vld [vmem:[#allocation5 + $0x18] sm:$0xff]  ;;  %1166 = vst [vmem:[#allocation3 + $0x38] sm:$0xff] %v1158_v20  ;;  %v1179_v33 = vadd.f32 %v1175_v21, %v1169_v16  ;;  %v1180_v34 = vadd.f32 %v1176_v22, %v1170_v18  ;;  %v1193_v35 = vunpack.c.l.bf16 %v1190_v31  ;;  %v1194_v36 = vunpack.c.h.bf16 %v1190_v31  ;;  %1206 = sbr.rel (%p3234_p2) target bundleno = 1296 (0x510), region = 148 }
 0x122   : > { %1181 = vst [vmem:[#allocation4] sm:$0xff] %v1177_v26  ;;  %1182 = vst [vmem:[#allocation4 + $0x18] sm:$0xff] %v1178_v27  ;;  %v1195_v37 = vadd.f32 %v1191_v28, %v1185_v23  ;;  %v1196_v38 = vadd.f32 %v1192_v29, %v1186_v25 }
 0x123   : > { %1183 = vst [vmem:[#allocation4 + $0x10] sm:$0xff] %v1179_v33  ;;  %1184 = vst [vmem:[#allocation4 + $0x8] sm:$0xff] %v1180_v34  ;;  %v1197_v39 = vadd.f32 %v1193_v35, %v1187_v30  ;;  %v1198_v40 = vadd.f32 %v1194_v36, %v1188_v32 }
 0x124   : > { %1199 = vst [vmem:[#allocation5 + $0x8] sm:$0xff] %v1195_v37  ;;  %1200 = vst [vmem:[#allocation5 + $0x10] sm:$0xff] %v1196_v38 }
 0x125   : > { %1201 = vst [vmem:[#allocation5] sm:$0xff] %v1197_v39  ;;  %1202 = vst [vmem:[#allocation5 + $0x18] sm:$0xff] %v1198_v40 }
 0x126   : > { %v3700_v41 = vld [vmem:[#allocation18 + $0x18] sm:$0xff]   ;;  %v1326_v42 = vlaneseq  ;;  %v3701_v43 = vld [vmem:[#allocation18 + $0x10] sm:$0xff]   ;;  %v3702_v45 = vld [vmem:[#allocation18 + $0x8] sm:$0xff]   ;;  %vm1337_vm3 = vcmask 1040384   ;;  %vm1331_vm5 = vcmask 516096  }
 0x127   : > { %3461 = vmatprep.subr.bf16.mxu0 %v3700_v41  ;;  %v1207_v47 = vld [vmem:[#allocation2] sm:$0xff]  ;;  %v1208_v48 = vld [vmem:[#allocation2 + $0x8] sm:$0xff]  ;;  %v4851_v49 = vld [vmem:[#allocation2 + $0x10] sm:$0xff] }
 0x128   : > { %v4847_v44 = vand.u32 127, %v1326_v42  ;;  %3462 = vmatpush3.bf16.msra.mxu0 %v3700_v41  ;;  %v4849_v46 = vshrl.u32 %v1326_v42, 7  ;;  %v1255_v50 = vsel %vm1094_vm1, %v1207_v47, 0.0  ;;  %v1256_v51 = vsel %vm1094_vm1, %v1208_v48, 0.0  ;;  %v4859_v54 = vld [vmem:[#allocation2 + $0x18] sm:$0xff]  ;;  %v3703_v56 = vld [vmem:[#allocation18] sm:$0xff]  }
 0x129   : > { %3463 = vmatprep.subr.bf16.mxu0 %v3701_v43  ;;  %v1258_v52 = vsel %vm1094_vm1, %v4851_v49, 0.0  ;;  %v1675_v53 = vpack.c.bf16 %v1208_v48, %v1207_v47  ;;  %v4864_v55 = vld [vmem:[%s5659_s10] sm:$0x1]  ;;  %v1257_v57 = vadd.f32 %v1256_v51, %v1255_v50  ;;  %v1260_v58 = vsel %vm1094_vm1, %v4859_v54, 0.0  ;;  %v4875_v62 = vld [vmem:[#allocation2 + $0x28] sm:$0xff]  ;;  %v1248_v4 = vld [vmem:[#allocation4 + $0x18] sm:$0xff] }
 0x12a   : > { %vm1335_vm2 = vcmp.eq.s32.totalorder %v4847_v44, 0  ;;  %vm1349_vm4 = vcmp.eq.s32.totalorder %v4847_v44, 1  ;;  %v1676_v59 = vpack.c.bf16 %v4859_v54, %v4851_v49  ;;  %v4873_v61 = vld [vmem:[#allocation2 + $0x20] sm:$0xff]  ;;  %v4880_v1 = vsub.s32 0, %v4849_v46  ;;  %v1249_v5 = vld [vmem:[#allocation4 + $0x10] sm:$0xff]  ;;  %v1250_v10 = vld [vmem:[#allocation4 + $0x8] sm:$0xff] }
 0x12b   : > { %v1336_v60 = vsel %vm1335_vm2, %v4864_v55, 0.0  ;;  %v1247_v63 = vld [vmem:[#allocation4] sm:$0xff]  ;;  %3469 = vmatprep.mubr.msk.bf16.mxu0 %vm1094_vm1, %v1675_v53  ;;  %v4883_v2 = vsub.s32 1, %v4849_v46  ;;  %v1262_v3 = vsel %vm1094_vm1, %v4873_v61, 0.0  ;;  %v1259_v6 = vadd.f32 %v1258_v52, %v1257_v57  ;;  %v4902_v16 = vld [vmem:[#allocation2 + $0x30] sm:$0xff]  ;;  %v4904_v17 = vld [vmem:[#allocation2 + $0x38] sm:$0xff] }
 0x12c   : > { %3464 = vmatpush3.bf16.msra.mxu0 %v3701_v43  ;;  %v1338_v0 = vsel %vm1337_vm3, %v1336_v60, 0.0  ;;  %v1264_v7 = vsel %vm1094_vm1, %v4875_v62, 0.0  ;;  %v1677_v8 = vpack.c.bf16 %v4875_v62, %v4873_v61  ;;  %v1350_v9 = vsel %vm1349_vm4, %v4864_v55, 0.0  ;;  %v4897_v11 = vld [vmem:[%s5660_s24] ss:$2 sm:$0x3] }
 0x12d   : > { %3465 = vmatprep.subr.bf16.mxu0 %v3702_v45  ;;  %1339 = vadd.xlane.f32.xlu0 %v1338_v0  ;;  %v1351_v12 = vsel %vm1337_vm3, %v1350_v9, 0.0  ;;  %v1398_v13 = vadd.f32 %v1249_v5, %v1247_v63  ;;  %v1405_v14 = vadd.f32 %v1250_v10, %v1248_v4  ;;  %v1421_v15 = vrot.slane %v4897_v11, %v4880_v1  ;;  %v4906_v18 = vld [vmem:[#allocation14] sm:$0x1]  ;;  %v4917_v23 = vld [vmem:[%s5660_s24 + $0x1] ss:$2 sm:$0x3] }
 0x12e   : > { %v1261_v19 = vadd.f32 %v1260_v58, %v1259_v6  ;;  %1352 = vadd.xlane.f32.xlu1 %v1351_v12  ;;  %v1425_v20 = vrot.slane %v4897_v11, %v4883_v2  ;;  %v1266_v21 = vsel %vm1094_vm1, %v4902_v16, 0.0  ;;  %v1268_v22 = vsel %vm1094_vm1, %v4904_v17, 0.0  ;;  %v4919_v24 = vld [vmem:[#allocation2 + $0x40] sm:$0xff]  ;;  %v4926_v29 = vld [vmem:[#allocation2 + $0x48] sm:$0xff]  ;;  %v1252_v35 = vld [vmem:[#allocation5 + $0x10] sm:$0xff] }
 0x12f   : > { %v1399_v25 = vrot.slane %v1398_v13, 4  ;;  %v1406_v26 = vrot.slane %v1405_v14, 4  ;;  %v1678_v27 = vpack.c.bf16 %v4904_v17, %v4902_v16  ;;  %v1378_v28 = vsel %vm1335_vm2, %v4906_v18, 0.0  ;;  %v1251_v30 = vld [vmem:[#allocation5 + $0x8] sm:$0xff]  ;;  %v1253_v40 = vld [vmem:[#allocation5] sm:$0xff]  ;;  %v1254_v41 = vld [vmem:[#allocation5 + $0x18] sm:$0xff] }
 0x130   : > { %3466 = vmatpush3.bf16.msra.mxu0 %v3702_v45  ;;  %v1263_v31 = vadd.f32 %v1262_v3, %v1261_v19  ;;  %v1379_v32 = vsel %vm1337_vm3, %v1378_v28, 0.0  ;;  %v1448_v33 = vrot.slane %v4917_v23, %v4880_v1  ;;  %v1452_v34 = vrot.slane %v4917_v23, %v4883_v2  ;;  %v4945_v48 = vld [vmem:[%s5661_s21] ss:$2 sm:$0xf] }
 0x131   : > { %3467 = vmatprep.subr.bf16.mxu0 %v3703_v56  ;;  %v1400_v36 = vadd.f32 %v1399_v25, %v1398_v13  ;;  %v1407_v37 = vadd.f32 %v1406_v26, %v1405_v14  ;;  %v1270_v38 = vsel %vm1094_vm1, %v4919_v24, 0.0  ;;  %v1272_v39 = vsel %vm1094_vm1, %v4926_v29, 0.0 }
 0x132   : > { %v1265_v42 = vadd.f32 %v1264_v7, %v1263_v31  ;;  %1380 = vadd.xlane.f32.xlu1 %v1379_v32  ;;  %v1679_v43 = vpack.c.bf16 %v4926_v29, %v4919_v24  ;;  %v1390_v45 = vsel %vm1349_vm4, %v4906_v18, 0.0  ;;  %v1470_v47 = vrot.slane %v1251_v30, 4  ;;  %v1220_v29 = vld [vmem:[#allocation2 + $0x68] sm:$0xff] }
 0x133   : > { %v1401_v50 = vrot.slane %v1400_v36, 2  ;;  %v1408_v51 = vrot.slane %v1407_v37, 2  ;;  %v1391_v52 = vsel %vm1337_vm3, %v1390_v45, 0.0  ;;  %v1476_v53 = vrot.slane %v1252_v35, 4  ;;  %v1217_v45 = vld [vmem:[#allocation2 + $0x50] sm:$0xff] }
 0x134   : > { %3468 = vmatpush3.bf16.msra.mxu0 %v3703_v56  ;;  %v1267_v57 = vadd.f32 %v1266_v21, %v1265_v42  ;;  %v1471_v58 = vadd.f32 %v1470_v47, %v1251_v30  ;;  %v1482_v60 = vrot.slane %v1253_v40, 4  ;;  %v1488_v61 = vrot.slane %v1254_v41, 4  ;;  %v1218_v47 = vld [vmem:[#allocation2 + $0x58] sm:$0xff] }
 0x135   : > { %v1402_v62 = vadd.f32 %v1401_v50, %v1400_v36  ;;  %v1409_v63 = vadd.f32 %v1408_v51, %v1407_v37  ;;  %v1477_v0 = vadd.f32 %v1476_v53, %v1252_v35  ;;  %v1505_v3 = vrot.slane %v4945_v48, %v4880_v1  ;;  %v4977_v53 = vld [vmem:[#allocation15] sm:$0x1] }
 0x136   : > { %v1269_v56 = vadd.f32 %v1268_v22, %v1267_v57  ;;  %1392 = vadd.xlane.f32.xlu1 %v1391_v52  ;;  %v1472_v4 = vrot.slane %v1471_v58, 2  ;;  %v1483_v5 = vadd.f32 %v1482_v60, %v1253_v40  ;;  %v1489_v6 = vadd.f32 %v1488_v61, %v1254_v41  ;;  %v1239_v57 = vld [vmem:[#allocation3 + $0x30] sm:$0xff]  ;;  %v1219_v60 = vld [vmem:[#allocation2 + $0x60] sm:$0xff] }
 0x137   : > { %3470 = vmatmul.mubr.msk.bf16.vlgmr.msra.gmra.mxu0 %vm1094_vm1, %v1676_v59  ;;  %v1403_v7 = vrot.slane %v1402_v62, 1  ;;  %v1410_v9 = vrot.slane %v1409_v63, 1  ;;  %v1478_v10 = vrot.slane %v1477_v0, 2  ;;  %v1509_v12 = vrot.slane %v4945_v48, %v4883_v2 }
 0x138   : > { %3473 = vmatprep.mubr.msk.bf16.mxu0 %vm1094_vm1, %v1677_v8  ;;  %v1271_v13 = vadd.f32 %v1270_v38, %v1269_v56  ;;  %v1473_v14 = vadd.f32 %v1472_v4, %v1471_v58  ;;  %v1484_v19 = vrot.slane %v1483_v5, 2  ;;  %v1490_v21 = vrot.slane %v1489_v6, 2  ;;  %v1240_v58 = vld [vmem:[#allocation3] sm:$0xff] }
 0x139   : > { %v1404_v49 = vadd.f32 %v1403_v7, %v1402_v62  ;;  %v1411_v54 = vadd.f32 %v1410_v9, %v1409_v63  ;;  %v1479_v59 = vadd.f32 %v1478_v10, %v1477_v0  ;;  %v4958_v22 = vsub.s32 2, %v4849_v46 }
 0x13a   : > { %v1273_v23 = vadd.f32 %v1272_v39, %v1271_v13  ;;  %v1474_v25 = vrot.slane %v1473_v14, 1  ;;  %v1485_v26 = vadd.f32 %v1484_v19, %v1483_v5  ;;  %v1491_v8 = vadd.f32 %v1490_v21, %v1489_v6  ;;  %v1241_v5 = vld [vmem:[#allocation3 + $0x18] sm:$0xff]  ;;  %v1221_v6 = vld [vmem:[#allocation2 + $0x70] sm:$0xff] }
 0x13b   : > { %v1413_v28 = vmul.f32 0.0625, %v1404_v49  ;;  %v1414_v30 = vmul.f32 0.0625, %v1411_v54  ;;  %v1480_v31 = vrot.slane %v1479_v59, 1  ;;  %v1513_v32 = vrot.slane %v4945_v48, %v4958_v22  ;;  %v1242_v19 = vld [vmem:[#allocation3 + $0x10] sm:$0xff]  ;;  %v1222_v21 = vld [vmem:[#allocation2 + $0x78] sm:$0xff] }
 0x13c   : > { %v1475_v35 = vadd.f32 %v1474_v25, %v1473_v14  ;;  %v1486_v36 = vrot.slane %v1485_v26, 1  ;;  %v1492_v37 = vrot.slane %v1491_v8, 1  ;;  %v4963_v38 = vsub.s32 3, %v4849_v46  ;;  %v1243_v25 = vld [vmem:[#allocation3 + $0x8] sm:$0xff] }
 0x13d   : > { %v1428_v40 = vmul.f32 %v1421_v15, %v1413_v28  ;;  %v1429_v39 = vmul.f32 %v1425_v20, %v1414_v30  ;;  %v1455_v41 = vmul.f32 %v1448_v33, %v1413_v28  ;;  %v1456_v42 = vmul.f32 %v1452_v34, %v1414_v30 }
 0x13e   : > { %v1481_v50 = vadd.f32 %v1480_v31, %v1479_v59  ;;  %v1487_v46 = vadd.f32 %v1486_v36, %v1485_v26  ;;  %v1493_v51 = vadd.f32 %v1492_v37, %v1491_v8  ;;  %v4975_v52 = vmul.f32 0.125, %v1475_v35  ;;  %v1223_v31 = vld [vmem:[#allocation2 + $0x80] sm:$0xff] }
 0x13f   : > { %3474 = vmatmul.mubr.msk.bf16.gmra.mxu0 %vm1094_vm1, %v1678_v27  ;;  %v1430_v15 = vsel %vm1337_vm3, %v1428_v40, 0.0  ;;  %v1431_v11 = vsel %vm1337_vm3, %v1429_v39, 0.0  ;;  %v1457_v20 = vsel %vm1337_vm3, %v1455_v41, 0.0  ;;  %v1458_v33 = vsel %vm1337_vm3, %v1456_v42, 0.0  ;;  %v5017_v40 = vld [vmem:[#allocation3 + $0x20] sm:$0xff]  ;;  %v1224_v41 = vld [vmem:[#allocation2 + $0x88] sm:$0xff] }
 0x140   : > { %3477 = vmatprep.mubr.msk.bf16.mxu0 %vm1094_vm1, %v1679_v43  ;;  %v1432_v16 = vadd.f32 %v1431_v11, %v1430_v15  ;;  %v1459_v17 = vadd.f32 %v1458_v33, %v1457_v20  ;;  %v4987_v27 = vmul.f32 0.125, %v1481_v50  ;;  %v4989_v34 = vmul.f32 0.125, %v1487_v46  ;;  %v5021_v50 = vld [vmem:[#allocation3 + $0x28] sm:$0xff]  ;;  %v1225_v15 = vld [vmem:[#allocation2 + $0x90] sm:$0xff] }
 0x141   : > { %v4991_v61 = vmul.f32 0.125, %v1493_v51  ;;  %v1517_v62 = vrot.slane %v4945_v48, %v4963_v38  ;;  %v1522_v63 = vmul.f32 %v1505_v3, %v4975_v52  ;;  %v1274_v24 = vsel %vm1094_vm1, %v1217_v45, 0.0  ;;  %v5023_v11 = vld [vmem:[#allocation17] sm:$0x1] }
 0x142   : > { %1433 = vadd.xlane.f32.xlu0 %v1432_v16  ;;  %v1523_v43 = vmul.f32 %v1509_v12, %v4987_v27  ;;  %v1524_v0 = vmul.f32 %v1513_v32, %v4989_v34  ;;  %v1275_v56 = vadd.f32 %v1274_v24, %v1273_v23  ;;  %v1276_v4 = vsel %vm1094_vm1, %v1218_v47, 0.0  ;;  %v1227_v24 = vld [vmem:[#allocation2 + $0xa0] sm:$0xff] }
 0x143   : > { %v1525_v7 = vmul.f32 %v1517_v62, %v4991_v61  ;;  %v1526_v9 = vsel %vm1337_vm3, %v1522_v63, 0.0  ;;  %v1680_v48 = vpack.c.bf16 %v1218_v47, %v1217_v45  ;;  %v1435_v3 = vsel %vm1335_vm2, %v4977_v53, 0.0 }
 0x144   : > { %v1527_v10 = vsel %vm1337_vm3, %v1523_v43, 0.0  ;;  %v1529_v12 = vsel %vm1337_vm3, %v1524_v0, 0.0  ;;  %v1277_v13 = vadd.f32 %v1276_v4, %v1275_v56  ;;  %v1436_v14 = vsel %vm1337_vm3, %v1435_v3, 0.0  ;;  %v1228_v4 = vld [vmem:[#allocation2 + $0xa8] sm:$0xff]  ;;  %v1229_v3 = vld [vmem:[#allocation2 + $0xb0] sm:$0xff] }
 0x145   : > { %v1528_v49 = vadd.f32 %v1527_v10, %v1526_v9  ;;  %v1531_v54 = vsel %vm1337_vm3, %v1525_v7, 0.0  ;;  %1437 = vadd.xlane.f32.xlu1 %v1436_v14  ;;  %v1357_v59 = vadd.f32 %v1240_v58, %v1239_v57  ;;  %v1278_v23 = vsel %vm1094_vm1, %v1219_v60, 0.0  ;;  %v1226_v58 = vld [vmem:[#allocation2 + $0x98] sm:$0xff] }
 0x146   : > { %1460 = vadd.xlane.f32.xlu0 %v1459_v17  ;;  %v1279_v26 = vadd.f32 %v1278_v23, %v1277_v13  ;;  %v1280_v8 = vsel %vm1094_vm1, %v1220_v29, 0.0  ;;  %v1681_v28 = vpack.c.bf16 %v1220_v29, %v1219_v60  ;;  %v1462_v30 = vsel %vm1349_vm4, %v4977_v53, 0.0  ;;  %v5026_v17 = vld [vmem:[#allocation3 + $0x38] sm:$0xff] }
 0x147   : > { %3478 = vmatmul.mubr.msk.bf16.gmra.mxu0 %vm1094_vm1, %v1680_v48  ;;  %v1530_v32 = vadd.f32 %v1529_v12, %v1528_v49  ;;  %v1358_v35 = vadd.f32 %v1357_v59, %v1241_v5  ;;  %v1463_v36 = vsel %vm1337_vm3, %v1462_v30, 0.0  ;;  %v1282_v37 = vsel %vm1094_vm1, %v1221_v6, 0.0  ;;  %v1231_v59 = vld [vmem:[#allocation2 + $0xc0] sm:$0xff] }
 0x148   : > { %v1281_v39 = vadd.f32 %v1280_v8, %v1279_v26  ;;  %3481 = vmatprep.mubr.msk.bf16.mxu0 %vm1094_vm1, %v1681_v28  ;;  %v1284_v47 = vsel %vm1094_vm1, %v1222_v21, 0.0  ;;  %v1682_v51 = vpack.c.bf16 %v1222_v21, %v1221_v6  ;;  %v1286_v33 = vsel %vm1094_vm1, %v1223_v31, 0.0 }
 0x149   : > { %v1532_v42 = vadd.f32 %v1531_v54, %v1530_v32  ;;  %v1359_v45 = vadd.f32 %v1358_v35, %v1242_v19  ;;  %1464 = vadd.xlane.f32.xlu1 %v1463_v36  ;;  %v1683_v16 = vpack.c.bf16 %v1224_v41, %v1223_v31  ;;  %v1288_v62 = vsel %vm1094_vm1, %v1224_v41, 0.0  ;;  %v1230_v19 = vld [vmem:[#allocation2 + $0xb8] sm:$0xff]  ;;  %v1232_v32 = vld [vmem:[#allocation2 + $0xc8] sm:$0xff]  ;;  %v1233_v41 = vld [vmem:[#allocation2 + $0xd0] sm:$0xff] }
 0x14a   : > { %v1283_v46 = vadd.f32 %v1282_v37, %v1281_v39  ;;  %v1290_v43 = vsel %vm1094_vm1, %v1225_v15, 0.0  ;;  %v1535_v0 = vsel %vm1335_vm2, %v5023_v11, 0.0  ;;  %v1292_v7 = vsel %vm1094_vm1, %v1226_v58, 0.0 }
 0x14b   : > { %1533 = vadd.xlane.f32.xlu0 %v1532_v42  ;;  %v1360_v20 = vadd.f32 %v1359_v45, %v1243_v25  ;;  %v1536_v5 = vsel %vm1337_vm3, %v1535_v0, 0.0  ;;  %v1684_v48 = vpack.c.bf16 %v1226_v58, %v1225_v15  ;;  %v1294_v12 = vsel %vm1094_vm1, %v1227_v24, 0.0  ;;  %v1234_v15 = vld [vmem:[#allocation2 + $0xd8] sm:$0xff] }
 0x14c   : > { %v1285_v57 = vadd.f32 %v1284_v47, %v1283_v46  ;;  %v1685_v13 = vpack.c.bf16 %v1228_v4, %v1227_v24  ;;  %v1296_v49 = vsel %vm1094_vm1, %v1228_v4, 0.0  ;;  %v1298_v25 = vsel %vm1094_vm1, %v1229_v3, 0.0  ;;  %v1373_v47 = vld [vmem:[#allocation12] sm:$0x1]  ;;  %v1385_v46 = vld [vmem:[#allocation12 + $0x1] sm:$0x1] }
 0x14d   : > { %v1361_v60 = vadd.f32 %v1360_v20, %v5017_v40  ;;  %1537 = vadd.xlane.f32.xlu1 %v1536_v5  ;;  %v1300_v28 = vsel %vm1094_vm1, %v1230_v19, 0.0  ;;  %v1686_v31 = vpack.c.bf16 %v1230_v19, %v1229_v3  ;;  %v1302_v36 = vsel %vm1094_vm1, %v1231_v59, 0.0  ;;  %v1237_v5 = vld [vmem:[#allocation2 + $0xf0] sm:$0xff] }
 0x14e   : > { %v1287_v63 = vadd.f32 %v1286_v33, %v1285_v57  ;;  %v1687_v37 = vpack.c.bf16 %v1232_v32, %v1231_v59  ;;  %v1304_v45 = vsel %vm1094_vm1, %v1232_v32, 0.0  ;;  %v1306_v33 = vsel %vm1094_vm1, %v1233_v41, 0.0  ;;  %v1235_v57 = vld [vmem:[#allocation2 + $0xe0] sm:$0xff] }
 0x14f   : > { %3482 = vmatmul.mubr.msk.bf16.gmra.mxu0 %vm1094_vm1, %v1682_v51  ;;  %v1362_v29 = vadd.f32 %v1361_v60, %v5021_v50  ;;  %v1688_v24 = vpack.c.bf16 %v1234_v15, %v1233_v41  ;;  %v1310_v0 = vsel %vm1094_vm1, %v1235_v57, 0.0  ;;  %v1314_v3 = vsel %vm1094_vm1, %v1237_v5, 0.0 }
 0x150   : > { %3485 = vmatprep.mubr.msk.bf16.mxu0 %vm1094_vm1, %v1683_v16  ;;  %v1289_v56 = vadd.f32 %v1288_v62, %v1287_v63  ;;  %v1308_v62 = vsel %vm1094_vm1, %v1234_v15, 0.0 }
 0x151   : > { %v1363_v6 = vadd.f32 %v1362_v29, %v5026_v17  ;;  %v1236_v29 = vld [vmem:[#allocation2 + $0xe8] sm:$0xff] }
 0x152   : > { %v1291_v9 = vadd.f32 %v1290_v43, %v1289_v56  ;;  %v1689_v56 = vpack.c.bf16 %v1236_v29, %v1235_v57 }
 0x153   : > { %v1364_v10 = vrot.slane %v1363_v6, 4 }
 0x154   : > { %v1293_v14 = vadd.f32 %v1292_v7, %v1291_v9  ;;  %v1312_v7 = vsel %vm1094_vm1, %v1236_v29, 0.0 }
 0x155   : > { %v1365_v21 = vadd.f32 %v1364_v10, %v1363_v6 }
 0x156   : > { %v1295_v54 = vadd.f32 %v1294_v12, %v1293_v14 }
 0x157   : > { %3486 = vmatmul.mubr.msk.bf16.gmra.mxu0 %vm1094_vm1, %v1684_v48  ;;  %v1366_v23 = vrot.slane %v1365_v21, 2  ;;  %v1238_v48 = vld [vmem:[#allocation2 + $0xf8] sm:$0xff] }
 0x158   : > { %3489 = vmatprep.mubr.msk.bf16.mxu0 %vm1094_vm1, %v1685_v13  ;;  %v1297_v26 = vadd.f32 %v1296_v49, %v1295_v54  ;;  %v1316_v12 = vsel %vm1094_vm1, %v1238_v48, 0.0  ;;  %v3236_v13 = vld [vmem:[%s5661_s21 + $0x1] ss:$2 sm:$0xf]  ;;  %v1690_v19 = vpack.c.bf16 %v1238_v48, %v1237_v5  ;;  %v3706_v5 = vld [vmem:[%s5662_s19 + $0x70] ss:$8 sps:$4 sm:$0xff]  }
 0x159   : > { %v1367_v8 = vadd.f32 %v1366_v23, %v1365_v21  ;;  %v1548_v49 = vrot.slane %v3236_v13, %v4880_v1  ;;  %v1552_v54 = vrot.slane %v3236_v13, %v4883_v2  ;;  %v3710_v48 = vld [vmem:[%s5662_s19 + $0x54] ss:$8 sps:$4 sm:$0xff]  }
 0x15a   : > { %v1299_v30 = vadd.f32 %v1298_v25, %v1297_v26  ;;  %v1556_v25 = vrot.slane %v3236_v13, %v4958_v22 }
 0x15b   : > { %v1368_v35 = vrot.slane %v1367_v8, 1  ;;  %v1565_v26 = vmul.f32 %v1548_v49, %v4975_v52  ;;  %v1344_v52 = vld [vmem:[#allocation11 + $0x1] sm:$0x1] }
 0x15c   : > { %v1301_v39 = vadd.f32 %v1300_v28, %v1299_v30  ;;  %v1560_v30 = vrot.slane %v3236_v13, %v4963_v38  ;;  %v1567_v32 = vmul.f32 %v1556_v25, %v4989_v34  ;;  %v4358_v25 = vmov 0  }
 0x15d   : > { %v1369_v42 = vadd.f32 %v1368_v35, %v1367_v8  ;;  %v1566_v8 = vmul.f32 %v1552_v54, %v4987_v27  ;;  %v1569_v35 = vsel %vm1337_vm3, %v1565_v26, 0.0  ;;  %2167 = vmatprep.mubr.bf16.mxu1 %v4358_v25 }
 0x15e   : > { %v1303_v51 = vadd.f32 %v1302_v36, %v1301_v39 }
 0x15f   : > { %3490 = vmatmul.mubr.msk.bf16.gmra.mxu0 %vm1094_vm1, %v1686_v31  ;;  %v1371_v20 = vmul.f32 0.015625, %v1369_v42  ;;  %v1570_v36 = vsel %vm1337_vm3, %v1566_v8, 0.0  ;;  %v1568_v42 = vmul.f32 %v1560_v30, %v4991_v61  ;;  %v3716_v8 = vld [vmem:[%s5662_s19 + $0x34] ss:$8 sps:$4 sm:$0xff]  }
 0x160   : > { %3493 = vmatprep.mubr.msk.bf16.mxu0 %vm1094_vm1, %v1687_v37  ;;  %v1305_v16 = vadd.f32 %v1304_v45, %v1303_v51  ;;  %v1571_v39 = vadd.f32 %v1570_v36, %v1569_v35  ;;  %v1572_v45 = vsel %vm1337_vm3, %v1567_v32, 0.0  ;;  %v3718_v32 = vld [vmem:[%s5662_s19 + $0x30] ss:$8 sps:$4 sm:$0xff]   ;;  %v3719_v36 = vld [vmem:[%s5662_s19 + $0x24] ss:$8 sps:$4 sm:$0xff]  }
 0x161   : > { %v1374_v58 = vmul.f32 %v1373_v47, %v1371_v20  ;;  %v1386_v60 = vmul.f32 %v1385_v46, %v1371_v20  ;;  %v1329_v47 = vld [vmem:[#allocation11] sm:$0x1]  ;;  %v1574_v34 = vsel %vm1337_vm3, %v1568_v42, 0.0  ;;  %v1578_v20 = vsel %vm1349_vm4, %v5023_v11, 0.0 }
 0x162   : > { %v1307_v63 = vadd.f32 %v1306_v33, %v1305_v16  ;;  %v1573_v46 = vadd.f32 %v1572_v45, %v1571_v39  ;;  %v1579_v57 = vsel %vm1337_vm3, %v1578_v20, 0.0 }
 0x163   : > { %v1375_v43 = vsel %vm1337_vm3, %v1374_v58, 0.0  ;;  %v1387_v6 = vsel %vm1337_vm3, %v1386_v60, 0.0 }
 0x164   : > { %1376 = vadd.xlane.f32.xlu0 %v1375_v43  ;;  %v1309_v4 = vadd.f32 %v1308_v62, %v1307_v63  ;;  %v1575_v61 = vadd.f32 %v1574_v34, %v1573_v46 }
 0x166   : > { %v1311_v9 = vadd.f32 %v1310_v0, %v1309_v4 }
 0x167   : > { %3494 = vmatmul.mubr.msk.bf16.gmra.mxu0 %vm1094_vm1, %v1688_v24 }
 0x168   : > { %3497 = vmatprep.mubr.msk.bf16.mxu0 %vm1094_vm1, %v1689_v56  ;;  %1388 = vadd.xlane.f32.xlu0 %v1387_v6  ;;  %v1313_v10 = vadd.f32 %v1312_v7, %v1311_v9  ;;  %v3704_v56 = vld [vmem:[%s5662_s19 + $0x74] ss:$8 sps:$4 sm:$0xff]   ;;  %v3707_v6 = vld [vmem:[%s5662_s19 + $0x64] ss:$8 sps:$4 sm:$0xff]   ;;  %v3709_v9 = vld [vmem:[%s5662_s19 + $0x60] ss:$8 sps:$4 sm:$0xff]  }
 0x169   : > { %2135 = vmatprep.subr.bf16.mxu1 %v3704_v56 }
 0x16a   : > { %v1315_v14 = vadd.f32 %v1314_v3, %v1313_v10  ;;  %2136 = vmatpush1.bf16.msra.mxu1 %v3706_v5 }
 0x16b   : > { %2137 = vmatprep.subr.bf16.mxu1 %v3707_v6 }
 0x16c   : > { %v1317_v21 = vadd.f32 %v1316_v12, %v1315_v14  ;;  %v3712_v12 = vld [vmem:[%s5662_s19 + $0x50] ss:$8 sps:$4 sm:$0xff]  }
 0x16e   : > { %v1318_v59 = vrot.slane %v1317_v21, 4  ;;  %2138 = vmatpush1.bf16.msra.mxu1 %v3709_v9 }
 0x16f   : > { %3498 = vmatmul.mubr.msk.bf16.gmra.mxu0 %vm1094_vm1, %v1690_v19  ;;  %2139 = vmatprep.subr.bf16.mxu1 %v3710_v48  ;;  %v3713_v19 = vld [vmem:[%s5662_s19 + $0x44] ss:$8 sps:$4 sm:$0xff]  }
 0x170   : > { %v1319_v23 = vadd.f32 %v1318_v59, %v1317_v21 }
 0x172   : > { %v1320_v28 = vrot.slane %v1319_v23, 2  ;;  %2140 = vmatpush1.bf16.msra.mxu1 %v3712_v12 }
 0x173   : > { %2141 = vmatprep.subr.bf16.mxu1 %v3713_v19 }
 0x174   : > { %v1321_v31 = vadd.f32 %v1320_v28, %v1319_v23  ;;  %v3715_v23 = vld [vmem:[%s5662_s19 + $0x40] ss:$8 sps:$4 sm:$0xff]  }
 0x176   : > { %v1322_v37 = vrot.slane %v1321_v31, 1  ;;  %2142 = vmatpush1.bf16.msra.mxu1 %v3715_v23 }
 0x177   : > { %2143 = vmatprep.subr.bf16.mxu1 %v3716_v8 }
 0x178   : > { %v1323_v41 = vadd.f32 %v1322_v37, %v1321_v31 }
 0x17a   : > { %v1325_v27 = vmul.f32 0.00390625, %v1323_v41  ;;  %2144 = vmatpush1.bf16.msra.mxu1 %v3718_v32 }
 0x17b   : > { %2145 = vmatprep.subr.bf16.mxu1 %v3719_v36 }
 0x17c   : > { %v1345_v51 = vmul.f32 %v1344_v52, %v1325_v27  ;;  %v1330_v15 = vmul.f32 %v1329_v47, %v1325_v27  ;;  %v3721_v52 = vld [vmem:[%s5662_s19 + $0x20] ss:$8 sps:$4 sm:$0xff]   ;;  %v3722_v27 = vld [vmem:[%s5662_s19 + $0x14] ss:$8 sps:$4 sm:$0xff]  }
 0x17e   : > { %v1346_v33 = vsel %vm1331_vm5, %v1345_v51, 0.0  ;;  %v1332_v16 = vsel %vm1331_vm5, %v1330_v15, 0.0  ;;  %2146 = vmatpush1.bf16.msra.mxu1 %v3721_v52 }
 0x17f   : > { %1347 = vadd.xlane.f32.xlu1 %v1346_v33  ;;  %1333 = vadd.xlane.f32.xlu0 %v1332_v16  ;;  %v3724_v16 = vld [vmem:[%s5662_s19 + $0x10] ss:$8 sps:$4 sm:$0xff]  }
 0x180   : > { %2147 = vmatprep.subr.bf16.mxu1 %v3722_v27 }
 0x182   : > { %2148 = vmatpush1.bf16.msra.mxu1 %v3724_v16 }
 0x183   : > { %1580 = vadd.xlane.f32.xlu1 %v1579_v57  ;;  %1576 = vadd.xlane.f32.xlu0 %v1575_v61 }
 0x1b6   : > { %v5080_v58 = vpop.xlane.xlu0 %1339 }
 0x1b7   : > { %v5082_v62 = vpop.xlane.xlu1 %1352 }
 0x1bb   : > { %v1381_v24 = vpop.xlane.xlu1 %1380 }
 0x1bf   : > { %v1393_v43 = vpop.xlane.xlu1 %1392 }
 0x1cb   : > { %v1434_v60 = vpop.xlane.xlu0 %1433 }
 0x1cc   : > { %v1440_v61 = vsel %vm1335_vm2, %v1434_v60, 0.0 }
 0x1cd   : > { %v1441_v6 = vadd.f32 %v1440_v61, %v4977_v53 }
 0x1ce   : > { %v1438_v4 = vpop.xlane.xlu1 %1437 }
 0x1cf   : > { %v5084_v63 = vpop.xlane.xlu0 %1460  ;;  %v1439_v49 = vadd.f32 %v1438_v4, %v1434_v60 }
 0x1d0   : > { %v1467_v48 = vsel %vm1349_vm4, %v5084_v63, 0.0 }
 0x1d1   : > { %v1468_v23 = vadd.f32 %v1467_v48, %v1441_v6 }
 0x1d2   : > { %v1465_v3 = vpop.xlane.xlu1 %1464 }
 0x1d3   : > { %v1466_v54 = vadd.f32 %v1465_v3, %v5084_v63 }
 0x1d4   : > { %v5086_v29 = vpop.xlane.xlu0 %1533 }
 0x1d5   : > { %v1615_v30 = vmax.f32 %v1439_v49, %v1466_v54  ;;  %v1540_v53 = vsel %vm1335_vm2, %v5086_v29, 0.0 }
 0x1d6   : > { %v1538_v51 = vpop.xlane.xlu1 %1537  ;;  %v1541_v8 = vadd.f32 %v1540_v53, %v5023_v11 }
 0x1d7   : > { %v1616_v41 = vsub.f32 %v1439_v49, %v1615_v30  ;;  %v1619_v42 = vsub.f32 %v1466_v54, %v1615_v30 }
 0x1d9   : > { %v1617_v20 = vmul.f32 1.442695, %v1616_v41  ;;  %v1620_v33 = vmul.f32 1.442695, %v1619_v42 }
 0x1ed   : > { %v1377_v0 = vpop.xlane.xlu0 %1376 }
 0x1ee   : > { %v1382_v13 = vadd.f32 %v1381_v24, %v1377_v0  ;;  %v1383_v34 = vsel %vm1335_vm2, %v1377_v0, 0.0  ;;  %v3725_v24 = vld [vmem:[%s5662_s19 + $0x4] ss:$8 sps:$4 sm:$0xff]  }
 0x1ef   : > { %2149 = vmatprep.subr.bf16.mxu1 %v3725_v24 }
 0x1f1   : > { %v1389_v7 = vpop.xlane.xlu0 %1388 }
 0x1f2   : > { %v1394_v14 = vadd.f32 %v1393_v43, %v1389_v7  ;;  %v1384_v43 = vadd.f32 %v1383_v34, %v4906_v18  ;;  %v1395_v4 = vsel %vm1349_vm4, %v1389_v7, 0.0  ;;  %v3727_v18 = vld [vmem:[%s5662_s19] ss:$8 sps:$4 sm:$0xff]  }
 0x1f3   : > { %2150 = vmatpush1.bf16.msra.mxu1 %v3727_v18 }
 0x1f4   : > { %v1601_v26 = vmax.f32 %v1382_v13, %v1394_v14 }
 0x1f6   : > { %v1602_v35 = vsub.f32 %v1382_v13, %v1601_v26  ;;  %v1605_v37 = vsub.f32 %v1394_v14, %v1601_v26 }
 0x1f7   : > { %v5103_v10 = vpop.f32.mrf.mxu0 }
 0x1f8   : > { %v1603_v47 = vmul.f32 1.442695, %v1602_v35  ;;  %v1606_v46 = vmul.f32 1.442695, %v1605_v37 }
 0x1f9   : > { %v5111_v21 = vpop.f32.mrf.mxu0 }
 0x1fa   : > { %3824 = vpow2.f32 %v1603_v47 }
 0x1fb   : > { %v5114_v59 = vpop.f32.mrf.mxu0  ;;  %3826 = vpow2.f32 %v1606_v46 }
 0x1fc   : > { %3828 = vpow2.f32 %v1617_v20 }
 0x1fd   : > { %v5123_v28 = vpop.f32.mrf.mxu0  ;;  %3830 = vpow2.f32 %v1620_v33 }
 0x1ff   : > { %v5125_v31 = vpop.f32.mrf.mxu0 }
 0x201   : > { %v5133_v39 = vpop.f32.mrf.mxu0 }
 0x203   : > { %v5135_v45 = vpop.f32.mrf.mxu0 }
 0x205   : > { %v5143_v15 = vpop.f32.mrf.mxu0 }
 0x207   : > { %v5152_v57 = vpop.f32.mrf.mxu0  ;;  %v3825_v27 = vpop.eup %3824 }
 0x208   : > { %v1348_v0 = vpop.xlane.xlu1 %1347  ;;  %v1334_v56 = vpop.xlane.xlu0 %1333 }
 0x209   : > { %v1354_v5 = vadd.f32 %v5082_v62, %v1348_v0  ;;  %v1341_v60 = vadd.f32 %v5080_v58, %v1334_v56  ;;  %v1342_v9 = vsel %vm1335_vm2, %v1334_v56, 0.0  ;;  %v5172_v3 = vpop.f32.mrf.mxu0  ;;  %v1396_v58 = vadd.f32 %v1395_v4, %v1384_v43  ;;  %v3827_v11 = vpop.eup %3826  ;;  %v3728_v4 = vld [vmem:[%s5663_s14 + $0xe0] ss:$16 sps:$4 sm:$0xff]  }
 0x20a   : > { %v1343_v7 = vadd.f32 %v1342_v9, %v4864_v55  ;;  %v1355_v12 = vsel %vm1349_vm4, %v1348_v0, 0.0  ;;  %v1539_v55 = vadd.f32 %v1538_v51, %v5086_v29  ;;  %v3829_v20 = vpop.eup %3828  ;;  %v1608_v16 = vadd.f32 %v3827_v11, %v3825_v27  ;;  %v3733_v9 = vld [vmem:[%s5663_s14 + $0xec] ss:$16 sps:$4 sm:$0xff]  }
 0x20b   : > { %v1587_v62 = vmax.f32 %v1341_v60, %v1354_v5  ;;  %v5183_v37 = vpop.f32.mrf.mxu0  ;;  %v3831_v33 = vpop.eup %3830  ;;  %2697 = vmatprep.subr.bf16.mxu1 %v3733_v9 }
 0x20c   : > { %v1581_v13 = vpop.xlane.xlu1 %1580  ;;  %v1577_v14 = vpop.xlane.xlu0 %1576  ;;  %v1356_v19 = vadd.f32 %v1355_v12, %v1343_v7  ;;  %v1622_v24 = vadd.f32 %v3831_v33, %v3829_v20 }
 0x20d   : > { %v1588_v49 = vsub.f32 %v1341_v60, %v1587_v62  ;;  %v1591_v54 = vsub.f32 %v1354_v5, %v1587_v62  ;;  %v1582_v63 = vadd.f32 %v1581_v13, %v1577_v14  ;;  %v1583_v26 = vsel %vm1349_vm4, %v1577_v14, 0.0  ;;  %v5185_v34 = vpop.f32.mrf.mxu0  ;;  %v3730_v5 = vld [vmem:[%s5663_s14 + $0xe4] ss:$16 sps:$4 sm:$0xff]  }
 0x20e   : > { %v1397_v30 = vadd.f32 %v1396_v58, %v1356_v19  ;;  %v1584_v42 = vadd.f32 %v1583_v26, %v1541_v8  ;;  %2654 = vmatprep.subr.bf16.mxu0 %v3730_v5 }
 0x20f   : > { %v1589_v32 = vmul.f32 1.442695, %v1588_v49  ;;  %v1592_v35 = vmul.f32 1.442695, %v1591_v54  ;;  %v1629_v36 = vmax.f32 %v1539_v55, %v1582_v63  ;;  %v5189_v61 = vpop.f32.mrf.mxu0  ;;  %2655 = vmatpush1.bf16.msra.mxu0 %v3728_v4 }
 0x210   : > { %v1469_v41 = vadd.f32 %v1468_v23, %v1397_v30 }
 0x211   : > { %3832 = vpow2.f32 %v1589_v32  ;;  %v1630_v52 = vsub.f32 %v1539_v55, %v1629_v36  ;;  %v1633_v47 = vsub.f32 %v1582_v63, %v1629_v36  ;;  %v5191_v43 = vpop.f32.mrf.mxu0 }
 0x212   : > { %3834 = vpow2.f32 %v1592_v35  ;;  %v1585_v29 = vadd.f32 %v1584_v42, %v1469_v41 }
 0x213   : > { %v1631_v46 = vmul.f32 1.442695, %v1630_v52  ;;  %v1634_v51 = vmul.f32 1.442695, %v1633_v47  ;;  %v5199_v6 = vpop.f32.mrf.mxu0 }
 0x214   : > { %1586 = vst [vmem:[%s893_s23] sm:$0x1] %v1585_v29 }
 0x215   : > { %3836 = vpow2.f32 %v1631_v46  ;;  %v5204_v7 = vpop.f32.mrf.mxu0 }
 0x216   : > { %3838 = vpow2.f32 %v1634_v51 }
 0x217   : > { %3840 = vrcp.f32 %v1608_v16  ;;  %v5206_v53 = vpop.f32.mrf.mxu0 }
 0x218   : > { %3842 = vrcp.f32 %v1622_v24 }
 0x219   : > { %v5208_v19 = vpop.f32.mrf.mxu0 }
 0x21b   : > { %v5210_v8 = vpop.f32.mrf.mxu0 }
 0x21d   : > { %v5212_v42 = vpop.f32.mrf.mxu0 }
 0x21e   : > { %v3833_v0 = vpop.eup %3832 }
 0x21f   : > { %v3835_v56 = vpop.eup %3834 }
 0x220   : > { %v1594_v60 = vadd.f32 %v3835_v56, %v3833_v0 }
 0x222   : > { %3844 = vrcp.f32 %v1594_v60  ;;  %v3837_v18 = vpop.eup %3836 }
 0x223   : > { %v3839_v48 = vpop.eup %3838 }
 0x224   : > { %v1636_v62 = vadd.f32 %v3839_v48, %v3837_v18  ;;  %v3841_v58 = vpop.eup %3840 }
 0x225   : > { %v3843_v12 = vpop.eup %3842  ;;  %v1610_v13 = vmul.f32 %v3841_v58, %v3825_v27  ;;  %v1611_v14 = vmul.f32 %v3841_v58, %v3827_v11  ;;  %v3491_v11 = vpop.f32.mrf.mxu0 }
 0x226   : > { %3846 = vrcp.f32 %v1636_v62  ;;  %v1624_v49 = vmul.f32 %v3843_v12, %v3829_v20  ;;  %v1625_v54 = vmul.f32 %v3843_v12, %v3831_v33 }
 0x227   : > { %v1612_v23 = vsub.f32 %v1611_v14, %v1610_v13  ;;  %v5214_v16 = vpop.f32.mrf.mxu0 }
 0x228   : > { %v1626_v30 = vsub.f32 %v1625_v54, %v1624_v49 }
 0x229   : > { %v1613_v36 = vand.u32 2147483647, %v1612_v23  ;;  %v3492_v62 = vpop.f32.mrf.mxu0 }
 0x22a   : > { %v1627_v29 = vand.u32 2147483647, %v1626_v30 }
 0x22f   : > { %v3845_v63 = vpop.eup %3844 }
 0x230   : > { %v1596_v55 = vmul.f32 %v3845_v63, %v3833_v0  ;;  %v1597_v26 = vmul.f32 %v3845_v63, %v3835_v56 }
 0x232   : > { %v1598_v32 = vsub.f32 %v1597_v26, %v1596_v55 }
 0x233   : > { %v3847_v35 = vpop.eup %3846 }
 0x234   : > { %v1599_v41 = vand.u32 2147483647, %v1598_v32  ;;  %v1638_v52 = vmul.f32 %v3847_v35, %v3837_v18  ;;  %v1639_v47 = vmul.f32 %v3847_v35, %v3839_v48  ;;  %v1880_v48 = vpop.f32.mrf.mxu0 }
 0x236   : > { %v1643_v27 = vmax.f32 %v1599_v41, %v1613_v36  ;;  %v1640_v46 = vsub.f32 %v1639_v47, %v1638_v52  ;;  %v3495_v58 = vpop.f32.mrf.mxu0  ;;  %v1926_v52 = vmax.f32 %v5103_v10, %v5152_v57 }
 0x238   : > { %v1644_v51 = vmax.f32 %v1643_v27, %v1627_v29  ;;  %v1641_v20 = vand.u32 2147483647, %v1640_v46  ;;  %v1893_v12 = vpop.f32.mrf.mxu0 }
 0x239   : > { %v1932_v47 = vmax.f32 %v5208_v19, %v1893_v12 }
 0x23a   : > { %v1645_v33 = vmax.f32 %v1644_v51, %v1641_v20  ;;  %v3496_v54 = vpop.f32.mrf.mxu0  ;;  %v1924_v51 = vmax.f32 %v5111_v21, %v5172_v3  ;;  %v1931_v21 = vmax.f32 %v5135_v45, %v5199_v6  ;;  %v1929_v45 = vmax.f32 %v5143_v15, %v5204_v7 }
 0x23c   : > { %v1646_v24 = vsub.f32 %v1599_v41, %v1645_v33  ;;  %v1649_v0 = vsub.f32 %v1613_v36, %v1645_v33  ;;  %v1652_v56 = vsub.f32 %v1627_v29, %v1645_v33  ;;  %v1655_v4 = vsub.f32 %v1641_v20, %v1645_v33  ;;  %v1896_v30 = vpop.f32.mrf.mxu0 }
 0x23d   : > { %v1934_v41 = vmax.f32 %v5206_v53, %v3495_v58  ;;  %v1935_v29 = vmax.f32 %v5210_v8, %v3496_v54  ;;  %v1933_v27 = vmax.f32 %v5212_v42, %v1896_v30  ;;  %v1927_v20 = vmax.f32 %v5114_v59, %v5183_v37 }
 0x23e   : > { %v1647_v5 = vmul.f32 1.442695, %v1646_v24  ;;  %v1650_v60 = vmul.f32 1.442695, %v1649_v0  ;;  %v1653_v9 = vmul.f32 1.442695, %v1652_v56  ;;  %v3499_v32 = vpop.f32.mrf.mxu0  ;;  %v1925_v53 = vmax.f32 %v5123_v28, %v5185_v34 }
 0x23f   : > { %v1656_v18 = vmul.f32 1.442695, %v1655_v4  ;;  %v1938_v33 = vmax.f32 %v3491_v11, %v3499_v32  ;;  %v1930_v8 = vmax.f32 %v5125_v31, %v5189_v61  ;;  %v1942_v3 = vmax.f32 %v1926_v52, %v1934_v41  ;;  %v3257_v56 = vld [vmem:[#allocation20] ss:$0 sm:$0xff] }
 0x240   : > { %3848 = vpow2.f32 %v1647_v5  ;;  %v1909_v35 = vpop.f32.mrf.mxu0  ;;  %v1940_v42 = vmax.f32 %v1924_v51, %v1932_v47  ;;  %v1943_v11 = vmax.f32 %v1927_v20, %v1935_v29  ;;  %v1941_v28 = vmax.f32 %v1925_v53, %v1933_v27 }
 0x241   : > { %3850 = vpow2.f32 %v1650_v60  ;;  %v1936_v59 = vmax.f32 %v5214_v16, %v1909_v35  ;;  %v1928_v34 = vmax.f32 %v5133_v39, %v5191_v43  ;;  %v1946_v4 = vmax.f32 %v1930_v8, %v1938_v33 }
 0x242   : > { %3852 = vpow2.f32 %v1653_v9  ;;  %v3500_v36 = vpop.f32.mrf.mxu0 }
 0x243   : > { %3854 = vpow2.f32 %v1656_v18  ;;  %v1939_v24 = vmax.f32 %v3492_v62, %v3500_v36  ;;  %v1944_v16 = vmax.f32 %v1928_v34, %v1936_v59 }
 0x244   : > { %v1912_v10 = vpop.f32.mrf.mxu0 }
 0x245   : > { %v1947_v5 = vmax.f32 %v1931_v21, %v1939_v24  ;;  %v1937_v60 = vmax.f32 %v1880_v48, %v1912_v10  ;;  %v3890_v21 = vld [vmem:[#allocation3 + $0x30] sm:$0xff] }
 0x247   : > { %v1945_v39 = vmax.f32 %v1929_v45, %v1937_v60 }
 0x24d   : > { %v3849_v13 = vpop.eup %3848 }
 0x24e   : > { %v5216_v14 = vpop.eup %3850 }
 0x24f   : > { %v1658_v49 = vadd.f32 %v5216_v14, %v3849_v13  ;;  %v3853_v63 = vpop.eup %3852 }
 0x250   : > { %v3855_v55 = vpop.eup %3854 }
 0x251   : > { %v1659_v23 = vadd.f32 %v3853_v63, %v1658_v49 }
 0x253   : > { %v1660_v26 = vadd.f32 %v3855_v55, %v1659_v23 }
 0x255   : > { %3856 = vrcp.f32 %v1660_v26 }
 0x262   : > { %v3857_v46 = vpop.eup %3856 }
 0x263   : > { %v1662_v0 = vmul.f32 %v3857_v46, %v3849_v13  ;;  %v5231_v57 = vmul.f32 %v3857_v46, %v3853_v63  ;;  %v5233_v19 = vmul.f32 %v3857_v46, %v3855_v55  ;;  %v1663_v52 = vmul.f32 %v3857_v46, %v5216_v14 }
 0x265   : > { %v1951_v37 = vrot.slane %v1662_v0, %v4880_v1  ;;  %v2017_v29 = vrot.slane %v1663_v52, %v4880_v1 }
 0x267   : > { %v1954_v9 = vmul.f32 %v1951_v37, %v1942_v3  ;;  %v1952_v31 = vmul.f32 %v1951_v37, %v1940_v42  ;;  %v1955_v61 = vmul.f32 %v1951_v37, %v1943_v11  ;;  %v1953_v62 = vmul.f32 %v1951_v37, %v1941_v28 }
 0x268   : > { %v1958_v6 = vmul.f32 %v1951_v37, %v1946_v4  ;;  %v1959_v18 = vmul.f32 %v1951_v37, %v1947_v5  ;;  %v1956_v23 = vmul.f32 %v1951_v37, %v1944_v16  ;;  %v1957_v30 = vmul.f32 %v1951_v37, %v1945_v39  ;;  %v3891_v37 = vld [vmem:[#allocation3] sm:$0xff] }
 0x269   : > { %v1968_v58 = vadd.f32 %v3257_v56, %v1954_v9  ;;  %v1966_v12 = vadd.f32 %v3257_v56, %v1952_v31  ;;  %v1969_v13 = vadd.f32 %v3257_v56, %v1955_v61  ;;  %v1967_v49 = vadd.f32 %v3257_v56, %v1953_v62 }
 0x26a   : > { %v1972_v54 = vadd.f32 %v3257_v56, %v1958_v6  ;;  %v1973_v48 = vadd.f32 %v3257_v56, %v1959_v18  ;;  %v1970_v15 = vadd.f32 %v3257_v56, %v1956_v23  ;;  %v1971_v35 = vadd.f32 %v3257_v56, %v1957_v30  ;;  %v3731_v18 = vld [vmem:[%s5663_s14 + $0xe8] ss:$16 sps:$4 sm:$0xff]  }
 0x26b   : > { %v1984_v43 = vmul.f32 0.70710677, %v1968_v58  ;;  %v1982_v63 = vmul.f32 0.70710677, %v1966_v12  ;;  %v1985_v55 = vmul.f32 0.70710677, %v1969_v13  ;;  %v2018_v3 = vmul.f32 %v3890_v21, %v2017_v29 }
 0x26c   : > { %v1983_v26 = vmul.f32 0.70710677, %v1967_v49  ;;  %v1988_v32 = vmul.f32 0.70710677, %v1972_v54  ;;  %v1989_v7 = vmul.f32 0.70710677, %v1973_v48  ;;  %v2019_v42 = vmul.f32 %v3891_v37, %v2017_v29 }
 0x26d   : > { %3858 = verf.f32 %v1984_v43  ;;  %v1986_v36 = vmul.f32 0.70710677, %v1970_v15  ;;  %v1987_v41 = vmul.f32 0.70710677, %v1971_v35  ;;  %v1974_v20 = vmul.f32 0.5, %v1966_v12  ;;  %v3892_v23 = vld [vmem:[#allocation3 + $0x18] sm:$0xff] }
 0x26e   : > { %3860 = verf.f32 %v1982_v63  ;;  %v1975_v0 = vmul.f32 0.5, %v1967_v49  ;;  %v1980_v59 = vmul.f32 0.5, %v1972_v54  ;;  %v1981_v4 = vmul.f32 0.5, %v1973_v48  ;;  %v3748_v21 = vld [vmem:[%s5663_s14 + $0x84] ss:$16 sps:$4 sm:$0xff]  }
 0x26f   : > { %3862 = verf.f32 %v1985_v55  ;;  %v2024_v9 = vmul.f32 %v2017_v29, %v5021_v50  ;;  %v1976_v31 = vmul.f32 0.5, %v1968_v58  ;;  %v1977_v61 = vmul.f32 0.5, %v1969_v13  ;;  %v3893_v58 = vld [vmem:[#allocation3 + $0x10] sm:$0xff] }
 0x270   : > { %3864 = verf.f32 %v1983_v26  ;;  %v2025_v6 = vmul.f32 %v2017_v29, %v5026_v17  ;;  %v2020_v50 = vmul.f32 %v3892_v23, %v2017_v29  ;;  %v2021_v13 = vmul.f32 %v3893_v58, %v2017_v29  ;;  %v3752_v37 = vld [vmem:[%s5663_s14 + $0x60] ss:$16 sps:$4 sm:$0xff]   ;;  %v3793_v23 = vld [vmem:[%s5663_s14 + $0x1ac] ss:$16 sps:$4 sm:$0xff]   ;;  %v3791_v58 = vld [vmem:[%s5663_s14 + $0x1a8] ss:$16 sps:$4 sm:$0xff]  }
 0x271   : > { %3866 = verf.f32 %v1988_v32  ;;  %v1978_v32 = vmul.f32 0.5, %v1970_v15  ;;  %v3734_v15 = vld [vmem:[%s5663_s14 + $0xc0] ss:$16 sps:$4 sm:$0xff]  }
 0x272   : > { %3868 = verf.f32 %v1989_v7  ;;  %v1979_v7 = vmul.f32 0.5, %v1971_v35  ;;  %v3736_v35 = vld [vmem:[%s5663_s14 + $0xc4] ss:$16 sps:$4 sm:$0xff]  }
 0x273   : > { %3870 = verf.f32 %v1986_v36  ;;  %2656 = vmatprep.subr.bf16.mxu0 %v3736_v35  ;;  %v3818_v35 = vld [vmem:[%s5663_s14 + $0x100] ss:$16 sps:$4 sm:$0xff]  }
 0x274   : > { %3872 = verf.f32 %v1987_v41  ;;  %2657 = vmatpush1.bf16.msra.mxu0 %v3734_v15  ;;  %v3823_v15 = vld [vmem:[%s5663_s14 + $0x10c] ss:$16 sps:$4 sm:$0xff]  }
 0x27a   : > { %v3859_v47 = vpop.eup %3858 }
 0x27b   : > { %v3861_v27 = vpop.eup %3860  ;;  %v2000_v34 = vadd.f32 1.0, %v3859_v47  ;;  %v3894_v47 = vld [vmem:[#allocation3 + $0x8] sm:$0xff] }
 0x27c   : > { %v3863_v51 = vpop.eup %3862  ;;  %v1998_v33 = vadd.f32 1.0, %v3861_v27  ;;  %v2022_v27 = vmul.f32 %v3894_v47, %v2017_v29  ;;  %v3809_v47 = vld [vmem:[%s5663_s14 + $0x148] ss:$16 sps:$4 sm:$0xff]  }
 0x27d   : > { %v3865_v24 = vpop.eup %3864  ;;  %v2001_v56 = vadd.f32 1.0, %v3863_v51  ;;  %v2008_v54 = vmul.f32 %v2000_v34, %v1976_v31  ;;  %v2023_v51 = vmul.f32 %v2017_v29, %v5017_v40  ;;  %v3737_v40 = vld [vmem:[%s5663_s14 + $0xc8] ss:$16 sps:$4 sm:$0xff]   ;;  %v3739_v29 = vld [vmem:[%s5663_s14 + $0xcc] ss:$16 sps:$4 sm:$0xff]  }
 0x27e   : > { %v3867_v53 = vpop.eup %3866  ;;  %v1999_v10 = vadd.f32 1.0, %v3865_v24  ;;  %v2006_v8 = vmul.f32 %v1998_v33, %v1974_v20  ;;  %v3761_v34 = vld [vmem:[%s5663_s14 + $0x48] ss:$16 sps:$4 sm:$0xff]   ;;  %v3772_v31 = vld [vmem:[%s5663_s14 + $0x4] ss:$16 sps:$4 sm:$0xff]  }
 0x27f   : > { %v2004_v14 = vadd.f32 1.0, %v3867_v53  ;;  %v3869_v46 = vpop.eup %3868  ;;  %v2009_v39 = vmul.f32 %v2001_v56, %v1977_v61  ;;  %v2028_v17 = vadd.f32 %v2020_v50, %v2008_v54  ;;  %v3742_v53 = vld [vmem:[%s5663_s14 + $0xa4] ss:$16 sps:$4 sm:$0xff]   ;;  %v3763_v56 = vld [vmem:[%s5663_s14 + $0x4c] ss:$16 sps:$4 sm:$0xff]  }
 0x280   : > { %v2007_v11 = vmul.f32 %v1999_v10, %v1975_v0  ;;  %v2026_v28 = vadd.f32 %v2018_v3, %v2006_v8  ;;  %v2005_v5 = vadd.f32 1.0, %v3869_v46  ;;  %v3871_v12 = vpop.eup %3870  ;;  %2658 = vmatprep.subr.bf16.mxu0 %v3742_v53  ;;  %v3743_v0 = vld [vmem:[%s5663_s14 + $0xa8] ss:$16 sps:$4 sm:$0xff]   ;;  %v3745_v10 = vld [vmem:[%s5663_s14 + $0xac] ss:$16 sps:$4 sm:$0xff]  }
 0x281   : > { %v2012_v60 = vmul.f32 %v2004_v14, %v1980_v59  ;;  %v3873_v43 = vpop.eup %3872  ;;  %v2029_v55 = vadd.f32 %v2021_v13, %v2009_v39  ;;  %v2002_v26 = vadd.f32 1.0, %v3871_v12  ;;  %v3746_v8 = vld [vmem:[%s5663_s14 + $0x80] ss:$16 sps:$4 sm:$0xff]   ;;  %v3749_v3 = vld [vmem:[%s5663_s14 + $0x88] ss:$16 sps:$4 sm:$0xff]  }
 0x282   : > { %v2027_v62 = vadd.f32 %v2019_v42, %v2007_v11  ;;  %v2013_v45 = vmul.f32 %v2005_v5, %v1981_v4  ;;  %v2003_v30 = vadd.f32 1.0, %v3873_v43  ;;  %v3751_v59 = vld [vmem:[%s5663_s14 + $0x8c] ss:$16 sps:$4 sm:$0xff]   ;;  %v3754_v42 = vld [vmem:[%s5663_s14 + $0x64] ss:$16 sps:$4 sm:$0xff]  }
 0x283   : > { %v2032_v16 = vadd.f32 %v2024_v9, %v2012_v60  ;;  %v2052_v36 = vpack.c.bf16 %v2029_v55, %v2028_v17  ;;  %v2010_v41 = vmul.f32 %v2002_v26, %v1978_v32  ;;  %v3755_v14 = vld [vmem:[%s5663_s14 + $0x68] ss:$16 sps:$4 sm:$0xff]   ;;  %v3757_v46 = vld [vmem:[%s5663_s14 + $0x6c] ss:$16 sps:$4 sm:$0xff]   ;;  %v3758_v11 = vld [vmem:[%s5663_s14 + $0x40] ss:$16 sps:$4 sm:$0xff]  }
 0x284   : > { %v2051_v49 = vpack.c.bf16 %v2027_v62, %v2026_v28  ;;  %v2033_v63 = vadd.f32 %v2025_v6, %v2013_v45  ;;  %v2011_v52 = vmul.f32 %v2003_v30, %v1979_v7  ;;  %v3760_v28 = vld [vmem:[%s5663_s14 + $0x44] ss:$16 sps:$4 sm:$0xff]   ;;  %v3764_v4 = vld [vmem:[%s5663_s14 + $0x20] ss:$16 sps:$4 sm:$0xff]   ;;  %v3767_v60 = vld [vmem:[%s5663_s14 + $0x28] ss:$16 sps:$4 sm:$0xff]  }
 0x285   : > { %v2030_v20 = vadd.f32 %v2022_v27, %v2010_v41  ;;  %v3766_v5 = vld [vmem:[%s5663_s14 + $0x24] ss:$16 sps:$4 sm:$0xff]   ;;  %v3769_v9 = vld [vmem:[%s5663_s14 + $0x2c] ss:$16 sps:$4 sm:$0xff]   ;;  %v3770_v62 = vld [vmem:[%s5663_s14] ss:$16 sps:$4 sm:$0xff]  }
 0x286   : > { %2168 = vmatmul.mubr.bf16.vlgmr.msra.gmra.mxu1 %v2051_v49  ;;  %v2054_v48 = vpack.c.bf16 %v2033_v63, %v2032_v16  ;;  %v2031_v33 = vadd.f32 %v2023_v51, %v2011_v52  ;;  %v3775_v61 = vld [vmem:[%s5663_s14 + $0xc] ss:$16 sps:$4 sm:$0xff]   ;;  %v3773_v45 = vld [vmem:[%s5663_s14 + $0x8] ss:$16 sps:$4 sm:$0xff]   ;;  %v3778_v6 = vld [vmem:[%s5663_s14 + $0x1e4] ss:$16 sps:$4 sm:$0xff]  }
 0x287   : > { %2177 = vmatprep.mubr.bf16.mxu1 %v4358_v25  ;;  %2698 = vmatpush1.bf16.msra.mxu1 %v3731_v18  ;;  %v3781_v16 = vld [vmem:[%s5663_s14 + $0x1ec] ss:$16 sps:$4 sm:$0xff]   ;;  %v3776_v18 = vld [vmem:[%s5663_s14 + $0x1e0] ss:$16 sps:$4 sm:$0xff]   ;;  %v3779_v12 = vld [vmem:[%s5663_s14 + $0x1e8] ss:$16 sps:$4 sm:$0xff]  }
 0x288   : > { %v2053_v24 = vpack.c.bf16 %v2031_v33, %v2030_v20  ;;  %2699 = vmatprep.subr.bf16.mxu1 %v3739_v29  ;;  %v3784_v49 = vld [vmem:[%s5663_s14 + $0x1c4] ss:$16 sps:$4 sm:$0xff]   ;;  %v3787_v54 = vld [vmem:[%s5663_s14 + $0x1cc] ss:$16 sps:$4 sm:$0xff]   ;;  %v3782_v39 = vld [vmem:[%s5663_s14 + $0x1c0] ss:$16 sps:$4 sm:$0xff]  }
 0x289   : > { %v3785_v43 = vld [vmem:[%s5663_s14 + $0x1c8] ss:$16 sps:$4 sm:$0xff]   ;;  %v3790_v63 = vld [vmem:[%s5663_s14 + $0x1a4] ss:$16 sps:$4 sm:$0xff]   ;;  %v3788_v50 = vld [vmem:[%s5663_s14 + $0x1a0] ss:$16 sps:$4 sm:$0xff]  }
 0x28a   : > { %v3796_v13 = vld [vmem:[%s5663_s14 + $0x184] ss:$16 sps:$4 sm:$0xff]   ;;  %v3794_v17 = vld [vmem:[%s5663_s14 + $0x180] ss:$16 sps:$4 sm:$0xff]   ;;  %v3797_v55 = vld [vmem:[%s5663_s14 + $0x188] ss:$16 sps:$4 sm:$0xff]  }
 0x28b   : > { %2700 = vmatpush1.bf16.msra.mxu1 %v3737_v40  ;;  %v3802_v26 = vld [vmem:[%s5663_s14 + $0x164] ss:$16 sps:$4 sm:$0xff]   ;;  %v3805_v30 = vld [vmem:[%s5663_s14 + $0x16c] ss:$16 sps:$4 sm:$0xff]   ;;  %v3800_v32 = vld [vmem:[%s5663_s14 + $0x160] ss:$16 sps:$4 sm:$0xff]  }
 0x28c   : > { %2701 = vmatprep.subr.bf16.mxu1 %v3745_v10  ;;  %v3803_v7 = vld [vmem:[%s5663_s14 + $0x168] ss:$16 sps:$4 sm:$0xff]   ;;  %v3811_v41 = vld [vmem:[%s5663_s14 + $0x14c] ss:$16 sps:$4 sm:$0xff]   ;;  %v3806_v52 = vld [vmem:[%s5663_s14 + $0x140] ss:$16 sps:$4 sm:$0xff]  }
 0x28d   : > { %v3814_v27 = vld [vmem:[%s5663_s14 + $0x124] ss:$16 sps:$4 sm:$0xff]   ;;  %v3817_v51 = vld [vmem:[%s5663_s14 + $0x12c] ss:$16 sps:$4 sm:$0xff]   ;;  %v3812_v20 = vld [vmem:[%s5663_s14 + $0x120] ss:$16 sps:$4 sm:$0xff]  }
 0x28e   : > { %2178 = vmatmul.mubr.bf16.gmra.mxu1 %v2052_v36  ;;  %v3808_v36 = vld [vmem:[%s5663_s14 + $0x144] ss:$16 sps:$4 sm:$0xff]   ;;  %v3815_v33 = vld [vmem:[%s5663_s14 + $0x128] ss:$16 sps:$4 sm:$0xff]  }
 0x28f   : > { %2187 = vmatprep.mubr.bf16.mxu1 %v4358_v25  ;;  %2702 = vmatpush1.bf16.msra.mxu1 %v3743_v0  ;;  %v3821_v40 = vld [vmem:[%s5663_s14 + $0x108] ss:$16 sps:$4 sm:$0xff]  }
 0x290   : > { %2703 = vmatprep.subr.bf16.mxu1 %v3751_v59 }
 0x293   : > { %2704 = vmatpush1.bf16.msra.mxu1 %v3749_v3 }
 0x294   : > { %2705 = vmatprep.subr.bf16.mxu1 %v3757_v46  ;;  %v2050_v46 = vld [vmem:[%s5664_s28] sm:$0x3] }
 0x296   : > { %2188 = vmatmul.mubr.bf16.gmra.mxu1 %v2053_v24  ;;  %v3820_v24 = vld [vmem:[%s5663_s14 + $0x104] ss:$16 sps:$4 sm:$0xff]  }
 0x297   : > { %2197 = vmatprep.mubr.bf16.mxu1 %v4358_v25  ;;  %v3740_v25 = vld [vmem:[%s5663_s14 + $0xa0] ss:$16 sps:$4 sm:$0xff]   ;;  %2706 = vmatpush1.bf16.msra.mxu1 %v3755_v14 }
 0x298   : > { %2659 = vmatpush1.bf16.msra.mxu0 %v3740_v25  ;;  %2707 = vmatprep.subr.bf16.mxu1 %v3763_v56  ;;  %v2224_v56 = vrot.slane %v2050_v46, %v4880_v1 }
 0x299   : > { %2660 = vmatprep.subr.bf16.mxu0 %v3748_v21 }
 0x29b   : > { %2708 = vmatpush1.bf16.msra.mxu1 %v3761_v34 }
 0x29c   : > { %2661 = vmatpush1.bf16.msra.mxu0 %v3746_v8  ;;  %2709 = vmatprep.subr.bf16.mxu1 %v3769_v9 }
 0x29d   : > { %2662 = vmatprep.subr.bf16.mxu0 %v3754_v42 }
 0x29e   : > { %2198 = vmatmul.mubr.bf16.gmra.mxu1 %v2054_v48  ;;  %v3799_v48 = vld [vmem:[%s5663_s14 + $0x18c] ss:$16 sps:$4 sm:$0xff]  }
 0x29f   : > { %2710 = vmatpush1.bf16.msra.mxu1 %v3767_v60 }
 0x2a0   : > { %2663 = vmatpush1.bf16.msra.mxu0 %v3752_v37  ;;  %2711 = vmatprep.subr.bf16.mxu1 %v3775_v61 }
 0x2a1   : > { %2664 = vmatprep.subr.bf16.mxu0 %v3760_v28 }
 0x2a3   : > { %2712 = vmatpush1.bf16.msra.mxu1 %v3773_v45 }
 0x2a4   : > { %2665 = vmatpush1.bf16.msra.mxu0 %v3758_v11  ;;  %2713 = vmatprep.subr.bf16.mxu1 %v3781_v16 }
 0x2a5   : > { %2666 = vmatprep.subr.bf16.mxu0 %v3766_v5 }
 0x2a7   : > { %2714 = vmatpush2.bf16.msra.mxu1 %v3779_v12 }
 0x2a8   : > { %2667 = vmatpush1.bf16.msra.mxu0 %v3764_v4  ;;  %2715 = vmatprep.subr.bf16.mxu1 %v3787_v54 }
 0x2a9   : > { %2668 = vmatprep.subr.bf16.mxu0 %v3772_v31  ;;  %v2228_v31 = vrot.slane %v2050_v46, %v4883_v2 }
 0x2ab   : > { %2716 = vmatpush2.bf16.msra.mxu1 %v3785_v43 }
 0x2ac   : > { %2669 = vmatpush1.bf16.msra.mxu0 %v3770_v62  ;;  %2717 = vmatprep.subr.bf16.mxu1 %v3793_v23 }
 0x2ad   : > { %2670 = vmatprep.subr.bf16.mxu0 %v3778_v6 }
 0x2af   : > { %2718 = vmatpush2.bf16.msra.mxu1 %v3791_v58 }
 0x2b0   : > { %2671 = vmatpush2.bf16.msra.mxu0 %v3776_v18  ;;  %2719 = vmatprep.subr.bf16.mxu1 %v3799_v48 }
 0x2b1   : > { %2672 = vmatprep.subr.bf16.mxu0 %v3784_v49 }
 0x2b3   : > { %2720 = vmatpush2.bf16.msra.mxu1 %v3797_v55 }
 0x2b4   : > { %2673 = vmatpush2.bf16.msra.mxu0 %v3782_v39  ;;  %2721 = vmatprep.subr.bf16.mxu1 %v3805_v30 }
 0x2b5   : > { %2674 = vmatprep.subr.bf16.mxu0 %v3790_v63 }
 0x2b7   : > { %2722 = vmatpush2.bf16.msra.mxu1 %v3803_v7  ;;  %v2258_v7 = vrot.slane %v5231_v57, %v4880_v1 }
 0x2b8   : > { %2675 = vmatpush2.bf16.msra.mxu0 %v3788_v50  ;;  %2723 = vmatprep.subr.bf16.mxu1 %v3811_v41 }
 0x2b9   : > { %2676 = vmatprep.subr.bf16.mxu0 %v3796_v13 }
 0x2bb   : > { %2724 = vmatpush2.bf16.msra.mxu1 %v3809_v47 }
 0x2bc   : > { %2677 = vmatpush2.bf16.msra.mxu0 %v3794_v17  ;;  %2725 = vmatprep.subr.bf16.mxu1 %v3817_v51 }
 0x2bd   : > { %2678 = vmatprep.subr.bf16.mxu0 %v3802_v26 }
 0x2bf   : > { %2726 = vmatpush2.bf16.msra.mxu1 %v3815_v33 }
 0x2c0   : > { %2679 = vmatpush2.bf16.msra.mxu0 %v3800_v32  ;;  %2727 = vmatprep.subr.bf16.mxu1 %v3823_v15 }
 0x2c1   : > { %2680 = vmatprep.subr.bf16.mxu0 %v3808_v36 }
 0x2c3   : > { %2728 = vmatpush2.bf16.msra.mxu1 %v3821_v40 }
 0x2c4   : > { %2681 = vmatpush2.bf16.msra.mxu0 %v3806_v52 }
 0x2c5   : > { %2682 = vmatprep.subr.bf16.mxu0 %v3814_v27 }
 0x2c8   : > { %2683 = vmatpush2.bf16.msra.mxu0 %v3812_v20 }
 0x2c9   : > { %2684 = vmatprep.subr.bf16.mxu0 %v3820_v24 }
 0x2cc   : > { %2685 = vmatpush2.bf16.msra.mxu0 %v3818_v35  ;;  %v3895_v35 = vld [vmem:[#allocation4 + $0x10] sm:$0xff] }
 0x2cd   : > { %v2261_v40 = vmul.f32 %v3895_v35, %v2258_v7 }
 0x346   : > { %v2169_v29 = vpop.f32.mrf.mxu1 }
 0x348   : > { %v2171_v25 = vpop.f32.mrf.mxu1 }
 0x34a   : > { %v2173_v53 = vpop.f32.mrf.mxu1 }
 0x34c   : > { %v2175_v0 = vpop.f32.mrf.mxu1 }
 0x34e   : > { %v2179_v10 = vpop.f32.mrf.mxu1 }
 0x34f   : > { %v2208_v28 = vmax.f32 %v2169_v29, %v2179_v10 }
 0x350   : > { %v2181_v8 = vpop.f32.mrf.mxu1 }
 0x351   : > { %v2209_v5 = vmax.f32 %v2171_v25, %v2181_v8  ;;  %v3896_v25 = vld [vmem:[#allocation4 + $0x18] sm:$0xff]  ;;  %v3898_v8 = vld [vmem:[#allocation4] sm:$0xff] }
 0x352   : > { %v2183_v21 = vpop.f32.mrf.mxu1 }
 0x353   : > { %v2210_v62 = vmax.f32 %v2173_v53, %v2183_v21  ;;  %v2260_v53 = vmul.f32 %v3896_v25, %v2258_v7  ;;  %v2259_v21 = vmul.f32 %v3898_v8, %v2258_v7  ;;  %v3900_v25 = vld [vmem:[#allocation5] sm:$0xff] }
 0x354   : > { %v2185_v3 = vpop.f32.mrf.mxu1 }
 0x355   : > { %v2211_v39 = vmax.f32 %v2175_v0, %v2185_v3  ;;  %v3897_v0 = vld [vmem:[#allocation4 + $0x8] sm:$0xff] }
 0x356   : > { %v2189_v59 = vpop.f32.mrf.mxu1  ;;  %v2262_v10 = vmul.f32 %v3897_v0, %v2258_v7 }
 0x358   : > { %v2191_v37 = vpop.f32.mrf.mxu1 }
 0x35a   : > { %v2193_v42 = vpop.f32.mrf.mxu1 }
 0x35c   : > { %v2195_v14 = vpop.f32.mrf.mxu1 }
 0x35e   : > { %v2199_v11 = vpop.f32.mrf.mxu1 }
 0x35f   : > { %v2212_v34 = vmax.f32 %v2189_v59, %v2199_v11 }
 0x360   : > { %v2201_v4 = vpop.f32.mrf.mxu1 }
 0x361   : > { %v2216_v60 = vmax.f32 %v2208_v28, %v2212_v34  ;;  %v2213_v9 = vmax.f32 %v2191_v37, %v2201_v4 }
 0x362   : > { %v2203_v61 = vpop.f32.mrf.mxu1 }
 0x363   : > { %v2231_v45 = vadd.f32 %v2224_v56, %v2216_v60  ;;  %v2217_v6 = vmax.f32 %v2209_v5, %v2213_v9  ;;  %v2214_v16 = vmax.f32 %v2193_v42, %v2203_v61 }
 0x364   : > { %v2205_v18 = vpop.f32.mrf.mxu1 }
 0x365   : > { %v2239_v12 = vmul.f32 0.70710677, %v2231_v45  ;;  %v2232_v49 = vadd.f32 %v2228_v31, %v2217_v6  ;;  %v2218_v54 = vmax.f32 %v2210_v62, %v2214_v16  ;;  %v2215_v43 = vmax.f32 %v2195_v14, %v2205_v18 }
 0x366   : > { %v2235_v27 = vmul.f32 0.5, %v2231_v45 }
 0x367   : > { %v2240_v63 = vmul.f32 0.70710677, %v2232_v49  ;;  %v2233_v23 = vadd.f32 %v2224_v56, %v2218_v54  ;;  %3874 = verf.f32 %v2239_v12  ;;  %v2219_v50 = vmax.f32 %v2211_v39, %v2215_v43  ;;  %v2331_v56 = vld [vmem:[%s5665_s20] sm:$0xf] }
 0x368   : > { %v2236_v52 = vmul.f32 0.5, %v2232_v49  ;;  %v2764_v61 = vrot.slane %v2331_v56, %v4958_v22 }
 0x369   : > { %3876 = verf.f32 %v2240_v63  ;;  %v2241_v58 = vmul.f32 0.70710677, %v2233_v23  ;;  %v2234_v13 = vadd.f32 %v2228_v31, %v2219_v50  ;;  %v2237_v36 = vmul.f32 0.5, %v2233_v23 }
 0x36a   : > { %v2756_v31 = vrot.slane %v2331_v56, %v4880_v1  ;;  %v2760_v63 = vrot.slane %v2331_v56, %v4883_v2  ;;  %v2768_v23 = vrot.slane %v2331_v56, %v4963_v38 }
 0x36b   : > { %3878 = verf.f32 %v2241_v58  ;;  %v2242_v48 = vmul.f32 0.70710677, %v2234_v13  ;;  %v2238_v20 = vmul.f32 0.5, %v2234_v13 }
 0x36d   : > { %3880 = verf.f32 %v2242_v48 }
 0x374   : > { %v3875_v17 = vpop.eup %3874 }
 0x375   : > { %v2247_v32 = vadd.f32 1.0, %v3875_v17 }
 0x376   : > { %v3877_v55 = vpop.eup %3876 }
 0x377   : > { %v2248_v30 = vadd.f32 1.0, %v3877_v55  ;;  %v2251_v15 = vmul.f32 %v2247_v32, %v2235_v27 }
 0x378   : > { %v3879_v26 = vpop.eup %3878 }
 0x379   : > { %v2249_v41 = vadd.f32 1.0, %v3879_v26  ;;  %v2252_v24 = vmul.f32 %v2248_v30, %v2236_v52  ;;  %v2263_v37 = vadd.f32 %v2259_v21, %v2251_v15  ;;  %v3899_v15 = vld [vmem:[#allocation5 + $0x8] sm:$0xff] }
 0x37a   : > { %v3881_v47 = vpop.eup %3880 }
 0x37b   : > { %v2253_v51 = vmul.f32 %v2249_v41, %v2237_v36  ;;  %v2250_v33 = vadd.f32 1.0, %v3881_v47  ;;  %v2264_v3 = vadd.f32 %v2260_v53, %v2252_v24  ;;  %v2800_v36 = vrot.slane %v5233_v19, %v4880_v1 }
 0x37d   : > { %v2254_v29 = vmul.f32 %v2250_v33, %v2238_v20  ;;  %v2265_v57 = vadd.f32 %v2261_v40, %v2253_v51  ;;  %v2801_v35 = vmul.f32 %v3899_v15, %v2800_v36  ;;  %v2803_v53 = vmul.f32 %v3900_v25, %v2800_v36 }
 0x37f   : > { %v2266_v59 = vadd.f32 %v2262_v10, %v2254_v29  ;;  %v2332_v14 = vpack.c.bf16 %v2265_v57, %v2263_v37 }
 0x381   : > { %v2333_v42 = vpack.c.bf16 %v2266_v59, %v2264_v3  ;;  %v3901_v59 = vld [vmem:[#allocation5 + $0x10] sm:$0xff] }
 0x382   : > { %v2802_v37 = vmul.f32 %v3901_v59, %v2800_v36 }
 0x383   : > { %2686 = vmatprep.mubr.bf16.mxu0 %v2333_v42  ;;  %2729 = vmatprep.mubr.bf16.mxu1 %v2333_v42 }
 0x384   : > { %2687 = vmatmul.mubr.bf16.vlgmr.msra.gmra.mxu0 %v2332_v14  ;;  %2730 = vmatmul.mubr.bf16.vlgmr.msra.gmra.mxu1 %v2332_v14 }
 0x444   : > { %v2688_v46 = vpop.f32.mrf.mxu0  ;;  %v2731_v11 = vpop.f32.mrf.mxu1 }
 0x446   : > { %v2690_v28 = vpop.f32.mrf.mxu0  ;;  %v2733_v34 = vpop.f32.mrf.mxu1 }
 0x448   : > { %v2692_v4 = vpop.f32.mrf.mxu0  ;;  %v2735_v5 = vpop.f32.mrf.mxu1 }
 0x449   : > { %v2740_v60 = vmax.f32 %v2688_v46, %v2692_v4  ;;  %v2742_v9 = vmax.f32 %v2731_v11, %v2735_v5  ;;  %v3902_v46 = vld [vmem:[#allocation5 + $0x18] sm:$0xff] }
 0x44a   : > { %v2694_v62 = vpop.f32.mrf.mxu0  ;;  %v2737_v45 = vpop.f32.mrf.mxu1  ;;  %v2804_v11 = vmul.f32 %v3902_v46, %v2800_v36  ;;  %v2837_v46 = vld [vmem:[#allocation21] sm:$0x1] }
 0x44b   : > { %v2744_v6 = vrot.slane %v2740_v60, 4  ;;  %v2746_v16 = vrot.slane %v2742_v9, 4  ;;  %v2741_v18 = vmax.f32 %v2690_v28, %v2694_v62  ;;  %v2743_v12 = vmax.f32 %v2733_v34, %v2737_v45 }
 0x44d   : > { %v2748_v49 = vmax.f32 %v2740_v60, %v2744_v6  ;;  %v2750_v54 = vmax.f32 %v2742_v9, %v2746_v16  ;;  %v2745_v39 = vrot.slane %v2741_v18, 4  ;;  %v2747_v43 = vrot.slane %v2743_v12, 4  ;;  %v3338_v16 = vld [vmem:[%s5666_s22 + $0x1] ss:$2 sm:$0xf] }
 0x44f   : > { %v2773_v50 = vadd.f32 %v2756_v31, %v2748_v49  ;;  %v2775_v58 = vadd.f32 %v2764_v61, %v2750_v54  ;;  %v2749_v13 = vmax.f32 %v2741_v18, %v2745_v39  ;;  %v2751_v48 = vmax.f32 %v2743_v12, %v2747_v43  ;;  %v2838_v49 = vld [vmem:[%s5666_s22] ss:$2 sm:$0xf] }
 0x451   : > { %v2781_v17 = vmul.f32 0.70710677, %v2773_v50  ;;  %v2783_v55 = vmul.f32 0.70710677, %v2775_v58  ;;  %v2774_v26 = vadd.f32 %v2760_v63, %v2749_v13  ;;  %v2776_v30 = vadd.f32 %v2768_v23, %v2751_v48 }
 0x452   : > { %v2777_v47 = vmul.f32 0.5, %v2773_v50  ;;  %v2779_v51 = vmul.f32 0.5, %v2775_v58  ;;  %v2881_v58 = vrot.slane %v3338_v16, %v4880_v1  ;;  %v2843_v13 = vrot.slane %v2838_v49, %v4880_v1 }
 0x453   : > { %3882 = verf.f32 %v2781_v17  ;;  %v2782_v32 = vmul.f32 0.70710677, %v2774_v26  ;;  %v2784_v7 = vmul.f32 0.70710677, %v2776_v30  ;;  %v2778_v0 = vmul.f32 0.5, %v2774_v26 }
 0x454   : > { %3884 = verf.f32 %v2783_v55  ;;  %v2780_v21 = vmul.f32 0.5, %v2776_v30  ;;  %v2885_v30 = vrot.slane %v3338_v16, %v4883_v2  ;;  %v2893_v1 = vrot.slane %v3338_v16, %v4963_v38 }
 0x455   : > { %3886 = verf.f32 %v2782_v32  ;;  %v2889_v32 = vrot.slane %v3338_v16, %v4958_v22 }
 0x456   : > { %3888 = verf.f32 %v2784_v7 }
 0x460   : > { %v3883_v41 = vpop.eup %3882 }
 0x461   : > { %v3885_v52 = vpop.eup %3884  ;;  %v2789_v27 = vadd.f32 1.0, %v3883_v41  ;;  %v2847_v41 = vrot.slane %v2838_v49, %v4883_v2 }
 0x462   : > { %v2791_v20 = vadd.f32 1.0, %v3885_v52  ;;  %v3887_v33 = vpop.eup %3886  ;;  %v2851_v52 = vrot.slane %v2838_v49, %v4958_v22 }
 0x463   : > { %v2793_v24 = vmul.f32 %v2789_v27, %v2777_v47  ;;  %v3889_v40 = vpop.eup %3888  ;;  %v2790_v10 = vadd.f32 1.0, %v3887_v33  ;;  %v2855_v33 = vrot.slane %v2838_v49, %v4963_v38 }
 0x464   : > { %v2795_v29 = vmul.f32 %v2791_v20, %v2779_v51  ;;  %v2792_v57 = vadd.f32 1.0, %v3889_v40 }
 0x465   : > { %v2805_v8 = vadd.f32 %v2801_v35, %v2793_v24  ;;  %v2794_v3 = vmul.f32 %v2790_v10, %v2778_v0 }
 0x466   : > { %v2807_v19 = vadd.f32 %v2803_v53, %v2795_v29  ;;  %v2796_v14 = vmul.f32 %v2792_v57, %v2780_v21 }
 0x467   : > { %v2809_v42 = vrot.slane %v2805_v8, 4  ;;  %v2806_v34 = vadd.f32 %v2802_v37, %v2794_v3 }
 0x468   : > { %v2821_v28 = vrot.slane %v2807_v19, 4  ;;  %v2808_v4 = vadd.f32 %v2804_v11, %v2796_v14 }
 0x469   : > { %v2810_v56 = vadd.f32 %v2809_v42, %v2805_v8  ;;  %v2815_v60 = vrot.slane %v2806_v34, 4 }
 0x46a   : > { %v2822_v5 = vadd.f32 %v2821_v28, %v2807_v19  ;;  %v2827_v31 = vrot.slane %v2808_v4, 4 }
 0x46b   : > { %v2811_v9 = vrot.slane %v2810_v56, 2  ;;  %v2816_v61 = vadd.f32 %v2815_v60, %v2806_v34 }
 0x46c   : > { %v2823_v62 = vrot.slane %v2822_v5, 2  ;;  %v2828_v6 = vadd.f32 %v2827_v31, %v2808_v4 }
 0x46d   : > { %v2812_v45 = vadd.f32 %v2811_v9, %v2810_v56  ;;  %v2817_v18 = vrot.slane %v2816_v61, 2 }
 0x46e   : > { %v2824_v12 = vadd.f32 %v2823_v62, %v2822_v5  ;;  %v2829_v39 = vrot.slane %v2828_v6, 2 }
 0x46f   : > { %v2813_v54 = vrot.slane %v2812_v45, 1  ;;  %v2818_v43 = vadd.f32 %v2817_v18, %v2816_v61 }
 0x470   : > { %v2825_v63 = vrot.slane %v2824_v12, 1  ;;  %v2830_v50 = vadd.f32 %v2829_v39, %v2828_v6 }
 0x471   : > { %v2814_v23 = vadd.f32 %v2813_v54, %v2812_v45  ;;  %v2819_v48 = vrot.slane %v2818_v43, 1 }
 0x472   : > { %v2826_v17 = vadd.f32 %v2825_v63, %v2824_v12  ;;  %v2831_v55 = vrot.slane %v2830_v50, 1 }
 0x473   : > { %v2833_v26 = vmul.f32 0.125, %v2814_v23  ;;  %v2820_v7 = vadd.f32 %v2819_v48, %v2818_v43 }
 0x474   : > { %v2835_v36 = vmul.f32 0.125, %v2826_v17  ;;  %v2832_v47 = vadd.f32 %v2831_v55, %v2830_v50 }
 0x475   : > { %v2898_v27 = vmul.f32 %v2881_v58, %v2833_v26  ;;  %v2860_v51 = vmul.f32 %v2843_v13, %v2833_v26  ;;  %v2834_v20 = vmul.f32 0.125, %v2820_v7 }
 0x476   : > { %v2836_v24 = vmul.f32 0.125, %v2832_v47  ;;  %v2900_v35 = vmul.f32 %v2889_v32, %v2835_v36  ;;  %v2862_v29 = vmul.f32 %v2851_v52, %v2835_v36 }
 0x477   : > { %v2899_v15 = vmul.f32 %v2885_v30, %v2834_v20  ;;  %v2861_v40 = vmul.f32 %v2847_v41, %v2834_v20  ;;  %v2902_v25 = vsel %vm1337_vm3, %v2898_v27, 0.0  ;;  %v2864_v53 = vsel %vm1337_vm3, %v2860_v51, 0.0 }
 0x478   : > { %v2901_v2 = vmul.f32 %v2893_v1, %v2836_v24  ;;  %v2863_v0 = vmul.f32 %v2855_v33, %v2836_v24  ;;  %v2905_v57 = vsel %vm1337_vm3, %v2900_v35, 0.0  ;;  %v2867_v38 = vsel %vm1337_vm3, %v2862_v29, 0.0 }
 0x479   : > { %v2903_v22 = vsel %vm1337_vm3, %v2899_v15, 0.0  ;;  %v2865_v10 = vsel %vm1337_vm3, %v2861_v40, 0.0 }
 0x47a   : > { %v2904_v8 = vadd.f32 %v2903_v22, %v2902_v25  ;;  %v2866_v21 = vadd.f32 %v2865_v10, %v2864_v53  ;;  %v2907_v59 = vsel %vm1337_vm3, %v2901_v2, 0.0  ;;  %v2869_v37 = vsel %vm1337_vm3, %v2863_v0, 0.0 }
 0x47c   : > { %v2906_v19 = vadd.f32 %v2905_v57, %v2904_v8  ;;  %v2868_v3 = vadd.f32 %v2867_v38, %v2866_v21 }
 0x47e   : > { %v2908_v42 = vadd.f32 %v2907_v59, %v2906_v19  ;;  %v2870_v14 = vadd.f32 %v2869_v37, %v2868_v3 }
 0x480   : > { %2909 = vadd.xlane.f32.xlu1 %v2908_v42  ;;  %2871 = vadd.xlane.f32.xlu0 %v2870_v14 }
 0x509   : > { %v2910_v11 = vpop.xlane.xlu1 %2909  ;;  %v2872_v28 = vpop.xlane.xlu0 %2871 }
 0x50a   : > { %v2873_v34 = vsel %vm1335_vm2, %v2872_v28, 0.0  ;;  %v2911_v4 = vsel %vm1349_vm4, %v2910_v11, 0.0 }
 0x50b   : > { %v2874_v56 = vadd.f32 %v2873_v34, %v2837_v46 }
 0x50d   : > { %v2912_v5 = vadd.f32 %v2911_v4, %v2874_v56 }
 0x50f   : > { %2913 = vst [vmem:[%s887_s18] sm:$0x1] %v2912_v5 }
 0x510 PF: > { %s3339_s15 = sshll.u32 %s4329_s0, 4  ;;  %s5667_s4 = sld [smem:[#allocation63_spill]] }
 0x511   : > { %s2931_s30 = sshll.u32 %s887_s18, 4  ;;  %s2915_s29 = scalar_lea.sflag [#allocation8], %s4735_s6  ;;  %s2932_s30 = int_to_ptr.vmem [resolvable:$true] %s2931_s30 }
 0x512   : > { %s4167_s28 = scalar_lea.vmem %s2932_s30, 16  ;;  %s4359_s10 = smov [#allocation23]  }
 0x513   : > { %p4168_p12 = scmp.ne.s32.totalorder %s2932_s30, %s4167_s28  ;;  %s4171_s16 = sshll.u32 %s4359_s10, 4  ;;  %s4172_s16 = int_to_ptr.vmem [resolvable:$false] %s4171_s16 }
 0x514   : > { %s4173_s20 = scalar_lea.vmem %s4172_s16, 32  ;;  %p4174_p7 = scmp.lt.s32.totalorder %s2932_s30, %s4172_s16 }
 0x515   : > { %p4169_p6 = pnand %p4168_p12, %p4646_p3  ;;  %p4175_p8 = scmp.lt.s32.totalorder %s4173_s20, %s4167_s28 }
 0x516   : > { %s5668_s8 = smov %s5667_s4  ;;  %s2929_s26 = scalar_lea.hbm %s5667_s4, %s3339_s15 }
 0x517   : > { %p4170_p13 = pneg %p4169_p6  ;;  %p4176_p9 = por %p4175_p8, %p4174_p7 }
 0x519   : > { %p4177_p10 = pnand %p4176_p9, %p4170_p13 }
 0x51b   : > { %4180 = shalt.err (!%p4177_p10)
}
 0x51c   : > { %s4181_s17 = scalar_lea.hbm %s2929_s26, 16  ;;  %s4185_s27 = scalar_lea.hbm %s5668_s8, 32 }
 0x51d   : > { %p4182_p4 = scmp.ne.s32.totalorder %s2929_s26, %s4181_s17  ;;  %p4186_p5 = scmp.lt.s32.totalorder %s2929_s26, %s5668_s8 }
 0x51e   : > { %p4187_p2 = scmp.lt.s32.totalorder %s4185_s27, %s4181_s17 }
 0x51f   : > { %p4183_p11 = pnand %p4182_p4, %p4646_p3 }
 0x520   : > { %p4188_p12 = por %p4187_p2, %p4186_p5 }
 0x521   : > { %p4184_p1 = pneg %p4183_p11 }
 0x523   : > { %p4189_p6 = pnand %p4188_p12, %p4184_p1 }
 0x525   : > { %4192 = shalt.err (!%p4189_p6)
}
 0x526   : > { %3537 = dma.vmem_to_hbm [thread:$0]  (%p4646_p3), %s2932_s30, 16, %s2929_s26, %s2915_s29  }
 0x527   : > { %s5669_s28 = sld [smem:[#allocation64_spill]]  ;;  %s2944_s20 = sshll.u32 %s893_s23, 4  ;;  %s2945_s20 = int_to_ptr.vmem [resolvable:$true] %s2944_s20 }
 0x528   : > { %s2919_s18 = scalar_lea.sflag [#allocation25], %s4735_s6  ;;  %s4193_s17 = scalar_lea.vmem %s2945_s20, 16 }
 0x529   : > { %p4194_p13 = scmp.ne.s32.totalorder %s2945_s20, %s4193_s17  ;;  %s4360_s7 = smov [#allocation24]  }
 0x52a   : > { %s4197_s27 = sshll.u32 %s4360_s7, 4  ;;  %s4198_s27 = int_to_ptr.vmem [resolvable:$false] %s4197_s27 }
 0x52b   : > { %p4195_p7 = pnand %p4194_p13, %p4646_p3  ;;  %s4199_s11 = scalar_lea.vmem %s4198_s27, 32 }
 0x52c   : > { %p4200_p9 = scmp.lt.s32.totalorder %s2945_s20, %s4198_s27  ;;  %p4201_p10 = scmp.lt.s32.totalorder %s4199_s11, %s4193_s17 }
 0x52d   : > { %s5670_s10 = smov %s5669_s28  ;;  %s2942_s16 = scalar_lea.hbm %s5669_s28, %s3339_s15 }
 0x52e   : > { %p4196_p8 = pneg %p4195_p7  ;;  %p4202_p4 = por %p4201_p10, %p4200_p9 }
 0x530   : > { %p4203_p11 = pnand %p4202_p4, %p4196_p8 }
 0x532   : > { %4206 = shalt.err (!%p4203_p11)
}
 0x533   : > { %s4207_s0 = scalar_lea.hbm %s2942_s16, 16  ;;  %s4211_s15 = scalar_lea.hbm %s5670_s10, 32 }
 0x534   : > { %p4208_p1 = scmp.ne.s32.totalorder %s2942_s16, %s4207_s0  ;;  %p4212_p12 = scmp.lt.s32.totalorder %s2942_s16, %s5670_s10 }
 0x535   : > { %p4213_p6 = scmp.lt.s32.totalorder %s4211_s15, %s4207_s0 }
 0x536   : > { %p4209_p5 = pnand %p4208_p1, %p4646_p3 }
 0x537   : > { %p4214_p13 = por %p4213_p6, %p4212_p12 }
 0x538   : > { %p4210_p2 = pneg %p4209_p5 }
 0x53a   : > { %p4215_p7 = pnand %p4214_p13, %p4210_p2 }
 0x53c   : > { %4218 = shalt.err (!%p4215_p7)
}
 0x53d   : > { %3538 = dma.vmem_to_hbm [thread:$0]  (%p4646_p3), %s2945_s20, 16, %s2942_s16, %s2919_s18  }
 0x53e PF: > { %p3597_p8 = scmp.ge.s32.totalorder %s4341_s5, 2  ;;  %s2956_s29 = sand.u32 1, %s4301_s2  }
 0x53f   : > { %s2957_s1 = scalar_lea.sflag [#allocation8], %s2956_s29 }
 0x540   : > { %p3574_p9 = pnand %p3597_p8, %p4660_p0 }
 0x542   : > { %p3575_p10 = pneg %p3574_p9 }
 0x544   : > { %4292 = dma.done.wait (%p3575_p10), %s2957_s1, 16  }
 0x545   : > { %4294 = vsyncadd (%p3575_p10), %s2957_s1, 4294967280  ;;  %s2965_s12 = scalar_lea.sflag [#allocation25], %s2956_s29 }
 0x546   : > { %4296 = dma.done.wait (%p3575_p10), %s2965_s12, 16  }
 0x547   : > { %4298 = vsyncadd (%p3575_p10), %s2965_s12, 4294967280  ;;  %s48_s5 = sadd.s32 1, %s4341_s5   ;;  %s5671_s13 = sld [smem:[#allocation35_spill]] }
 0x548   : > { %p45_p4 = scmp.ge.s32.totalorder %s48_s5, 6   ;;  %s5672_s26 = sld [smem:[#allocation41_spill]] }
 0x549   : > { %s5673_s4 = sld [smem:[#allocation36_spill]]  ;;  %s5679_s2 = smov %s4305_s25 }
 0x54a   : > { %s5674_s28 = sld [smem:[#allocation42_spill]]  ;;  %s5681_s27 = smov %s4317_s3 }
 0x54b   : > { %s5675_s29 = sld [smem:[#allocation37_spill]] }
 0x54c   : > { %s5676_s0 = sld [smem:[#allocation38_spill]] }
 0x54d   : > { %s5677_s9 = sld [smem:[#allocation39_spill]]  ;;  %s5680_s25 = smov %s5671_s13 }
 0x54e   : > { %s5678_s30 = sld [smem:[#allocation40_spill]] }
 0x54f   : > { %s5682_s3 = smov %s5673_s4  ;;  %47 = sbr.rel (!%p45_p4) target bundleno = 40 (0x28), region = 224 }
 0x553   : > { %s5683_s4 = smov %s5677_s9 }
 0x554   :  { %2969 = vsyncpa [#allocation7], 1 }
 0x555   :  { %2971 = vsyncpa [#allocation7 + $0x1], 1 }
 0x556   :  { %2972 = vsyncpa [#allocation10], 1 }
 0x557   :  { %2974 = vsyncpa [#allocation10 + $0x1], 1 }
 0x558   :  { %2975 = vsyncpa [#allocation13], 1 }
 0x559   :  { %2976 = vsyncpa [#allocation16], 1 }
 0x55a   :  { %2977 = vsyncpa [#allocation19], 1 }
 0x55b   :  { %2978 = vsyncpa [#allocation22], 1 }
 0x55c   :  { %2979 = vsyncpa [#allocation8], 1 }
 0x55d   :  { %2981 = vsyncpa [#allocation8 + $0x1], 1 }
 0x55e   :  { %2982 = vsyncpa [#allocation25], 1 }
 0x55f   :  { %2984 = vsyncpa [#allocation25 + $0x1], 1 }

</bundles_post_ra>
